<compile_context>
chip_gen: v7x
topology: tpu7x:2x2x1
jax: 0.10.0
libtpu: 0.0.40
codegen_flags: <defaults>
</compile_context>

<pallas_src>
import jax
import jax.numpy as jnp
import numpy as np
from jax import lax
from jax.experimental import pallas as pl
from jax.experimental.pallas import tpu as pltpu  # noqa: F401  (TPU backend; no TPU-only params needed)

# ---------------- configuration (small, consistent with the module) ----------------
B = 2                      # batch size (<= 3 -> softmax attention branch)
T = 8                      # listener time steps
LISTENER_HIDDEN = 16
FEAT = 2 * LISTENER_HIDDEN          # listener feature dim (= 2*listener_hidden_dim)
HID = FEAT                          # speller_hidden_dim (must equal FEAT for shapes to work)
LABEL = 10                          # output_class_dim
NL = 2                              # speller_rnn_layer
MAXLEN = 5                          # max_label_len
IN0 = LABEL + HID                   # LSTM layer-0 input dim
G4 = 4 * HID                        # fused gate width (= 128 -> exactly one f32 vreg lane span)
OUT_LANES = 128                     # fused, lane-dense output slab width (pred | attn | pad)


# ---------------------------------- Pallas kernel ----------------------------------
def _speller_kernel(lf_ref, onehot_ref,
                    wp0_ref, wc0_ref, whh0_ref, b0_ref,
                    wih1_ref, whh1_ref, b1_ref,
                    wcdr_ref, wcdc_ref, bcd_ref,
                    out_ref):
    """Entire Speller.forward (all MAXLEN decode steps) in one grid-free kernel invocation."""
    # Hoist only the operands of the serial per-cell recurrence (low vreg pressure); operands
    # used once per step are read from VMEM at their use site (3 vld slots hide the re-reads).
    whh0 = whh0_ref[...]        # (HID, 4*HID)
    wih1 = wih1_ref[...]        # (HID, 4*HID)
    whh1 = whh1_ref[...]        # (HID, 4*HID)
    b1 = b1_ref[...]            # (1, 4*HID)
    lf = lf_ref[...]            # (B, T, FEAT)   (~2 vregs)

    # Constant lane masks for the fused gate activation: one sigmoid pass over the whole
    # (1, 128) gate vreg; g-gate lanes are pre-scaled by 2 and fixed up with
    # tanh(x) = 2*sigmoid(2x) - 1.  PyTorch i/f/g/o gate order preserved.
    lane = lax.broadcasted_iota(jnp.int32, (1, G4), 1)
    is_g = (lane >= 2 * HID) & (lane < 3 * HID)
    pre_scale = jnp.where(is_g, jnp.float32(2.0), jnp.float32(1.0))
    post_mul = pre_scale
    post_add = jnp.where(is_g, jnp.float32(-1.0), jnp.float32(0.0))

    def fdot(a, b):
        return jnp.dot(a, b, preferred_element_type=jnp.float32)

    def gate_combine(gates, c):
        act = jax.nn.sigmoid(gates * pre_scale) * post_mul + post_add   # single EUP pass
        i_g = act[:, 0 * HID:1 * HID]
        f_g = act[:, 1 * HID:2 * HID]
        g_g = act[:, 2 * HID:3 * HID]
        o_g = act[:, 3 * HID:4 * HID]
        c_new = f_g * c + i_g * g_g
        h_new = o_g * jnp.tanh(c_new)
        return h_new, c_new

    # Batched layer-0 input projection for a (output_word, context) pair.  Replaces the
    # unaligned concat([word, ctx]) @ W_ih0 with two lane-aligned matmuls (W_ih0 split host-side).
    def layer0_input_proj(word, ctx):
        return fdot(word, wp0_ref[...]) + fdot(ctx, wc0_ref[...]) + b0_ref[...]   # (B, 4*HID)

    # Shared LSTM state, carried across batch-as-pseudo-time and across decode steps.
    h = [jnp.zeros((1, HID), jnp.float32) for _ in range(NL)]
    c = [jnp.zeros((1, HID), jnp.float32) for _ in range(NL)]

    # Initial rnn_input = cat([onehot(0), listener_feature[:, 0, :]]) expressed concat-free.
    xin_proj = layer0_input_proj(onehot_ref[...], lf[:, 0, :])          # (B, 4*HID)

    pad = jnp.zeros((B, OUT_LANES - LABEL - T), jnp.float32)

    # MAXLEN=5 -> fully unrolled.  (If MAXLEN is ever scaled up, convert to lax.fori_loop
    # carrying (h, c, xin_proj) so live ranges stay bounded.)
    for s in range(MAXLEN):
        # ---- multi-layer LSTM scanning the batch axis as pseudo-time (PyTorch quirk).
        #      Layer-0 input projection is already hoisted out of this serial loop. ----
        outs = []
        for b in range(B):
            g0 = xin_proj[b:b + 1, :] + fdot(h[0], whh0)
            h[0], c[0] = gate_combine(g0, c[0])
            x = h[0]
            for l in range(1, NL):
                gl = fdot(x, wih1) + fdot(h[l], whh1) + b1
                h[l], c[l] = gate_combine(gl, c[l])
                x = h[l]
            outs.append(x)                              # top-layer output for batch element b
        rnn_out = jnp.concatenate(outs, axis=0)         # (B, HID)

        # ---- dot attention, exact softmax (reductions stay on VPU/XLU) ----
        energy = jnp.sum(rnn_out[:, None, :] * lf, axis=-1)             # (B, T)
        m = jnp.max(energy, axis=-1, keepdims=True)
        e = jnp.exp(energy - m)
        score = e / jnp.sum(e, axis=-1, keepdims=True)                  # exact; feeds back
        context = jnp.sum(lf * score[:, :, None], axis=1)               # (B, FEAT)

        # ---- character distribution (concat-free: weight split into rnn/context row blocks) ----
        logits = fdot(rnn_out, wcdr_ref[...]) + fdot(context, wcdc_ref[...]) + bcd_ref[...]
        lmax = jnp.max(logits, axis=-1, keepdims=True)
        lse = jnp.log(jnp.sum(jnp.exp(logits - lmax), axis=-1, keepdims=True)) + lmax
        raw_pred = logits - lse                                         # LogSoftmax

        # ---- fused lane-dense output slab: pred in lanes [0,LABEL), attention in
        #      lanes [LABEL, LABEL+T); unmasked 128-lane store, single writeback DMA ----
        slab = jnp.concatenate([raw_pred, score, pad], axis=-1)         # (B, 128)
        out_ref[pl.ds(s, 1), :, :] = slab[None, :, :]

        if s < MAXLEN - 1:                              # skip dead work at the last step
            # next rnn_input = cat([raw_pred, context]) (no teacher forcing), concat-free
            xin_proj = layer0_input_proj(raw_pred, context)


def speller_pallas(listener_feature, onehot0, kernel_params):
    """Runs the full decode as a single grid-free Pallas call (everything VMEM-resident)."""
    (wp0, wc0, whh0, b0, wih1, whh1, b1, wcd_r, wcd_c, bcd2) = kernel_params
    args = (listener_feature, onehot0, wp0, wc0, whh0, b0, wih1, whh1, b1, wcd_r, wcd_c, bcd2)

    # Small advisory cost estimate so XLA schedules the custom call sensibly.
    flops_step = (2 * B * IN0 * G4            # batched layer-0 input projection
                  + B * 2 * HID * G4          # layer-0 recurrent matmul (per batch element)
                  + B * 2 * 2 * HID * G4      # layer-1 matmuls
                  + 4 * B * T * FEAT          # attention energy + context reductions
                  + 2 * B * 2 * HID * LABEL)  # character distribution
    trans_step = B * NL * (G4 + HID) + B * T + B * LABEL
    bytes_acc = 4 * (sum(int(np.prod(a.shape)) for a in args) + MAXLEN * B * OUT_LANES)

    out = pl.pallas_call(
        _speller_kernel,
        out_shape=jax.ShapeDtypeStruct((MAXLEN, B, OUT_LANES), jnp.float32),
        cost_estimate=pl.CostEstimate(flops=MAXLEN * flops_step,
                                      transcendentals=MAXLEN * trans_step,
                                      bytes_accessed=bytes_acc),
    )(*args)

    # Slice the fused slab apart (layout plumbing only, outside the kernel).
    return out[:, :, :LABEL], out[:, :, LABEL:LABEL + T]


# ------------------------------ pure-JAX reference ------------------------------
def _lstm_cell_ref(x, h, c, wih, whh, bias):
    gates = wih @ x + whh @ h + bias
    i = jax.nn.sigmoid(gates[0:HID])
    f = jax.nn.sigmoid(gates[HID:2 * HID])
    g = jnp.tanh(gates[2 * HID:3 * HID])
    o = jax.nn.sigmoid(gates[3 * HID:4 * HID])
    c_new = f * c + i * g
    h_new = o * jnp.tanh(c_new)
    return h_new, c_new


def speller_reference(lf, onehot0, raw):
    wih, whh, bias, wcd, bcd = raw
    h = jnp.zeros((NL, HID), jnp.float32)
    c = jnp.zeros((NL, HID), jnp.float32)
    x_in = jnp.concatenate([onehot0, lf[:, 0, :]], axis=-1)
    preds, attns = [], []
    for _ in range(MAXLEN):
        ro = []
        for bb in range(B):                       # LSTM scans batch as pseudo-time
            x = x_in[bb]
            for l in range(NL):
                hn, cn = _lstm_cell_ref(x, h[l], c[l], wih[l], whh[l], bias[l])
                h = h.at[l].set(hn)
                c = c.at[l].set(cn)
                x = hn
            ro.append(x)
        rnn_out = jnp.stack(ro)                   # (B, HID)
        energy = jnp.sum(rnn_out[:, None, :] * lf, axis=-1)
        score = jax.nn.softmax(energy, axis=-1)
        context = jnp.sum(lf * score[:, :, None], axis=1)
        logits = jnp.concatenate([rnn_out, context], axis=-1) @ wcd.T + bcd
        raw_pred = jax.nn.log_softmax(logits, axis=-1)
        preds.append(raw_pred)
        attns.append(score)
        x_in = jnp.concatenate([raw_pred, context], axis=-1)
    return jnp.stack(preds), jnp.stack(attns)


# ------------------------------------- main -------------------------------------
if __name__ == "__main__":
    key = jax.random.PRNGKey(0)
    keys = jax.random.split(key, 16)

    def uni(k, shape, fan):
        bound = 1.0 / np.sqrt(fan)
        return jax.random.uniform(k, shape, jnp.float32, -bound, bound)

    # deterministic "PyTorch-like" parameter init
    wih_l = [uni(keys[0], (4 * HID, IN0), HID), uni(keys[1], (4 * HID, HID), HID)]
    whh_l = [uni(keys[2], (4 * HID, HID), HID), uni(keys[3], (4 * HID, HID), HID)]
    bih_l = [uni(keys[4], (4 * HID,), HID), uni(keys[5], (4 * HID,), HID)]
    bhh_l = [uni(keys[6], (4 * HID,), HID), uni(keys[7], (4 * HID,), HID)]
    wcd = uni(keys[8], (LABEL, 2 * HID), 2 * HID)
    bcd = uni(keys[9], (LABEL,), 2 * HID)

    listener_feature = jax.random.normal(keys[10], (B, T, FEAT), jnp.float32)
    onehot0 = jnp.zeros((B, LABEL), jnp.float32).at[:, 0].set(1.0)   # CreateOnehotVariable(zeros)

    # Kernel-friendly packing (all exact math, i/f/g/o gate order kept through the transpose):
    #   * fused per-layer gate weights pre-transposed to (in_dim, 4*HID),
    #   * W_ih0 split into its output_word / context row blocks (concat-free feedback path),
    #   * char-dist weight split into rnn_out / context row blocks,
    #   * per-layer biases pre-summed (b_ih + b_hh).
    wih0_t = wih_l[0].T                                   # (IN0, 4*HID)
    wcd_t = wcd.T                                         # (2*HID, LABEL)
    kernel_params = (
        wih0_t[:LABEL, :],                                # W_ih0 word block   (LABEL, 4*HID)
        wih0_t[LABEL:, :],                                # W_ih0 context block (HID, 4*HID)
        whh_l[0].T,                                       # W_hh0              (HID, 4*HID)
        (bih_l[0] + bhh_l[0]).reshape(1, G4),             # fused bias layer 0
        wih_l[1].T,                                       # W_ih1              (HID, 4*HID)
        whh_l[1].T,                                       # W_hh1              (HID, 4*HID)
        (bih_l[1] + bhh_l[1]).reshape(1, G4),             # fused bias layer 1
        wcd_t[:HID, :],                                   # char-dist rnn block  (HID, LABEL)
        wcd_t[HID:, :],                                   # char-dist ctx block  (HID, LABEL)
        bcd.reshape(1, LABEL),                            # char-dist bias
    )

    pred_seq, attn_rec = jax.block_until_ready(
        speller_pallas(listener_feature, onehot0, kernel_params))

    # Sanity check against a pure-JAX reference of the same forward pass.
    # (Tolerance absorbs the tanh(x)=2*sigmoid(2x)-1 fusion and f32 accumulation-order diffs.)
    ref_pred, ref_attn = speller_reference(
        listener_feature, onehot0,
        (wih_l, whh_l, [bih_l[0] + bhh_l[0], bih_l[1] + bhh_l[1]], wcd, bcd))
    np.testing.assert_allclose(np.asarray(pred_seq), np.asarray(ref_pred), rtol=2e-3, atol=2e-3)
    np.testing.assert_allclose(np.asarray(attn_rec), np.asarray(ref_attn), rtol=2e-3, atol=2e-3)

    print("KERNEL_OK")
</pallas_src>

<mosaic_0001>
module attributes {stable_mosaic.version = 11 : i64} {
  func.func @_speller_kernel(%arg0: memref<2x8x32xf32, #tpu.memory_space<vmem>>, %arg1: memref<2x10xf32, #tpu.memory_space<vmem>>, %arg2: memref<10x128xf32, #tpu.memory_space<vmem>>, %arg3: memref<32x128xf32, #tpu.memory_space<vmem>>, %arg4: memref<32x128xf32, #tpu.memory_space<vmem>>, %arg5: memref<1x128xf32, #tpu.memory_space<vmem>>, %arg6: memref<32x128xf32, #tpu.memory_space<vmem>>, %arg7: memref<32x128xf32, #tpu.memory_space<vmem>>, %arg8: memref<1x128xf32, #tpu.memory_space<vmem>>, %arg9: memref<32x10xf32, #tpu.memory_space<vmem>>, %arg10: memref<32x10xf32, #tpu.memory_space<vmem>>, %arg11: memref<1x10xf32, #tpu.memory_space<vmem>>, %arg12: memref<5x2x128xf32, #tpu.memory_space<vmem>>) attributes {dimension_semantics = [], scalar_prefetch = 0 : i64, scratch_operands = 0 : i64, tpu.core_type = #tpu.core_type<tc>} {
    %c0 = arith.constant 0 : index
    %c0_0 = arith.constant 0 : index
    %0 = vector.load %arg4[%c0, %c0_0] : memref<32x128xf32, #tpu.memory_space<vmem>>, vector<32x128xf32>
    %c0_1 = arith.constant 0 : index
    %c0_2 = arith.constant 0 : index
    %1 = vector.load %arg6[%c0_1, %c0_2] : memref<32x128xf32, #tpu.memory_space<vmem>>, vector<32x128xf32>
    %c0_3 = arith.constant 0 : index
    %c0_4 = arith.constant 0 : index
    %2 = vector.load %arg7[%c0_3, %c0_4] : memref<32x128xf32, #tpu.memory_space<vmem>>, vector<32x128xf32>
    %c0_5 = arith.constant 0 : index
    %c0_6 = arith.constant 0 : index
    %3 = vector.load %arg8[%c0_5, %c0_6] : memref<1x128xf32, #tpu.memory_space<vmem>>, vector<1x128xf32>
    %c0_7 = arith.constant 0 : index
    %c0_8 = arith.constant 0 : index
    %c0_9 = arith.constant 0 : index
    %4 = vector.load %arg0[%c0_7, %c0_8, %c0_9] : memref<2x8x32xf32, #tpu.memory_space<vmem>>, vector<2x8x32xf32>
    %5 = tpu.iota {dimensions = array<i32: 1>} : vector<1x128xi32>
    %c64_i32 = arith.constant 64 : i32
    %6 = vector.broadcast %c64_i32 : i32 to vector<1x128xi32>
    %7 = arith.cmpi sge, %5, %6 : vector<1x128xi32>
    %c96_i32 = arith.constant 96 : i32
    %8 = vector.broadcast %c96_i32 : i32 to vector<1x128xi32>
    %9 = arith.cmpi slt, %5, %8 : vector<1x128xi32>
    %10 = arith.andi %7, %9 : vector<1x128xi1>
    %cst = arith.constant 2.000000e+00 : f32
    %cst_10 = arith.constant 1.000000e+00 : f32
    %11 = vector.broadcast %cst : f32 to vector<1x128xf32>
    %12 = vector.broadcast %cst_10 : f32 to vector<1x128xf32>
    %13 = arith.select %10, %11, %12 : vector<1x128xi1>, vector<1x128xf32>
    %cst_11 = arith.constant -1.000000e+00 : f32
    %cst_12 = arith.constant 0.000000e+00 : f32
    %14 = vector.broadcast %cst_11 : f32 to vector<1x128xf32>
    %15 = vector.broadcast %cst_12 : f32 to vector<1x128xf32>
    %16 = arith.select %10, %14, %15 : vector<1x128xi1>, vector<1x128xf32>
    %cst_13 = arith.constant 0.000000e+00 : f32
    %17 = vector.broadcast %cst_13 : f32 to vector<1x32xf32>
    %cst_14 = arith.constant 0.000000e+00 : f32
    %18 = vector.broadcast %cst_14 : f32 to vector<1x32xf32>
    %cst_15 = arith.constant 0.000000e+00 : f32
    %19 = vector.broadcast %cst_15 : f32 to vector<1x32xf32>
    %cst_16 = arith.constant 0.000000e+00 : f32
    %20 = vector.broadcast %cst_16 : f32 to vector<1x32xf32>
    %c0_17 = arith.constant 0 : index
    %c0_18 = arith.constant 0 : index
    %21 = vector.load %arg1[%c0_17, %c0_18] : memref<2x10xf32, #tpu.memory_space<vmem>>, vector<2x10xf32>
    %22 = vector.extract_strided_slice %4 {offsets = [0, 0, 0], sizes = [2, 1, 32], strides = [1, 1, 1]} : vector<2x8x32xf32> to vector<2x1x32xf32>
    %23 = vector.shape_cast %22 : vector<2x1x32xf32> to vector<2x32xf32>
    %c0_19 = arith.constant 0 : index
    %c0_20 = arith.constant 0 : index
    %24 = vector.load %arg2[%c0_19, %c0_20] : memref<10x128xf32, #tpu.memory_space<vmem>>, vector<10x128xf32>
    %cst_21 = arith.constant dense<0.000000e+00> : vector<2x128xf32>
    %25 = tpu.matmul %21, %24, %cst_21 {dimension_numbers = #tpu.dot_dimension_numbers<[1], [0], [0], [1], [0, 0, 1, 1], [], []>} : vector<2x10xf32>, vector<10x128xf32>, vector<2x128xf32> -> vector<2x128xf32>
    %c0_22 = arith.constant 0 : index
    %c0_23 = arith.constant 0 : index
    %26 = vector.load %arg3[%c0_22, %c0_23] : memref<32x128xf32, #tpu.memory_space<vmem>>, vector<32x128xf32>
    %cst_24 = arith.constant dense<0.000000e+00> : vector<2x128xf32>
    %27 = tpu.matmul %23, %26, %cst_24 {dimension_numbers = #tpu.dot_dimension_numbers<[1], [0], [0], [1], [0, 0, 1, 1], [], []>} : vector<2x32xf32>, vector<32x128xf32>, vector<2x128xf32> -> vector<2x128xf32>
    %28 = arith.addf %25, %27 : vector<2x128xf32>
    %c0_25 = arith.constant 0 : index
    %c0_26 = arith.constant 0 : index
    %29 = vector.load %arg5[%c0_25, %c0_26] : memref<1x128xf32, #tpu.memory_space<vmem>>, vector<1x128xf32>
    %30 = vector.broadcast %29 : vector<1x128xf32> to vector<2x128xf32>
    %31 = arith.addf %28, %30 : vector<2x128xf32>
    %cst_27 = arith.constant 0.000000e+00 : f32
    %32 = vector.broadcast %cst_27 : f32 to vector<2x110xf32>
    %33 = vector.extract_strided_slice %31 {offsets = [0, 0], sizes = [1, 128], strides = [1, 1]} : vector<2x128xf32> to vector<1x128xf32>
    %cst_28 = arith.constant dense<0.000000e+00> : vector<1x128xf32>
    %34 = tpu.matmul %17, %0, %cst_28 {dimension_numbers = #tpu.dot_dimension_numbers<[1], [0], [0], [1], [0, 0, 1, 1], [], []>} : vector<1x32xf32>, vector<32x128xf32>, vector<1x128xf32> -> vector<1x128xf32>
    %35 = arith.addf %33, %34 : vector<1x128xf32>
    %36 = arith.mulf %35, %13 : vector<1x128xf32>
    %37 = arith.negf %36 : vector<1x128xf32>
    %38 = math.exp %37 : vector<1x128xf32>
    %cst_29 = arith.constant 1.000000e+00 : f32
    %39 = vector.broadcast %cst_29 : f32 to vector<1x128xf32>
    %40 = arith.addf %39, %38 : vector<1x128xf32>
    %41 = arith.divf %39, %40 : vector<1x128xf32>
    %42 = arith.mulf %41, %13 : vector<1x128xf32>
    %43 = arith.addf %42, %16 : vector<1x128xf32>
    %44 = vector.extract_strided_slice %43 {offsets = [0, 0], sizes = [1, 32], strides = [1, 1]} : vector<1x128xf32> to vector<1x32xf32>
    %45 = vector.extract_strided_slice %43 {offsets = [0, 32], sizes = [1, 32], strides = [1, 1]} : vector<1x128xf32> to vector<1x32xf32>
    %46 = vector.extract_strided_slice %43 {offsets = [0, 64], sizes = [1, 32], strides = [1, 1]} : vector<1x128xf32> to vector<1x32xf32>
    %47 = vector.extract_strided_slice %43 {offsets = [0, 96], sizes = [1, 32], strides = [1, 1]} : vector<1x128xf32> to vector<1x32xf32>
    %48 = arith.mulf %45, %19 : vector<1x32xf32>
    %49 = arith.mulf %44, %46 : vector<1x32xf32>
    %50 = arith.addf %48, %49 : vector<1x32xf32>
    %51 = math.tanh %50 : vector<1x32xf32>
    %52 = arith.mulf %47, %51 : vector<1x32xf32>
    %cst_30 = arith.constant dense<0.000000e+00> : vector<1x128xf32>
    %53 = tpu.matmul %52, %1, %cst_30 {dimension_numbers = #tpu.dot_dimension_numbers<[1], [0], [0], [1], [0, 0, 1, 1], [], []>} : vector<1x32xf32>, vector<32x128xf32>, vector<1x128xf32> -> vector<1x128xf32>
    %cst_31 = arith.constant dense<0.000000e+00> : vector<1x128xf32>
    %54 = tpu.matmul %18, %2, %cst_31 {dimension_numbers = #tpu.dot_dimension_numbers<[1], [0], [0], [1], [0, 0, 1, 1], [], []>} : vector<1x32xf32>, vector<32x128xf32>, vector<1x128xf32> -> vector<1x128xf32>
    %55 = arith.addf %53, %54 : vector<1x128xf32>
    %56 = arith.addf %55, %3 : vector<1x128xf32>
    %57 = arith.mulf %56, %13 : vector<1x128xf32>
    %58 = arith.negf %57 : vector<1x128xf32>
    %59 = math.exp %58 : vector<1x128xf32>
    %cst_32 = arith.constant 1.000000e+00 : f32
    %60 = vector.broadcast %cst_32 : f32 to vector<1x128xf32>
    %61 = arith.addf %60, %59 : vector<1x128xf32>
    %62 = arith.divf %60, %61 : vector<1x128xf32>
    %63 = arith.mulf %62, %13 : vector<1x128xf32>
    %64 = arith.addf %63, %16 : vector<1x128xf32>
    %65 = vector.extract_strided_slice %64 {offsets = [0, 0], sizes = [1, 32], strides = [1, 1]} : vector<1x128xf32> to vector<1x32xf32>
    %66 = vector.extract_strided_slice %64 {offsets = [0, 32], sizes = [1, 32], strides = [1, 1]} : vector<1x128xf32> to vector<1x32xf32>
    %67 = vector.extract_strided_slice %64 {offsets = [0, 64], sizes = [1, 32], strides = [1, 1]} : vector<1x128xf32> to vector<1x32xf32>
    %68 = vector.extract_strided_slice %64 {offsets = [0, 96], sizes = [1, 32], strides = [1, 1]} : vector<1x128xf32> to vector<1x32xf32>
    %69 = arith.mulf %66, %20 : vector<1x32xf32>
    %70 = arith.mulf %65, %67 : vector<1x32xf32>
    %71 = arith.addf %69, %70 : vector<1x32xf32>
    %72 = math.tanh %71 : vector<1x32xf32>
    %73 = arith.mulf %68, %72 : vector<1x32xf32>
    %74 = vector.extract_strided_slice %31 {offsets = [1, 0], sizes = [1, 128], strides = [1, 1]} : vector<2x128xf32> to vector<1x128xf32>
    %cst_33 = arith.constant dense<0.000000e+00> : vector<1x128xf32>
    %75 = tpu.matmul %52, %0, %cst_33 {dimension_numbers = #tpu.dot_dimension_numbers<[1], [0], [0], [1], [0, 0, 1, 1], [], []>} : vector<1x32xf32>, vector<32x128xf32>, vector<1x128xf32> -> vector<1x128xf32>
    %76 = arith.addf %74, %75 : vector<1x128xf32>
    %77 = arith.mulf %76, %13 : vector<1x128xf32>
    %78 = arith.negf %77 : vector<1x128xf32>
    %79 = math.exp %78 : vector<1x128xf32>
    %cst_34 = arith.constant 1.000000e+00 : f32
    %80 = vector.broadcast %cst_34 : f32 to vector<1x128xf32>
    %81 = arith.addf %80, %79 : vector<1x128xf32>
    %82 = arith.divf %80, %81 : vector<1x128xf32>
    %83 = arith.mulf %82, %13 : vector<1x128xf32>
    %84 = arith.addf %83, %16 : vector<1x128xf32>
    %85 = vector.extract_strided_slice %84 {offsets = [0, 0], sizes = [1, 32], strides = [1, 1]} : vector<1x128xf32> to vector<1x32xf32>
    %86 = vector.extract_strided_slice %84 {offsets = [0, 32], sizes = [1, 32], strides = [1, 1]} : vector<1x128xf32> to vector<1x32xf32>
    %87 = vector.extract_strided_slice %84 {offsets = [0, 64], sizes = [1, 32], strides = [1, 1]} : vector<1x128xf32> to vector<1x32xf32>
    %88 = vector.extract_strided_slice %84 {offsets = [0, 96], sizes = [1, 32], strides = [1, 1]} : vector<1x128xf32> to vector<1x32xf32>
    %89 = arith.mulf %86, %50 : vector<1x32xf32>
    %90 = arith.mulf %85, %87 : vector<1x32xf32>
    %91 = arith.addf %89, %90 : vector<1x32xf32>
    %92 = math.tanh %91 : vector<1x32xf32>
    %93 = arith.mulf %88, %92 : vector<1x32xf32>
    %cst_35 = arith.constant dense<0.000000e+00> : vector<1x128xf32>
    %94 = tpu.matmul %93, %1, %cst_35 {dimension_numbers = #tpu.dot_dimension_numbers<[1], [0], [0], [1], [0, 0, 1, 1], [], []>} : vector<1x32xf32>, vector<32x128xf32>, vector<1x128xf32> -> vector<1x128xf32>
    %cst_36 = arith.constant dense<0.000000e+00> : vector<1x128xf32>
    %95 = tpu.matmul %73, %2, %cst_36 {dimension_numbers = #tpu.dot_dimension_numbers<[1], [0], [0], [1], [0, 0, 1, 1], [], []>} : vector<1x32xf32>, vector<32x128xf32>, vector<1x128xf32> -> vector<1x128xf32>
    %96 = arith.addf %94, %95 : vector<1x128xf32>
    %97 = arith.addf %96, %3 : vector<1x128xf32>
    %98 = arith.mulf %97, %13 : vector<1x128xf32>
    %99 = arith.negf %98 : vector<1x128xf32>
    %100 = math.exp %99 : vector<1x128xf32>
    %cst_37 = arith.constant 1.000000e+00 : f32
    %101 = vector.broadcast %cst_37 : f32 to vector<1x128xf32>
    %102 = arith.addf %101, %100 : vector<1x128xf32>
    %103 = arith.divf %101, %102 : vector<1x128xf32>
    %104 = arith.mulf %103, %13 : vector<1x128xf32>
    %105 = arith.addf %104, %16 : vector<1x128xf32>
    %106 = vector.extract_strided_slice %105 {offsets = [0, 0], sizes = [1, 32], strides = [1, 1]} : vector<1x128xf32> to vector<1x32xf32>
    %107 = vector.extract_strided_slice %105 {offsets = [0, 32], sizes = [1, 32], strides = [1, 1]} : vector<1x128xf32> to vector<1x32xf32>
    %108 = vector.extract_strided_slice %105 {offsets = [0, 64], sizes = [1, 32], strides = [1, 1]} : vector<1x128xf32> to vector<1x32xf32>
    %109 = vector.extract_strided_slice %105 {offsets = [0, 96], sizes = [1, 32], strides = [1, 1]} : vector<1x128xf32> to vector<1x32xf32>
    %110 = arith.mulf %107, %71 : vector<1x32xf32>
    %111 = arith.mulf %106, %108 : vector<1x32xf32>
    %112 = arith.addf %110, %111 : vector<1x32xf32>
    %113 = math.tanh %112 : vector<1x32xf32>
    %114 = arith.mulf %109, %113 : vector<1x32xf32>
    %115 = tpu.concatenate %73, %114 in 0 : vector<1x32xf32>, vector<1x32xf32> -> vector<2x32xf32>
    %116 = vector.shape_cast %115 : vector<2x32xf32> to vector<2x1x32xf32>
    %117 = vector.broadcast %116 : vector<2x1x32xf32> to vector<2x8x32xf32>
    %118 = arith.mulf %117, %4 : vector<2x8x32xf32>
    %cst_38 = arith.constant dense<0.000000e+00> : vector<2x8xf32>
    %119 = vector.multi_reduction <add>, %118, %cst_38 [2] : vector<2x8x32xf32> to vector<2x8xf32>
    %cst_39 = arith.constant dense<0xFF800000> : vector<2xf32>
    %120 = vector.multi_reduction <maximumf>, %119, %cst_39 [1] : vector<2x8xf32> to vector<2xf32>
    %121 = vector.shape_cast %120 : vector<2xf32> to vector<2x1xf32>
    %122 = vector.broadcast %121 : vector<2x1xf32> to vector<2x8xf32>
    %123 = arith.subf %119, %122 : vector<2x8xf32>
    %124 = math.exp %123 : vector<2x8xf32>
    %cst_40 = arith.constant dense<0.000000e+00> : vector<2xf32>
    %125 = vector.multi_reduction <add>, %124, %cst_40 [1] : vector<2x8xf32> to vector<2xf32>
    %126 = vector.shape_cast %125 : vector<2xf32> to vector<2x1xf32>
    %127 = vector.broadcast %126 : vector<2x1xf32> to vector<2x8xf32>
    %128 = arith.divf %124, %127 : vector<2x8xf32>
    %129 = vector.shape_cast %128 : vector<2x8xf32> to vector<2x8x1xf32>
    %130 = vector.broadcast %129 : vector<2x8x1xf32> to vector<2x8x32xf32>
    %131 = arith.mulf %4, %130 : vector<2x8x32xf32>
    %cst_41 = arith.constant dense<0.000000e+00> : vector<2x32xf32>
    %132 = vector.multi_reduction <add>, %131, %cst_41 [1] : vector<2x8x32xf32> to vector<2x32xf32>
    %c0_42 = arith.constant 0 : index
    %c0_43 = arith.constant 0 : index
    %133 = vector.load %arg9[%c0_42, %c0_43] : memref<32x10xf32, #tpu.memory_space<vmem>>, vector<32x10xf32>
    %cst_44 = arith.constant dense<0.000000e+00> : vector<2x10xf32>
    %134 = tpu.matmul %115, %133, %cst_44 {dimension_numbers = #tpu.dot_dimension_numbers<[1], [0], [0], [1], [0, 0, 1, 1], [], []>} : vector<2x32xf32>, vector<32x10xf32>, vector<2x10xf32> -> vector<2x10xf32>
    %c0_45 = arith.constant 0 : index
    %c0_46 = arith.constant 0 : index
    %135 = vector.load %arg10[%c0_45, %c0_46] : memref<32x10xf32, #tpu.memory_space<vmem>>, vector<32x10xf32>
    %cst_47 = arith.constant dense<0.000000e+00> : vector<2x10xf32>
    %136 = tpu.matmul %132, %135, %cst_47 {dimension_numbers = #tpu.dot_dimension_numbers<[1], [0], [0], [1], [0, 0, 1, 1], [], []>} : vector<2x32xf32>, vector<32x10xf32>, vector<2x10xf32> -> vector<2x10xf32>
    %137 = arith.addf %134, %136 : vector<2x10xf32>
    %c0_48 = arith.constant 0 : index
    %c0_49 = arith.constant 0 : index
    %138 = vector.load %arg11[%c0_48, %c0_49] : memref<1x10xf32, #tpu.memory_space<vmem>>, vector<1x10xf32>
    %139 = vector.broadcast %138 : vector<1x10xf32> to vector<2x10xf32>
    %140 = arith.addf %137, %139 : vector<2x10xf32>
    %cst_50 = arith.constant dense<0xFF800000> : vector<2xf32>
    %141 = vector.multi_reduction <maximumf>, %140, %cst_50 [1] : vector<2x10xf32> to vector<2xf32>
    %142 = vector.shape_cast %141 : vector<2xf32> to vector<2x1xf32>
    %143 = vector.broadcast %142 : vector<2x1xf32> to vector<2x10xf32>
    %144 = arith.subf %140, %143 : vector<2x10xf32>
    %145 = math.exp %144 : vector<2x10xf32>
    %cst_51 = arith.constant dense<0.000000e+00> : vector<2xf32>
    %146 = vector.multi_reduction <add>, %145, %cst_51 [1] : vector<2x10xf32> to vector<2xf32>
    %147 = vector.shape_cast %146 : vector<2xf32> to vector<2x1xf32>
    %148 = math.log %147 : vector<2x1xf32>
    %149 = arith.addf %148, %142 : vector<2x1xf32>
    %150 = vector.broadcast %149 : vector<2x1xf32> to vector<2x10xf32>
    %151 = arith.subf %140, %150 : vector<2x10xf32>
    %152 = tpu.concatenate %151, %128, %32 in 1 : vector<2x10xf32>, vector<2x8xf32>, vector<2x110xf32> -> vector<2x128xf32>
    %153 = vector.shape_cast %152 : vector<2x128xf32> to vector<1x2x128xf32>
    %c0_52 = arith.constant 0 : index
    %c0_53 = arith.constant 0 : index
    %c0_54 = arith.constant 0 : index
    %154 = vector.load %arg12[%c0_52, %c0_53, %c0_54] : memref<5x2x128xf32, #tpu.memory_space<vmem>>, vector<1x2x128xf32>
    tpu.vector_store %arg12[%c0_52, %c0_53, %c0_54], %153 {strides = array<i32>} : memref<5x2x128xf32, #tpu.memory_space<vmem>>, vector<1x2x128xf32>,
    %c0_55 = arith.constant 0 : index
    %c0_56 = arith.constant 0 : index
    %155 = vector.load %arg2[%c0_55, %c0_56] : memref<10x128xf32, #tpu.memory_space<vmem>>, vector<10x128xf32>
    %cst_57 = arith.constant dense<0.000000e+00> : vector<2x128xf32>
    %156 = tpu.matmul %151, %155, %cst_57 {dimension_numbers = #tpu.dot_dimension_numbers<[1], [0], [0], [1], [0, 0, 1, 1], [], []>} : vector<2x10xf32>, vector<10x128xf32>, vector<2x128xf32> -> vector<2x128xf32>
    %c0_58 = arith.constant 0 : index
    %c0_59 = arith.constant 0 : index
    %157 = vector.load %arg3[%c0_58, %c0_59] : memref<32x128xf32, #tpu.memory_space<vmem>>, vector<32x128xf32>
    %cst_60 = arith.constant dense<0.000000e+00> : vector<2x128xf32>
    %158 = tpu.matmul %132, %157, %cst_60 {dimension_numbers = #tpu.dot_dimension_numbers<[1], [0], [0], [1], [0, 0, 1, 1], [], []>} : vector<2x32xf32>, vector<32x128xf32>, vector<2x128xf32> -> vector<2x128xf32>
    %159 = arith.addf %156, %158 : vector<2x128xf32>
    %c0_61 = arith.constant 0 : index
    %c0_62 = arith.constant 0 : index
    %160 = vector.load %arg5[%c0_61, %c0_62] : memref<1x128xf32, #tpu.memory_space<vmem>>, vector<1x128xf32>
    %161 = vector.broadcast %160 : vector<1x128xf32> to vector<2x128xf32>
    %162 = arith.addf %159, %161 : vector<2x128xf32>
    %163 = vector.extract_strided_slice %162 {offsets = [0, 0], sizes = [1, 128], strides = [1, 1]} : vector<2x128xf32> to vector<1x128xf32>
    %cst_63 = arith.constant dense<0.000000e+00> : vector<1x128xf32>
    %164 = tpu.matmul %93, %0, %cst_63 {dimension_numbers = #tpu.dot_dimension_numbers<[1], [0], [0], [1], [0, 0, 1, 1], [], []>} : vector<1x32xf32>, vector<32x128xf32>, vector<1x128xf32> -> vector<1x128xf32>
    %165 = arith.addf %163, %164 : vector<1x128xf32>
    %166 = arith.mulf %165, %13 : vector<1x128xf32>
    %167 = arith.negf %166 : vector<1x128xf32>
    %168 = math.exp %167 : vector<1x128xf32>
    %cst_64 = arith.constant 1.000000e+00 : f32
    %169 = vector.broadcast %cst_64 : f32 to vector<1x128xf32>
    %170 = arith.addf %169, %168 : vector<1x128xf32>
    %171 = arith.divf %169, %170 : vector<1x128xf32>
    %172 = arith.mulf %171, %13 : vector<1x128xf32>
    %173 = arith.addf %172, %16 : vector<1x128xf32>
    %174 = vector.extract_strided_slice %173 {offsets = [0, 0], sizes = [1, 32], strides = [1, 1]} : vector<1x128xf32> to vector<1x32xf32>
    %175 = vector.extract_strided_slice %173 {offsets = [0, 32], sizes = [1, 32], strides = [1, 1]} : vector<1x128xf32> to vector<1x32xf32>
    %176 = vector.extract_strided_slice %173 {offsets = [0, 64], sizes = [1, 32], strides = [1, 1]} : vector<1x128xf32> to vector<1x32xf32>
    %177 = vector.extract_strided_slice %173 {offsets = [0, 96], sizes = [1, 32], strides = [1, 1]} : vector<1x128xf32> to vector<1x32xf32>
    %178 = arith.mulf %175, %91 : vector<1x32xf32>
    %179 = arith.mulf %174, %176 : vector<1x32xf32>
    %180 = arith.addf %178, %179 : vector<1x32xf32>
    %181 = math.tanh %180 : vector<1x32xf32>
    %182 = arith.mulf %177, %181 : vector<1x32xf32>
    %cst_65 = arith.constant dense<0.000000e+00> : vector<1x128xf32>
    %183 = tpu.matmul %182, %1, %cst_65 {dimension_numbers = #tpu.dot_dimension_numbers<[1], [0], [0], [1], [0, 0, 1, 1], [], []>} : vector<1x32xf32>, vector<32x128xf32>, vector<1x128xf32> -> vector<1x128xf32>
    %cst_66 = arith.constant dense<0.000000e+00> : vector<1x128xf32>
    %184 = tpu.matmul %114, %2, %cst_66 {dimension_numbers = #tpu.dot_dimension_numbers<[1], [0], [0], [1], [0, 0, 1, 1], [], []>} : vector<1x32xf32>, vector<32x128xf32>, vector<1x128xf32> -> vector<1x128xf32>
    %185 = arith.addf %183, %184 : vector<1x128xf32>
    %186 = arith.addf %185, %3 : vector<1x128xf32>
    %187 = arith.mulf %186, %13 : vector<1x128xf32>
    %188 = arith.negf %187 : vector<1x128xf32>
    %189 = math.exp %188 : vector<1x128xf32>
    %cst_67 = arith.constant 1.000000e+00 : f32
    %190 = vector.broadcast %cst_67 : f32 to vector<1x128xf32>
    %191 = arith.addf %190, %189 : vector<1x128xf32>
    %192 = arith.divf %190, %191 : vector<1x128xf32>
    %193 = arith.mulf %192, %13 : vector<1x128xf32>
    %194 = arith.addf %193, %16 : vector<1x128xf32>
    %195 = vector.extract_strided_slice %194 {offsets = [0, 0], sizes = [1, 32], strides = [1, 1]} : vector<1x128xf32> to vector<1x32xf32>
    %196 = vector.extract_strided_slice %194 {offsets = [0, 32], sizes = [1, 32], strides = [1, 1]} : vector<1x128xf32> to vector<1x32xf32>
    %197 = vector.extract_strided_slice %194 {offsets = [0, 64], sizes = [1, 32], strides = [1, 1]} : vector<1x128xf32> to vector<1x32xf32>
    %198 = vector.extract_strided_slice %194 {offsets = [0, 96], sizes = [1, 32], strides = [1, 1]} : vector<1x128xf32> to vector<1x32xf32>
    %199 = arith.mulf %196, %112 : vector<1x32xf32>
    %200 = arith.mulf %195, %197 : vector<1x32xf32>
    %201 = arith.addf %199, %200 : vector<1x32xf32>
    %202 = math.tanh %201 : vector<1x32xf32>
    %203 = arith.mulf %198, %202 : vector<1x32xf32>
    %204 = vector.extract_strided_slice %162 {offsets = [1, 0], sizes = [1, 128], strides = [1, 1]} : vector<2x128xf32> to vector<1x128xf32>
    %cst_68 = arith.constant dense<0.000000e+00> : vector<1x128xf32>
    %205 = tpu.matmul %182, %0, %cst_68 {dimension_numbers = #tpu.dot_dimension_numbers<[1], [0], [0], [1], [0, 0, 1, 1], [], []>} : vector<1x32xf32>, vector<32x128xf32>, vector<1x128xf32> -> vector<1x128xf32>
    %206 = arith.addf %204, %205 : vector<1x128xf32>
    %207 = arith.mulf %206, %13 : vector<1x128xf32>
    %208 = arith.negf %207 : vector<1x128xf32>
    %209 = math.exp %208 : vector<1x128xf32>
    %cst_69 = arith.constant 1.000000e+00 : f32
    %210 = vector.broadcast %cst_69 : f32 to vector<1x128xf32>
    %211 = arith.addf %210, %209 : vector<1x128xf32>
    %212 = arith.divf %210, %211 : vector<1x128xf32>
    %213 = arith.mulf %212, %13 : vector<1x128xf32>
    %214 = arith.addf %213, %16 : vector<1x128xf32>
    %215 = vector.extract_strided_slice %214 {offsets = [0, 0], sizes = [1, 32], strides = [1, 1]} : vector<1x128xf32> to vector<1x32xf32>
    %216 = vector.extract_strided_slice %214 {offsets = [0, 32], sizes = [1, 32], strides = [1, 1]} : vector<1x128xf32> to vector<1x32xf32>
    %217 = vector.extract_strided_slice %214 {offsets = [0, 64], sizes = [1, 32], strides = [1, 1]} : vector<1x128xf32> to vector<1x32xf32>
    %218 = vector.extract_strided_slice %214 {offsets = [0, 96], sizes = [1, 32], strides = [1, 1]} : vector<1x128xf32> to vector<1x32xf32>
    %219 = arith.mulf %216, %180 : vector<1x32xf32>
    %220 = arith.mulf %215, %217 : vector<1x32xf32>
    %221 = arith.addf %219, %220 : vector<1x32xf32>
    %222 = math.tanh %221 : vector<1x32xf32>
    %223 = arith.mulf %218, %222 : vector<1x32xf32>
    %cst_70 = arith.constant dense<0.000000e+00> : vector<1x128xf32>
    %224 = tpu.matmul %223, %1, %cst_70 {dimension_numbers = #tpu.dot_dimension_numbers<[1], [0], [0], [1], [0, 0, 1, 1], [], []>} : vector<1x32xf32>, vector<32x128xf32>, vector<1x128xf32> -> vector<1x128xf32>
    %cst_71 = arith.constant dense<0.000000e+00> : vector<1x128xf32>
    %225 = tpu.matmul %203, %2, %cst_71 {dimension_numbers = #tpu.dot_dimension_numbers<[1], [0], [0], [1], [0, 0, 1, 1], [], []>} : vector<1x32xf32>, vector<32x128xf32>, vector<1x128xf32> -> vector<1x128xf32>
    %226 = arith.addf %224, %225 : vector<1x128xf32>
    %227 = arith.addf %226, %3 : vector<1x128xf32>
    %228 = arith.mulf %227, %13 : vector<1x128xf32>
    %229 = arith.negf %228 : vector<1x128xf32>
    %230 = math.exp %229 : vector<1x128xf32>
    %cst_72 = arith.constant 1.000000e+00 : f32
    %231 = vector.broadcast %cst_72 : f32 to vector<1x128xf32>
    %232 = arith.addf %231, %230 : vector<1x128xf32>
    %233 = arith.divf %231, %232 : vector<1x128xf32>
    %234 = arith.mulf %233, %13 : vector<1x128xf32>
    %235 = arith.addf %234, %16 : vector<1x128xf32>
    %236 = vector.extract_strided_slice %235 {offsets = [0, 0], sizes = [1, 32], strides = [1, 1]} : vector<1x128xf32> to vector<1x32xf32>
    %237 = vector.extract_strided_slice %235 {offsets = [0, 32], sizes = [1, 32], strides = [1, 1]} : vector<1x128xf32> to vector<1x32xf32>
    %238 = vector.extract_strided_slice %235 {offsets = [0, 64], sizes = [1, 32], strides = [1, 1]} : vector<1x128xf32> to vector<1x32xf32>
    %239 = vector.extract_strided_slice %235 {offsets = [0, 96], sizes = [1, 32], strides = [1, 1]} : vector<1x128xf32> to vector<1x32xf32>
    %240 = arith.mulf %237, %201 : vector<1x32xf32>
    %241 = arith.mulf %236, %238 : vector<1x32xf32>
    %242 = arith.addf %240, %241 : vector<1x32xf32>
    %243 = math.tanh %242 : vector<1x32xf32>
    %244 = arith.mulf %239, %243 : vector<1x32xf32>
    %245 = tpu.concatenate %203, %244 in 0 : vector<1x32xf32>, vector<1x32xf32> -> vector<2x32xf32>
    %246 = vector.shape_cast %245 : vector<2x32xf32> to vector<2x1x32xf32>
    %247 = vector.broadcast %246 : vector<2x1x32xf32> to vector<2x8x32xf32>
    %248 = arith.mulf %247, %4 : vector<2x8x32xf32>
    %cst_73 = arith.constant dense<0.000000e+00> : vector<2x8xf32>
    %249 = vector.multi_reduction <add>, %248, %cst_73 [2] : vector<2x8x32xf32> to vector<2x8xf32>
    %cst_74 = arith.constant dense<0xFF800000> : vector<2xf32>
    %250 = vector.multi_reduction <maximumf>, %249, %cst_74 [1] : vector<2x8xf32> to vector<2xf32>
    %251 = vector.shape_cast %250 : vector<2xf32> to vector<2x1xf32>
    %252 = vector.broadcast %251 : vector<2x1xf32> to vector<2x8xf32>
    %253 = arith.subf %249, %252 : vector<2x8xf32>
    %254 = math.exp %253 : vector<2x8xf32>
    %cst_75 = arith.constant dense<0.000000e+00> : vector<2xf32>
    %255 = vector.multi_reduction <add>, %254, %cst_75 [1] : vector<2x8xf32> to vector<2xf32>
    %256 = vector.shape_cast %255 : vector<2xf32> to vector<2x1xf32>
    %257 = vector.broadcast %256 : vector<2x1xf32> to vector<2x8xf32>
    %258 = arith.divf %254, %257 : vector<2x8xf32>
    %259 = vector.shape_cast %258 : vector<2x8xf32> to vector<2x8x1xf32>
    %260 = vector.broadcast %259 : vector<2x8x1xf32> to vector<2x8x32xf32>
    %261 = arith.mulf %4, %260 : vector<2x8x32xf32>
    %cst_76 = arith.constant dense<0.000000e+00> : vector<2x32xf32>
    %262 = vector.multi_reduction <add>, %261, %cst_76 [1] : vector<2x8x32xf32> to vector<2x32xf32>
    %c0_77 = arith.constant 0 : index
    %c0_78 = arith.constant 0 : index
    %263 = vector.load %arg9[%c0_77, %c0_78] : memref<32x10xf32, #tpu.memory_space<vmem>>, vector<32x10xf32>
    %cst_79 = arith.constant dense<0.000000e+00> : vector<2x10xf32>
    %264 = tpu.matmul %245, %263, %cst_79 {dimension_numbers = #tpu.dot_dimension_numbers<[1], [0], [0], [1], [0, 0, 1, 1], [], []>} : vector<2x32xf32>, vector<32x10xf32>, vector<2x10xf32> -> vector<2x10xf32>
    %c0_80 = arith.constant 0 : index
    %c0_81 = arith.constant 0 : index
    %265 = vector.load %arg10[%c0_80, %c0_81] : memref<32x10xf32, #tpu.memory_space<vmem>>, vector<32x10xf32>
    %cst_82 = arith.constant dense<0.000000e+00> : vector<2x10xf32>
    %266 = tpu.matmul %262, %265, %cst_82 {dimension_numbers = #tpu.dot_dimension_numbers<[1], [0], [0], [1], [0, 0, 1, 1], [], []>} : vector<2x32xf32>, vector<32x10xf32>, vector<2x10xf32> -> vector<2x10xf32>
    %267 = arith.addf %264, %266 : vector<2x10xf32>
    %c0_83 = arith.constant 0 : index
    %c0_84 = arith.constant 0 : index
    %268 = vector.load %arg11[%c0_83, %c0_84] : memref<1x10xf32, #tpu.memory_space<vmem>>, vector<1x10xf32>
    %269 = vector.broadcast %268 : vector<1x10xf32> to vector<2x10xf32>
    %270 = arith.addf %267, %269 : vector<2x10xf32>
    %cst_85 = arith.constant dense<0xFF800000> : vector<2xf32>
    %271 = vector.multi_reduction <maximumf>, %270, %cst_85 [1] : vector<2x10xf32> to vector<2xf32>
    %272 = vector.shape_cast %271 : vector<2xf32> to vector<2x1xf32>
    %273 = vector.broadcast %272 : vector<2x1xf32> to vector<2x10xf32>
    %274 = arith.subf %270, %273 : vector<2x10xf32>
    %275 = math.exp %274 : vector<2x10xf32>
    %cst_86 = arith.constant dense<0.000000e+00> : vector<2xf32>
    %276 = vector.multi_reduction <add>, %275, %cst_86 [1] : vector<2x10xf32> to vector<2xf32>
    %277 = vector.shape_cast %276 : vector<2xf32> to vector<2x1xf32>
    %278 = math.log %277 : vector<2x1xf32>
    %279 = arith.addf %278, %272 : vector<2x1xf32>
    %280 = vector.broadcast %279 : vector<2x1xf32> to vector<2x10xf32>
    %281 = arith.subf %270, %280 : vector<2x10xf32>
    %282 = tpu.concatenate %281, %258, %32 in 1 : vector<2x10xf32>, vector<2x8xf32>, vector<2x110xf32> -> vector<2x128xf32>
    %283 = vector.shape_cast %282 : vector<2x128xf32> to vector<1x2x128xf32>
    %c1 = arith.constant 1 : index
    %c0_87 = arith.constant 0 : index
    %c0_88 = arith.constant 0 : index
    %284 = vector.load %arg12[%c1, %c0_87, %c0_88] : memref<5x2x128xf32, #tpu.memory_space<vmem>>, vector<1x2x128xf32>
    tpu.vector_store %arg12[%c1, %c0_87, %c0_88], %283 {strides = array<i32>} : memref<5x2x128xf32, #tpu.memory_space<vmem>>, vector<1x2x128xf32>,
    %c0_89 = arith.constant 0 : index
    %c0_90 = arith.constant 0 : index
    %285 = vector.load %arg2[%c0_89, %c0_90] : memref<10x128xf32, #tpu.memory_space<vmem>>, vector<10x128xf32>
    %cst_91 = arith.constant dense<0.000000e+00> : vector<2x128xf32>
    %286 = tpu.matmul %281, %285, %cst_91 {dimension_numbers = #tpu.dot_dimension_numbers<[1], [0], [0], [1], [0, 0, 1, 1], [], []>} : vector<2x10xf32>, vector<10x128xf32>, vector<2x128xf32> -> vector<2x128xf32>
    %c0_92 = arith.constant 0 : index
    %c0_93 = arith.constant 0 : index
    %287 = vector.load %arg3[%c0_92, %c0_93] : memref<32x128xf32, #tpu.memory_space<vmem>>, vector<32x128xf32>
    %cst_94 = arith.constant dense<0.000000e+00> : vector<2x128xf32>
    %288 = tpu.matmul %262, %287, %cst_94 {dimension_numbers = #tpu.dot_dimension_numbers<[1], [0], [0], [1], [0, 0, 1, 1], [], []>} : vector<2x32xf32>, vector<32x128xf32>, vector<2x128xf32> -> vector<2x128xf32>
    %289 = arith.addf %286, %288 : vector<2x128xf32>
    %c0_95 = arith.constant 0 : index
    %c0_96 = arith.constant 0 : index
    %290 = vector.load %arg5[%c0_95, %c0_96] : memref<1x128xf32, #tpu.memory_space<vmem>>, vector<1x128xf32>
    %291 = vector.broadcast %290 : vector<1x128xf32> to vector<2x128xf32>
    %292 = arith.addf %289, %291 : vector<2x128xf32>
    %293 = vector.extract_strided_slice %292 {offsets = [0, 0], sizes = [1, 128], strides = [1, 1]} : vector<2x128xf32> to vector<1x128xf32>
    %cst_97 = arith.constant dense<0.000000e+00> : vector<1x128xf32>
    %294 = tpu.matmul %223, %0, %cst_97 {dimension_numbers = #tpu.dot_dimension_numbers<[1], [0], [0], [1], [0, 0, 1, 1], [], []>} : vector<1x32xf32>, vector<32x128xf32>, vector<1x128xf32> -> vector<1x128xf32>
    %295 = arith.addf %293, %294 : vector<1x128xf32>
    %296 = arith.mulf %295, %13 : vector<1x128xf32>
    %297 = arith.negf %296 : vector<1x128xf32>
    %298 = math.exp %297 : vector<1x128xf32>
    %cst_98 = arith.constant 1.000000e+00 : f32
    %299 = vector.broadcast %cst_98 : f32 to vector<1x128xf32>
    %300 = arith.addf %299, %298 : vector<1x128xf32>
    %301 = arith.divf %299, %300 : vector<1x128xf32>
    %302 = arith.mulf %301, %13 : vector<1x128xf32>
    %303 = arith.addf %302, %16 : vector<1x128xf32>
    %304 = vector.extract_strided_slice %303 {offsets = [0, 0], sizes = [1, 32], strides = [1, 1]} : vector<1x128xf32> to vector<1x32xf32>
    %305 = vector.extract_strided_slice %303 {offsets = [0, 32], sizes = [1, 32], strides = [1, 1]} : vector<1x128xf32> to vector<1x32xf32>
    %306 = vector.extract_strided_slice %303 {offsets = [0, 64], sizes = [1, 32], strides = [1, 1]} : vector<1x128xf32> to vector<1x32xf32>
    %307 = vector.extract_strided_slice %303 {offsets = [0, 96], sizes = [1, 32], strides = [1, 1]} : vector<1x128xf32> to vector<1x32xf32>
    %308 = arith.mulf %305, %221 : vector<1x32xf32>
    %309 = arith.mulf %304, %306 : vector<1x32xf32>
    %310 = arith.addf %308, %309 : vector<1x32xf32>
    %311 = math.tanh %310 : vector<1x32xf32>
    %312 = arith.mulf %307, %311 : vector<1x32xf32>
    %cst_99 = arith.constant dense<0.000000e+00> : vector<1x128xf32>
    %313 = tpu.matmul %312, %1, %cst_99 {dimension_numbers = #tpu.dot_dimension_numbers<[1], [0], [0], [1], [0, 0, 1, 1], [], []>} : vector<1x32xf32>, vector<32x128xf32>, vector<1x128xf32> -> vector<1x128xf32>
    %cst_100 = arith.constant dense<0.000000e+00> : vector<1x128xf32>
    %314 = tpu.matmul %244, %2, %cst_100 {dimension_numbers = #tpu.dot_dimension_numbers<[1], [0], [0], [1], [0, 0, 1, 1], [], []>} : vector<1x32xf32>, vector<32x128xf32>, vector<1x128xf32> -> vector<1x128xf32>
    %315 = arith.addf %313, %314 : vector<1x128xf32>
    %316 = arith.addf %315, %3 : vector<1x128xf32>
    %317 = arith.mulf %316, %13 : vector<1x128xf32>
    %318 = arith.negf %317 : vector<1x128xf32>
    %319 = math.exp %318 : vector<1x128xf32>
    %cst_101 = arith.constant 1.000000e+00 : f32
    %320 = vector.broadcast %cst_101 : f32 to vector<1x128xf32>
    %321 = arith.addf %320, %319 : vector<1x128xf32>
    %322 = arith.divf %320, %321 : vector<1x128xf32>
    %323 = arith.mulf %322, %13 : vector<1x128xf32>
    %324 = arith.addf %323, %16 : vector<1x128xf32>
    %325 = vector.extract_strided_slice %324 {offsets = [0, 0], sizes = [1, 32], strides = [1, 1]} : vector<1x128xf32> to vector<1x32xf32>
    %326 = vector.extract_strided_slice %324 {offsets = [0, 32], sizes = [1, 32], strides = [1, 1]} : vector<1x128xf32> to vector<1x32xf32>
    %327 = vector.extract_strided_slice %324 {offsets = [0, 64], sizes = [1, 32], strides = [1, 1]} : vector<1x128xf32> to vector<1x32xf32>
    %328 = vector.extract_strided_slice %324 {offsets = [0, 96], sizes = [1, 32], strides = [1, 1]} : vector<1x128xf32> to vector<1x32xf32>
    %329 = arith.mulf %326, %242 : vector<1x32xf32>
    %330 = arith.mulf %325, %327 : vector<1x32xf32>
    %331 = arith.addf %329, %330 : vector<1x32xf32>
    %332 = math.tanh %331 : vector<1x32xf32>
    %333 = arith.mulf %328, %332 : vector<1x32xf32>
    %334 = vector.extract_strided_slice %292 {offsets = [1, 0], sizes = [1, 128], strides = [1, 1]} : vector<2x128xf32> to vector<1x128xf32>
    %cst_102 = arith.constant dense<0.000000e+00> : vector<1x128xf32>
    %335 = tpu.matmul %312, %0, %cst_102 {dimension_numbers = #tpu.dot_dimension_numbers<[1], [0], [0], [1], [0, 0, 1, 1], [], []>} : vector<1x32xf32>, vector<32x128xf32>, vector<1x128xf32> -> vector<1x128xf32>
    %336 = arith.addf %334, %335 : vector<1x128xf32>
    %337 = arith.mulf %336, %13 : vector<1x128xf32>
    %338 = arith.negf %337 : vector<1x128xf32>
    %339 = math.exp %338 : vector<1x128xf32>
    %cst_103 = arith.constant 1.000000e+00 : f32
    %340 = vector.broadcast %cst_103 : f32 to vector<1x128xf32>
    %341 = arith.addf %340, %339 : vector<1x128xf32>
    %342 = arith.divf %340, %341 : vector<1x128xf32>
    %343 = arith.mulf %342, %13 : vector<1x128xf32>
    %344 = arith.addf %343, %16 : vector<1x128xf32>
    %345 = vector.extract_strided_slice %344 {offsets = [0, 0], sizes = [1, 32], strides = [1, 1]} : vector<1x128xf32> to vector<1x32xf32>
    %346 = vector.extract_strided_slice %344 {offsets = [0, 32], sizes = [1, 32], strides = [1, 1]} : vector<1x128xf32> to vector<1x32xf32>
    %347 = vector.extract_strided_slice %344 {offsets = [0, 64], sizes = [1, 32], strides = [1, 1]} : vector<1x128xf32> to vector<1x32xf32>
    %348 = vector.extract_strided_slice %344 {offsets = [0, 96], sizes = [1, 32], strides = [1, 1]} : vector<1x128xf32> to vector<1x32xf32>
    %349 = arith.mulf %346, %310 : vector<1x32xf32>
    %350 = arith.mulf %345, %347 : vector<1x32xf32>
    %351 = arith.addf %349, %350 : vector<1x32xf32>
    %352 = math.tanh %351 : vector<1x32xf32>
    %353 = arith.mulf %348, %352 : vector<1x32xf32>
    %cst_104 = arith.constant dense<0.000000e+00> : vector<1x128xf32>
    %354 = tpu.matmul %353, %1, %cst_104 {dimension_numbers = #tpu.dot_dimension_numbers<[1], [0], [0], [1], [0, 0, 1, 1], [], []>} : vector<1x32xf32>, vector<32x128xf32>, vector<1x128xf32> -> vector<1x128xf32>
    %cst_105 = arith.constant dense<0.000000e+00> : vector<1x128xf32>
    %355 = tpu.matmul %333, %2, %cst_105 {dimension_numbers = #tpu.dot_dimension_numbers<[1], [0], [0], [1], [0, 0, 1, 1], [], []>} : vector<1x32xf32>, vector<32x128xf32>, vector<1x128xf32> -> vector<1x128xf32>
    %356 = arith.addf %354, %355 : vector<1x128xf32>
    %357 = arith.addf %356, %3 : vector<1x128xf32>
    %358 = arith.mulf %357, %13 : vector<1x128xf32>
    %359 = arith.negf %358 : vector<1x128xf32>
    %360 = math.exp %359 : vector<1x128xf32>
    %cst_106 = arith.constant 1.000000e+00 : f32
    %361 = vector.broadcast %cst_106 : f32 to vector<1x128xf32>
    %362 = arith.addf %361, %360 : vector<1x128xf32>
    %363 = arith.divf %361, %362 : vector<1x128xf32>
    %364 = arith.mulf %363, %13 : vector<1x128xf32>
    %365 = arith.addf %364, %16 : vector<1x128xf32>
    %366 = vector.extract_strided_slice %365 {offsets = [0, 0], sizes = [1, 32], strides = [1, 1]} : vector<1x128xf32> to vector<1x32xf32>
    %367 = vector.extract_strided_slice %365 {offsets = [0, 32], sizes = [1, 32], strides = [1, 1]} : vector<1x128xf32> to vector<1x32xf32>
    %368 = vector.extract_strided_slice %365 {offsets = [0, 64], sizes = [1, 32], strides = [1, 1]} : vector<1x128xf32> to vector<1x32xf32>
    %369 = vector.extract_strided_slice %365 {offsets = [0, 96], sizes = [1, 32], strides = [1, 1]} : vector<1x128xf32> to vector<1x32xf32>
    %370 = arith.mulf %367, %331 : vector<1x32xf32>
    %371 = arith.mulf %366, %368 : vector<1x32xf32>
    %372 = arith.addf %370, %371 : vector<1x32xf32>
    %373 = math.tanh %372 : vector<1x32xf32>
    %374 = arith.mulf %369, %373 : vector<1x32xf32>
    %375 = tpu.concatenate %333, %374 in 0 : vector<1x32xf32>, vector<1x32xf32> -> vector<2x32xf32>
    %376 = vector.shape_cast %375 : vector<2x32xf32> to vector<2x1x32xf32>
    %377 = vector.broadcast %376 : vector<2x1x32xf32> to vector<2x8x32xf32>
    %378 = arith.mulf %377, %4 : vector<2x8x32xf32>
    %cst_107 = arith.constant dense<0.000000e+00> : vector<2x8xf32>
    %379 = vector.multi_reduction <add>, %378, %cst_107 [2] : vector<2x8x32xf32> to vector<2x8xf32>
    %cst_108 = arith.constant dense<0xFF800000> : vector<2xf32>
    %380 = vector.multi_reduction <maximumf>, %379, %cst_108 [1] : vector<2x8xf32> to vector<2xf32>
    %381 = vector.shape_cast %380 : vector<2xf32> to vector<2x1xf32>
    %382 = vector.broadcast %381 : vector<2x1xf32> to vector<2x8xf32>
    %383 = arith.subf %379, %382 : vector<2x8xf32>
    %384 = math.exp %383 : vector<2x8xf32>
    %cst_109 = arith.constant dense<0.000000e+00> : vector<2xf32>
    %385 = vector.multi_reduction <add>, %384, %cst_109 [1] : vector<2x8xf32> to vector<2xf32>
    %386 = vector.shape_cast %385 : vector<2xf32> to vector<2x1xf32>
    %387 = vector.broadcast %386 : vector<2x1xf32> to vector<2x8xf32>
    %388 = arith.divf %384, %387 : vector<2x8xf32>
    %389 = vector.shape_cast %388 : vector<2x8xf32> to vector<2x8x1xf32>
    %390 = vector.broadcast %389 : vector<2x8x1xf32> to vector<2x8x32xf32>
    %391 = arith.mulf %4, %390 : vector<2x8x32xf32>
    %cst_110 = arith.constant dense<0.000000e+00> : vector<2x32xf32>
    %392 = vector.multi_reduction <add>, %391, %cst_110 [1] : vector<2x8x32xf32> to vector<2x32xf32>
    %c0_111 = arith.constant 0 : index
    %c0_112 = arith.constant 0 : index
    %393 = vector.load %arg9[%c0_111, %c0_112] : memref<32x10xf32, #tpu.memory_space<vmem>>, vector<32x10xf32>
    %cst_113 = arith.constant dense<0.000000e+00> : vector<2x10xf32>
    %394 = tpu.matmul %375, %393, %cst_113 {dimension_numbers = #tpu.dot_dimension_numbers<[1], [0], [0], [1], [0, 0, 1, 1], [], []>} : vector<2x32xf32>, vector<32x10xf32>, vector<2x10xf32> -> vector<2x10xf32>
    %c0_114 = arith.constant 0 : index
    %c0_115 = arith.constant 0 : index
    %395 = vector.load %arg10[%c0_114, %c0_115] : memref<32x10xf32, #tpu.memory_space<vmem>>, vector<32x10xf32>
    %cst_116 = arith.constant dense<0.000000e+00> : vector<2x10xf32>
    %396 = tpu.matmul %392, %395, %cst_116 {dimension_numbers = #tpu.dot_dimension_numbers<[1], [0], [0], [1], [0, 0, 1, 1], [], []>} : vector<2x32xf32>, vector<32x10xf32>, vector<2x10xf32> -> vector<2x10xf32>
    %397 = arith.addf %394, %396 : vector<2x10xf32>
    %c0_117 = arith.constant 0 : index
    %c0_118 = arith.constant 0 : index
    %398 = vector.load %arg11[%c0_117, %c0_118] : memref<1x10xf32, #tpu.memory_space<vmem>>, vector<1x10xf32>
    %399 = vector.broadcast %398 : vector<1x10xf32> to vector<2x10xf32>
    %400 = arith.addf %397, %399 : vector<2x10xf32>
    %cst_119 = arith.constant dense<0xFF800000> : vector<2xf32>
    %401 = vector.multi_reduction <maximumf>, %400, %cst_119 [1] : vector<2x10xf32> to vector<2xf32>
    %402 = vector.shape_cast %401 : vector<2xf32> to vector<2x1xf32>
    %403 = vector.broadcast %402 : vector<2x1xf32> to vector<2x10xf32>
    %404 = arith.subf %400, %403 : vector<2x10xf32>
    %405 = math.exp %404 : vector<2x10xf32>
    %cst_120 = arith.constant dense<0.000000e+00> : vector<2xf32>
    %406 = vector.multi_reduction <add>, %405, %cst_120 [1] : vector<2x10xf32> to vector<2xf32>
    %407 = vector.shape_cast %406 : vector<2xf32> to vector<2x1xf32>
    %408 = math.log %407 : vector<2x1xf32>
    %409 = arith.addf %408, %402 : vector<2x1xf32>
    %410 = vector.broadcast %409 : vector<2x1xf32> to vector<2x10xf32>
    %411 = arith.subf %400, %410 : vector<2x10xf32>
    %412 = tpu.concatenate %411, %388, %32 in 1 : vector<2x10xf32>, vector<2x8xf32>, vector<2x110xf32> -> vector<2x128xf32>
    %413 = vector.shape_cast %412 : vector<2x128xf32> to vector<1x2x128xf32>
    %c2 = arith.constant 2 : index
    %c0_121 = arith.constant 0 : index
    %c0_122 = arith.constant 0 : index
    %414 = vector.load %arg12[%c2, %c0_121, %c0_122] : memref<5x2x128xf32, #tpu.memory_space<vmem>>, vector<1x2x128xf32>
    tpu.vector_store %arg12[%c2, %c0_121, %c0_122], %413 {strides = array<i32>} : memref<5x2x128xf32, #tpu.memory_space<vmem>>, vector<1x2x128xf32>,
    %c0_123 = arith.constant 0 : index
    %c0_124 = arith.constant 0 : index
    %415 = vector.load %arg2[%c0_123, %c0_124] : memref<10x128xf32, #tpu.memory_space<vmem>>, vector<10x128xf32>
    %cst_125 = arith.constant dense<0.000000e+00> : vector<2x128xf32>
    %416 = tpu.matmul %411, %415, %cst_125 {dimension_numbers = #tpu.dot_dimension_numbers<[1], [0], [0], [1], [0, 0, 1, 1], [], []>} : vector<2x10xf32>, vector<10x128xf32>, vector<2x128xf32> -> vector<2x128xf32>
    %c0_126 = arith.constant 0 : index
    %c0_127 = arith.constant 0 : index
    %417 = vector.load %arg3[%c0_126, %c0_127] : memref<32x128xf32, #tpu.memory_space<vmem>>, vector<32x128xf32>
    %cst_128 = arith.constant dense<0.000000e+00> : vector<2x128xf32>
    %418 = tpu.matmul %392, %417, %cst_128 {dimension_numbers = #tpu.dot_dimension_numbers<[1], [0], [0], [1], [0, 0, 1, 1], [], []>} : vector<2x32xf32>, vector<32x128xf32>, vector<2x128xf32> -> vector<2x128xf32>
    %419 = arith.addf %416, %418 : vector<2x128xf32>
    %c0_129 = arith.constant 0 : index
    %c0_130 = arith.constant 0 : index
    %420 = vector.load %arg5[%c0_129, %c0_130] : memref<1x128xf32, #tpu.memory_space<vmem>>, vector<1x128xf32>
    %421 = vector.broadcast %420 : vector<1x128xf32> to vector<2x128xf32>
    %422 = arith.addf %419, %421 : vector<2x128xf32>
    %423 = vector.extract_strided_slice %422 {offsets = [0, 0], sizes = [1, 128], strides = [1, 1]} : vector<2x128xf32> to vector<1x128xf32>
    %cst_131 = arith.constant dense<0.000000e+00> : vector<1x128xf32>
    %424 = tpu.matmul %353, %0, %cst_131 {dimension_numbers = #tpu.dot_dimension_numbers<[1], [0], [0], [1], [0, 0, 1, 1], [], []>} : vector<1x32xf32>, vector<32x128xf32>, vector<1x128xf32> -> vector<1x128xf32>
    %425 = arith.addf %423, %424 : vector<1x128xf32>
    %426 = arith.mulf %425, %13 : vector<1x128xf32>
    %427 = arith.negf %426 : vector<1x128xf32>
    %428 = math.exp %427 : vector<1x128xf32>
    %cst_132 = arith.constant 1.000000e+00 : f32
    %429 = vector.broadcast %cst_132 : f32 to vector<1x128xf32>
    %430 = arith.addf %429, %428 : vector<1x128xf32>
    %431 = arith.divf %429, %430 : vector<1x128xf32>
    %432 = arith.mulf %431, %13 : vector<1x128xf32>
    %433 = arith.addf %432, %16 : vector<1x128xf32>
    %434 = vector.extract_strided_slice %433 {offsets = [0, 0], sizes = [1, 32], strides = [1, 1]} : vector<1x128xf32> to vector<1x32xf32>
    %435 = vector.extract_strided_slice %433 {offsets = [0, 32], sizes = [1, 32], strides = [1, 1]} : vector<1x128xf32> to vector<1x32xf32>
    %436 = vector.extract_strided_slice %433 {offsets = [0, 64], sizes = [1, 32], strides = [1, 1]} : vector<1x128xf32> to vector<1x32xf32>
    %437 = vector.extract_strided_slice %433 {offsets = [0, 96], sizes = [1, 32], strides = [1, 1]} : vector<1x128xf32> to vector<1x32xf32>
    %438 = arith.mulf %435, %351 : vector<1x32xf32>
    %439 = arith.mulf %434, %436 : vector<1x32xf32>
    %440 = arith.addf %438, %439 : vector<1x32xf32>
    %441 = math.tanh %440 : vector<1x32xf32>
    %442 = arith.mulf %437, %441 : vector<1x32xf32>
    %cst_133 = arith.constant dense<0.000000e+00> : vector<1x128xf32>
    %443 = tpu.matmul %442, %1, %cst_133 {dimension_numbers = #tpu.dot_dimension_numbers<[1], [0], [0], [1], [0, 0, 1, 1], [], []>} : vector<1x32xf32>, vector<32x128xf32>, vector<1x128xf32> -> vector<1x128xf32>
    %cst_134 = arith.constant dense<0.000000e+00> : vector<1x128xf32>
    %444 = tpu.matmul %374, %2, %cst_134 {dimension_numbers = #tpu.dot_dimension_numbers<[1], [0], [0], [1], [0, 0, 1, 1], [], []>} : vector<1x32xf32>, vector<32x128xf32>, vector<1x128xf32> -> vector<1x128xf32>
    %445 = arith.addf %443, %444 : vector<1x128xf32>
    %446 = arith.addf %445, %3 : vector<1x128xf32>
    %447 = arith.mulf %446, %13 : vector<1x128xf32>
    %448 = arith.negf %447 : vector<1x128xf32>
    %449 = math.exp %448 : vector<1x128xf32>
    %cst_135 = arith.constant 1.000000e+00 : f32
    %450 = vector.broadcast %cst_135 : f32 to vector<1x128xf32>
    %451 = arith.addf %450, %449 : vector<1x128xf32>
    %452 = arith.divf %450, %451 : vector<1x128xf32>
    %453 = arith.mulf %452, %13 : vector<1x128xf32>
    %454 = arith.addf %453, %16 : vector<1x128xf32>
    %455 = vector.extract_strided_slice %454 {offsets = [0, 0], sizes = [1, 32], strides = [1, 1]} : vector<1x128xf32> to vector<1x32xf32>
    %456 = vector.extract_strided_slice %454 {offsets = [0, 32], sizes = [1, 32], strides = [1, 1]} : vector<1x128xf32> to vector<1x32xf32>
    %457 = vector.extract_strided_slice %454 {offsets = [0, 64], sizes = [1, 32], strides = [1, 1]} : vector<1x128xf32> to vector<1x32xf32>
    %458 = vector.extract_strided_slice %454 {offsets = [0, 96], sizes = [1, 32], strides = [1, 1]} : vector<1x128xf32> to vector<1x32xf32>
    %459 = arith.mulf %456, %372 : vector<1x32xf32>
    %460 = arith.mulf %455, %457 : vector<1x32xf32>
    %461 = arith.addf %459, %460 : vector<1x32xf32>
    %462 = math.tanh %461 : vector<1x32xf32>
    %463 = arith.mulf %458, %462 : vector<1x32xf32>
    %464 = vector.extract_strided_slice %422 {offsets = [1, 0], sizes = [1, 128], strides = [1, 1]} : vector<2x128xf32> to vector<1x128xf32>
    %cst_136 = arith.constant dense<0.000000e+00> : vector<1x128xf32>
    %465 = tpu.matmul %442, %0, %cst_136 {dimension_numbers = #tpu.dot_dimension_numbers<[1], [0], [0], [1], [0, 0, 1, 1], [], []>} : vector<1x32xf32>, vector<32x128xf32>, vector<1x128xf32> -> vector<1x128xf32>
    %466 = arith.addf %464, %465 : vector<1x128xf32>
    %467 = arith.mulf %466, %13 : vector<1x128xf32>
    %468 = arith.negf %467 : vector<1x128xf32>
    %469 = math.exp %468 : vector<1x128xf32>
    %cst_137 = arith.constant 1.000000e+00 : f32
    %470 = vector.broadcast %cst_137 : f32 to vector<1x128xf32>
    %471 = arith.addf %470, %469 : vector<1x128xf32>
    %472 = arith.divf %470, %471 : vector<1x128xf32>
    %473 = arith.mulf %472, %13 : vector<1x128xf32>
    %474 = arith.addf %473, %16 : vector<1x128xf32>
    %475 = vector.extract_strided_slice %474 {offsets = [0, 0], sizes = [1, 32], strides = [1, 1]} : vector<1x128xf32> to vector<1x32xf32>
    %476 = vector.extract_strided_slice %474 {offsets = [0, 32], sizes = [1, 32], strides = [1, 1]} : vector<1x128xf32> to vector<1x32xf32>
    %477 = vector.extract_strided_slice %474 {offsets = [0, 64], sizes = [1, 32], strides = [1, 1]} : vector<1x128xf32> to vector<1x32xf32>
    %478 = vector.extract_strided_slice %474 {offsets = [0, 96], sizes = [1, 32], strides = [1, 1]} : vector<1x128xf32> to vector<1x32xf32>
    %479 = arith.mulf %476, %440 : vector<1x32xf32>
    %480 = arith.mulf %475, %477 : vector<1x32xf32>
    %481 = arith.addf %479, %480 : vector<1x32xf32>
    %482 = math.tanh %481 : vector<1x32xf32>
    %483 = arith.mulf %478, %482 : vector<1x32xf32>
    %cst_138 = arith.constant dense<0.000000e+00> : vector<1x128xf32>
    %484 = tpu.matmul %483, %1, %cst_138 {dimension_numbers = #tpu.dot_dimension_numbers<[1], [0], [0], [1], [0, 0, 1, 1], [], []>} : vector<1x32xf32>, vector<32x128xf32>, vector<1x128xf32> -> vector<1x128xf32>
    %cst_139 = arith.constant dense<0.000000e+00> : vector<1x128xf32>
    %485 = tpu.matmul %463, %2, %cst_139 {dimension_numbers = #tpu.dot_dimension_numbers<[1], [0], [0], [1], [0, 0, 1, 1], [], []>} : vector<1x32xf32>, vector<32x128xf32>, vector<1x128xf32> -> vector<1x128xf32>
    %486 = arith.addf %484, %485 : vector<1x128xf32>
    %487 = arith.addf %486, %3 : vector<1x128xf32>
    %488 = arith.mulf %487, %13 : vector<1x128xf32>
    %489 = arith.negf %488 : vector<1x128xf32>
    %490 = math.exp %489 : vector<1x128xf32>
    %cst_140 = arith.constant 1.000000e+00 : f32
    %491 = vector.broadcast %cst_140 : f32 to vector<1x128xf32>
    %492 = arith.addf %491, %490 : vector<1x128xf32>
    %493 = arith.divf %491, %492 : vector<1x128xf32>
    %494 = arith.mulf %493, %13 : vector<1x128xf32>
    %495 = arith.addf %494, %16 : vector<1x128xf32>
    %496 = vector.extract_strided_slice %495 {offsets = [0, 0], sizes = [1, 32], strides = [1, 1]} : vector<1x128xf32> to vector<1x32xf32>
    %497 = vector.extract_strided_slice %495 {offsets = [0, 32], sizes = [1, 32], strides = [1, 1]} : vector<1x128xf32> to vector<1x32xf32>
    %498 = vector.extract_strided_slice %495 {offsets = [0, 64], sizes = [1, 32], strides = [1, 1]} : vector<1x128xf32> to vector<1x32xf32>
    %499 = vector.extract_strided_slice %495 {offsets = [0, 96], sizes = [1, 32], strides = [1, 1]} : vector<1x128xf32> to vector<1x32xf32>
    %500 = arith.mulf %497, %461 : vector<1x32xf32>
    %501 = arith.mulf %496, %498 : vector<1x32xf32>
    %502 = arith.addf %500, %501 : vector<1x32xf32>
    %503 = math.tanh %502 : vector<1x32xf32>
    %504 = arith.mulf %499, %503 : vector<1x32xf32>
    %505 = tpu.concatenate %463, %504 in 0 : vector<1x32xf32>, vector<1x32xf32> -> vector<2x32xf32>
    %506 = vector.shape_cast %505 : vector<2x32xf32> to vector<2x1x32xf32>
    %507 = vector.broadcast %506 : vector<2x1x32xf32> to vector<2x8x32xf32>
    %508 = arith.mulf %507, %4 : vector<2x8x32xf32>
    %cst_141 = arith.constant dense<0.000000e+00> : vector<2x8xf32>
    %509 = vector.multi_reduction <add>, %508, %cst_141 [2] : vector<2x8x32xf32> to vector<2x8xf32>
    %cst_142 = arith.constant dense<0xFF800000> : vector<2xf32>
    %510 = vector.multi_reduction <maximumf>, %509, %cst_142 [1] : vector<2x8xf32> to vector<2xf32>
    %511 = vector.shape_cast %510 : vector<2xf32> to vector<2x1xf32>
    %512 = vector.broadcast %511 : vector<2x1xf32> to vector<2x8xf32>
    %513 = arith.subf %509, %512 : vector<2x8xf32>
    %514 = math.exp %513 : vector<2x8xf32>
    %cst_143 = arith.constant dense<0.000000e+00> : vector<2xf32>
    %515 = vector.multi_reduction <add>, %514, %cst_143 [1] : vector<2x8xf32> to vector<2xf32>
    %516 = vector.shape_cast %515 : vector<2xf32> to vector<2x1xf32>
    %517 = vector.broadcast %516 : vector<2x1xf32> to vector<2x8xf32>
    %518 = arith.divf %514, %517 : vector<2x8xf32>
    %519 = vector.shape_cast %518 : vector<2x8xf32> to vector<2x8x1xf32>
    %520 = vector.broadcast %519 : vector<2x8x1xf32> to vector<2x8x32xf32>
    %521 = arith.mulf %4, %520 : vector<2x8x32xf32>
    %cst_144 = arith.constant dense<0.000000e+00> : vector<2x32xf32>
    %522 = vector.multi_reduction <add>, %521, %cst_144 [1] : vector<2x8x32xf32> to vector<2x32xf32>
    %c0_145 = arith.constant 0 : index
    %c0_146 = arith.constant 0 : index
    %523 = vector.load %arg9[%c0_145, %c0_146] : memref<32x10xf32, #tpu.memory_space<vmem>>, vector<32x10xf32>
    %cst_147 = arith.constant dense<0.000000e+00> : vector<2x10xf32>
    %524 = tpu.matmul %505, %523, %cst_147 {dimension_numbers = #tpu.dot_dimension_numbers<[1], [0], [0], [1], [0, 0, 1, 1], [], []>} : vector<2x32xf32>, vector<32x10xf32>, vector<2x10xf32> -> vector<2x10xf32>
    %c0_148 = arith.constant 0 : index
    %c0_149 = arith.constant 0 : index
    %525 = vector.load %arg10[%c0_148, %c0_149] : memref<32x10xf32, #tpu.memory_space<vmem>>, vector<32x10xf32>
    %cst_150 = arith.constant dense<0.000000e+00> : vector<2x10xf32>
    %526 = tpu.matmul %522, %525, %cst_150 {dimension_numbers = #tpu.dot_dimension_numbers<[1], [0], [0], [1], [0, 0, 1, 1], [], []>} : vector<2x32xf32>, vector<32x10xf32>, vector<2x10xf32> -> vector<2x10xf32>
    %527 = arith.addf %524, %526 : vector<2x10xf32>
    %c0_151 = arith.constant 0 : index
    %c0_152 = arith.constant 0 : index
    %528 = vector.load %arg11[%c0_151, %c0_152] : memref<1x10xf32, #tpu.memory_space<vmem>>, vector<1x10xf32>
    %529 = vector.broadcast %528 : vector<1x10xf32> to vector<2x10xf32>
    %530 = arith.addf %527, %529 : vector<2x10xf32>
    %cst_153 = arith.constant dense<0xFF800000> : vector<2xf32>
    %531 = vector.multi_reduction <maximumf>, %530, %cst_153 [1] : vector<2x10xf32> to vector<2xf32>
    %532 = vector.shape_cast %531 : vector<2xf32> to vector<2x1xf32>
    %533 = vector.broadcast %532 : vector<2x1xf32> to vector<2x10xf32>
    %534 = arith.subf %530, %533 : vector<2x10xf32>
    %535 = math.exp %534 : vector<2x10xf32>
    %cst_154 = arith.constant dense<0.000000e+00> : vector<2xf32>
    %536 = vector.multi_reduction <add>, %535, %cst_154 [1] : vector<2x10xf32> to vector<2xf32>
    %537 = vector.shape_cast %536 : vector<2xf32> to vector<2x1xf32>
    %538 = math.log %537 : vector<2x1xf32>
    %539 = arith.addf %538, %532 : vector<2x1xf32>
    %540 = vector.broadcast %539 : vector<2x1xf32> to vector<2x10xf32>
    %541 = arith.subf %530, %540 : vector<2x10xf32>
    %542 = tpu.concatenate %541, %518, %32 in 1 : vector<2x10xf32>, vector<2x8xf32>, vector<2x110xf32> -> vector<2x128xf32>
    %543 = vector.shape_cast %542 : vector<2x128xf32> to vector<1x2x128xf32>
    %c3 = arith.constant 3 : index
    %c0_155 = arith.constant 0 : index
    %c0_156 = arith.constant 0 : index
    %544 = vector.load %arg12[%c3, %c0_155, %c0_156] : memref<5x2x128xf32, #tpu.memory_space<vmem>>, vector<1x2x128xf32>
    tpu.vector_store %arg12[%c3, %c0_155, %c0_156], %543 {strides = array<i32>} : memref<5x2x128xf32, #tpu.memory_space<vmem>>, vector<1x2x128xf32>,
    %c0_157 = arith.constant 0 : index
    %c0_158 = arith.constant 0 : index
    %545 = vector.load %arg2[%c0_157, %c0_158] : memref<10x128xf32, #tpu.memory_space<vmem>>, vector<10x128xf32>
    %cst_159 = arith.constant dense<0.000000e+00> : vector<2x128xf32>
    %546 = tpu.matmul %541, %545, %cst_159 {dimension_numbers = #tpu.dot_dimension_numbers<[1], [0], [0], [1], [0, 0, 1, 1], [], []>} : vector<2x10xf32>, vector<10x128xf32>, vector<2x128xf32> -> vector<2x128xf32>
    %c0_160 = arith.constant 0 : index
    %c0_161 = arith.constant 0 : index
    %547 = vector.load %arg3[%c0_160, %c0_161] : memref<32x128xf32, #tpu.memory_space<vmem>>, vector<32x128xf32>
    %cst_162 = arith.constant dense<0.000000e+00> : vector<2x128xf32>
    %548 = tpu.matmul %522, %547, %cst_162 {dimension_numbers = #tpu.dot_dimension_numbers<[1], [0], [0], [1], [0, 0, 1, 1], [], []>} : vector<2x32xf32>, vector<32x128xf32>, vector<2x128xf32> -> vector<2x128xf32>
    %549 = arith.addf %546, %548 : vector<2x128xf32>
    %c0_163 = arith.constant 0 : index
    %c0_164 = arith.constant 0 : index
    %550 = vector.load %arg5[%c0_163, %c0_164] : memref<1x128xf32, #tpu.memory_space<vmem>>, vector<1x128xf32>
    %551 = vector.broadcast %550 : vector<1x128xf32> to vector<2x128xf32>
    %552 = arith.addf %549, %551 : vector<2x128xf32>
    %553 = vector.extract_strided_slice %552 {offsets = [0, 0], sizes = [1, 128], strides = [1, 1]} : vector<2x128xf32> to vector<1x128xf32>
    %cst_165 = arith.constant dense<0.000000e+00> : vector<1x128xf32>
    %554 = tpu.matmul %483, %0, %cst_165 {dimension_numbers = #tpu.dot_dimension_numbers<[1], [0], [0], [1], [0, 0, 1, 1], [], []>} : vector<1x32xf32>, vector<32x128xf32>, vector<1x128xf32> -> vector<1x128xf32>
    %555 = arith.addf %553, %554 : vector<1x128xf32>
    %556 = arith.mulf %555, %13 : vector<1x128xf32>
    %557 = arith.negf %556 : vector<1x128xf32>
    %558 = math.exp %557 : vector<1x128xf32>
    %cst_166 = arith.constant 1.000000e+00 : f32
    %559 = vector.broadcast %cst_166 : f32 to vector<1x128xf32>
    %560 = arith.addf %559, %558 : vector<1x128xf32>
    %561 = arith.divf %559, %560 : vector<1x128xf32>
    %562 = arith.mulf %561, %13 : vector<1x128xf32>
    %563 = arith.addf %562, %16 : vector<1x128xf32>
    %564 = vector.extract_strided_slice %563 {offsets = [0, 0], sizes = [1, 32], strides = [1, 1]} : vector<1x128xf32> to vector<1x32xf32>
    %565 = vector.extract_strided_slice %563 {offsets = [0, 32], sizes = [1, 32], strides = [1, 1]} : vector<1x128xf32> to vector<1x32xf32>
    %566 = vector.extract_strided_slice %563 {offsets = [0, 64], sizes = [1, 32], strides = [1, 1]} : vector<1x128xf32> to vector<1x32xf32>
    %567 = vector.extract_strided_slice %563 {offsets = [0, 96], sizes = [1, 32], strides = [1, 1]} : vector<1x128xf32> to vector<1x32xf32>
    %568 = arith.mulf %565, %481 : vector<1x32xf32>
    %569 = arith.mulf %564, %566 : vector<1x32xf32>
    %570 = arith.addf %568, %569 : vector<1x32xf32>
    %571 = math.tanh %570 : vector<1x32xf32>
    %572 = arith.mulf %567, %571 : vector<1x32xf32>
    %cst_167 = arith.constant dense<0.000000e+00> : vector<1x128xf32>
    %573 = tpu.matmul %572, %1, %cst_167 {dimension_numbers = #tpu.dot_dimension_numbers<[1], [0], [0], [1], [0, 0, 1, 1], [], []>} : vector<1x32xf32>, vector<32x128xf32>, vector<1x128xf32> -> vector<1x128xf32>
    %cst_168 = arith.constant dense<0.000000e+00> : vector<1x128xf32>
    %574 = tpu.matmul %504, %2, %cst_168 {dimension_numbers = #tpu.dot_dimension_numbers<[1], [0], [0], [1], [0, 0, 1, 1], [], []>} : vector<1x32xf32>, vector<32x128xf32>, vector<1x128xf32> -> vector<1x128xf32>
    %575 = arith.addf %573, %574 : vector<1x128xf32>
    %576 = arith.addf %575, %3 : vector<1x128xf32>
    %577 = arith.mulf %576, %13 : vector<1x128xf32>
    %578 = arith.negf %577 : vector<1x128xf32>
    %579 = math.exp %578 : vector<1x128xf32>
    %cst_169 = arith.constant 1.000000e+00 : f32
    %580 = vector.broadcast %cst_169 : f32 to vector<1x128xf32>
    %581 = arith.addf %580, %579 : vector<1x128xf32>
    %582 = arith.divf %580, %581 : vector<1x128xf32>
    %583 = arith.mulf %582, %13 : vector<1x128xf32>
    %584 = arith.addf %583, %16 : vector<1x128xf32>
    %585 = vector.extract_strided_slice %584 {offsets = [0, 0], sizes = [1, 32], strides = [1, 1]} : vector<1x128xf32> to vector<1x32xf32>
    %586 = vector.extract_strided_slice %584 {offsets = [0, 32], sizes = [1, 32], strides = [1, 1]} : vector<1x128xf32> to vector<1x32xf32>
    %587 = vector.extract_strided_slice %584 {offsets = [0, 64], sizes = [1, 32], strides = [1, 1]} : vector<1x128xf32> to vector<1x32xf32>
    %588 = vector.extract_strided_slice %584 {offsets = [0, 96], sizes = [1, 32], strides = [1, 1]} : vector<1x128xf32> to vector<1x32xf32>
    %589 = arith.mulf %586, %502 : vector<1x32xf32>
    %590 = arith.mulf %585, %587 : vector<1x32xf32>
    %591 = arith.addf %589, %590 : vector<1x32xf32>
    %592 = math.tanh %591 : vector<1x32xf32>
    %593 = arith.mulf %588, %592 : vector<1x32xf32>
    %594 = vector.extract_strided_slice %552 {offsets = [1, 0], sizes = [1, 128], strides = [1, 1]} : vector<2x128xf32> to vector<1x128xf32>
    %cst_170 = arith.constant dense<0.000000e+00> : vector<1x128xf32>
    %595 = tpu.matmul %572, %0, %cst_170 {dimension_numbers = #tpu.dot_dimension_numbers<[1], [0], [0], [1], [0, 0, 1, 1], [], []>} : vector<1x32xf32>, vector<32x128xf32>, vector<1x128xf32> -> vector<1x128xf32>
    %596 = arith.addf %594, %595 : vector<1x128xf32>
    %597 = arith.mulf %596, %13 : vector<1x128xf32>
    %598 = arith.negf %597 : vector<1x128xf32>
    %599 = math.exp %598 : vector<1x128xf32>
    %cst_171 = arith.constant 1.000000e+00 : f32
    %600 = vector.broadcast %cst_171 : f32 to vector<1x128xf32>
    %601 = arith.addf %600, %599 : vector<1x128xf32>
    %602 = arith.divf %600, %601 : vector<1x128xf32>
    %603 = arith.mulf %602, %13 : vector<1x128xf32>
    %604 = arith.addf %603, %16 : vector<1x128xf32>
    %605 = vector.extract_strided_slice %604 {offsets = [0, 0], sizes = [1, 32], strides = [1, 1]} : vector<1x128xf32> to vector<1x32xf32>
    %606 = vector.extract_strided_slice %604 {offsets = [0, 32], sizes = [1, 32], strides = [1, 1]} : vector<1x128xf32> to vector<1x32xf32>
    %607 = vector.extract_strided_slice %604 {offsets = [0, 64], sizes = [1, 32], strides = [1, 1]} : vector<1x128xf32> to vector<1x32xf32>
    %608 = vector.extract_strided_slice %604 {offsets = [0, 96], sizes = [1, 32], strides = [1, 1]} : vector<1x128xf32> to vector<1x32xf32>
    %609 = arith.mulf %606, %570 : vector<1x32xf32>
    %610 = arith.mulf %605, %607 : vector<1x32xf32>
    %611 = arith.addf %609, %610 : vector<1x32xf32>
    %612 = math.tanh %611 : vector<1x32xf32>
    %613 = arith.mulf %608, %612 : vector<1x32xf32>
    %cst_172 = arith.constant dense<0.000000e+00> : vector<1x128xf32>
    %614 = tpu.matmul %613, %1, %cst_172 {dimension_numbers = #tpu.dot_dimension_numbers<[1], [0], [0], [1], [0, 0, 1, 1], [], []>} : vector<1x32xf32>, vector<32x128xf32>, vector<1x128xf32> -> vector<1x128xf32>
    %cst_173 = arith.constant dense<0.000000e+00> : vector<1x128xf32>
    %615 = tpu.matmul %593, %2, %cst_173 {dimension_numbers = #tpu.dot_dimension_numbers<[1], [0], [0], [1], [0, 0, 1, 1], [], []>} : vector<1x32xf32>, vector<32x128xf32>, vector<1x128xf32> -> vector<1x128xf32>
    %616 = arith.addf %614, %615 : vector<1x128xf32>
    %617 = arith.addf %616, %3 : vector<1x128xf32>
    %618 = arith.mulf %617, %13 : vector<1x128xf32>
    %619 = arith.negf %618 : vector<1x128xf32>
    %620 = math.exp %619 : vector<1x128xf32>
    %cst_174 = arith.constant 1.000000e+00 : f32
    %621 = vector.broadcast %cst_174 : f32 to vector<1x128xf32>
    %622 = arith.addf %621, %620 : vector<1x128xf32>
    %623 = arith.divf %621, %622 : vector<1x128xf32>
    %624 = arith.mulf %623, %13 : vector<1x128xf32>
    %625 = arith.addf %624, %16 : vector<1x128xf32>
    %626 = vector.extract_strided_slice %625 {offsets = [0, 0], sizes = [1, 32], strides = [1, 1]} : vector<1x128xf32> to vector<1x32xf32>
    %627 = vector.extract_strided_slice %625 {offsets = [0, 32], sizes = [1, 32], strides = [1, 1]} : vector<1x128xf32> to vector<1x32xf32>
    %628 = vector.extract_strided_slice %625 {offsets = [0, 64], sizes = [1, 32], strides = [1, 1]} : vector<1x128xf32> to vector<1x32xf32>
    %629 = vector.extract_strided_slice %625 {offsets = [0, 96], sizes = [1, 32], strides = [1, 1]} : vector<1x128xf32> to vector<1x32xf32>
    %630 = arith.mulf %627, %591 : vector<1x32xf32>
    %631 = arith.mulf %626, %628 : vector<1x32xf32>
    %632 = arith.addf %630, %631 : vector<1x32xf32>
    %633 = math.tanh %632 : vector<1x32xf32>
    %634 = arith.mulf %629, %633 : vector<1x32xf32>
    %635 = tpu.concatenate %593, %634 in 0 : vector<1x32xf32>, vector<1x32xf32> -> vector<2x32xf32>
    %636 = vector.shape_cast %635 : vector<2x32xf32> to vector<2x1x32xf32>
    %637 = vector.broadcast %636 : vector<2x1x32xf32> to vector<2x8x32xf32>
    %638 = arith.mulf %637, %4 : vector<2x8x32xf32>
    %cst_175 = arith.constant dense<0.000000e+00> : vector<2x8xf32>
    %639 = vector.multi_reduction <add>, %638, %cst_175 [2] : vector<2x8x32xf32> to vector<2x8xf32>
    %cst_176 = arith.constant dense<0xFF800000> : vector<2xf32>
    %640 = vector.multi_reduction <maximumf>, %639, %cst_176 [1] : vector<2x8xf32> to vector<2xf32>
    %641 = vector.shape_cast %640 : vector<2xf32> to vector<2x1xf32>
    %642 = vector.broadcast %641 : vector<2x1xf32> to vector<2x8xf32>
    %643 = arith.subf %639, %642 : vector<2x8xf32>
    %644 = math.exp %643 : vector<2x8xf32>
    %cst_177 = arith.constant dense<0.000000e+00> : vector<2xf32>
    %645 = vector.multi_reduction <add>, %644, %cst_177 [1] : vector<2x8xf32> to vector<2xf32>
    %646 = vector.shape_cast %645 : vector<2xf32> to vector<2x1xf32>
    %647 = vector.broadcast %646 : vector<2x1xf32> to vector<2x8xf32>
    %648 = arith.divf %644, %647 : vector<2x8xf32>
    %649 = vector.shape_cast %648 : vector<2x8xf32> to vector<2x8x1xf32>
    %650 = vector.broadcast %649 : vector<2x8x1xf32> to vector<2x8x32xf32>
    %651 = arith.mulf %4, %650 : vector<2x8x32xf32>
    %cst_178 = arith.constant dense<0.000000e+00> : vector<2x32xf32>
    %652 = vector.multi_reduction <add>, %651, %cst_178 [1] : vector<2x8x32xf32> to vector<2x32xf32>
    %c0_179 = arith.constant 0 : index
    %c0_180 = arith.constant 0 : index
    %653 = vector.load %arg9[%c0_179, %c0_180] : memref<32x10xf32, #tpu.memory_space<vmem>>, vector<32x10xf32>
    %cst_181 = arith.constant dense<0.000000e+00> : vector<2x10xf32>
    %654 = tpu.matmul %635, %653, %cst_181 {dimension_numbers = #tpu.dot_dimension_numbers<[1], [0], [0], [1], [0, 0, 1, 1], [], []>} : vector<2x32xf32>, vector<32x10xf32>, vector<2x10xf32> -> vector<2x10xf32>
    %c0_182 = arith.constant 0 : index
    %c0_183 = arith.constant 0 : index
    %655 = vector.load %arg10[%c0_182, %c0_183] : memref<32x10xf32, #tpu.memory_space<vmem>>, vector<32x10xf32>
    %cst_184 = arith.constant dense<0.000000e+00> : vector<2x10xf32>
    %656 = tpu.matmul %652, %655, %cst_184 {dimension_numbers = #tpu.dot_dimension_numbers<[1], [0], [0], [1], [0, 0, 1, 1], [], []>} : vector<2x32xf32>, vector<32x10xf32>, vector<2x10xf32> -> vector<2x10xf32>
    %657 = arith.addf %654, %656 : vector<2x10xf32>
    %c0_185 = arith.constant 0 : index
    %c0_186 = arith.constant 0 : index
    %658 = vector.load %arg11[%c0_185, %c0_186] : memref<1x10xf32, #tpu.memory_space<vmem>>, vector<1x10xf32>
    %659 = vector.broadcast %658 : vector<1x10xf32> to vector<2x10xf32>
    %660 = arith.addf %657, %659 : vector<2x10xf32>
    %cst_187 = arith.constant dense<0xFF800000> : vector<2xf32>
    %661 = vector.multi_reduction <maximumf>, %660, %cst_187 [1] : vector<2x10xf32> to vector<2xf32>
    %662 = vector.shape_cast %661 : vector<2xf32> to vector<2x1xf32>
    %663 = vector.broadcast %662 : vector<2x1xf32> to vector<2x10xf32>
    %664 = arith.subf %660, %663 : vector<2x10xf32>
    %665 = math.exp %664 : vector<2x10xf32>
    %cst_188 = arith.constant dense<0.000000e+00> : vector<2xf32>
    %666 = vector.multi_reduction <add>, %665, %cst_188 [1] : vector<2x10xf32> to vector<2xf32>
    %667 = vector.shape_cast %666 : vector<2xf32> to vector<2x1xf32>
    %668 = math.log %667 : vector<2x1xf32>
    %669 = arith.addf %668, %662 : vector<2x1xf32>
    %670 = vector.broadcast %669 : vector<2x1xf32> to vector<2x10xf32>
    %671 = arith.subf %660, %670 : vector<2x10xf32>
    %672 = tpu.concatenate %671, %648, %32 in 1 : vector<2x10xf32>, vector<2x8xf32>, vector<2x110xf32> -> vector<2x128xf32>
    %673 = vector.shape_cast %672 : vector<2x128xf32> to vector<1x2x128xf32>
    %c4 = arith.constant 4 : index
    %c0_189 = arith.constant 0 : index
    %c0_190 = arith.constant 0 : index
    %674 = vector.load %arg12[%c4, %c0_189, %c0_190] : memref<5x2x128xf32, #tpu.memory_space<vmem>>, vector<1x2x128xf32>
    tpu.vector_store %arg12[%c4, %c0_189, %c0_190], %673 {strides = array<i32>} : memref<5x2x128xf32, #tpu.memory_space<vmem>>, vector<1x2x128xf32>,
    return
  }
}

</mosaic_0001>

<bundles_post_ra>
// kernel: tpu_custom_call.1
= control target key start
LH: loop header
LB: loop body
LE: loop exit
PB: predicated region body
PF: predicated region fallthrough
CT: control target
= control target key end

     0   :  { %17 = vsyncpa [#allocation3], 0  ;;  %s8146_s0 = inlined_call_operand.hbm [shape: f32[2,8,32], index: 0, kind: input, shape index: {}]   ;;  %s8147_s1 = inlined_call_operand.vmem [shape: f32[2,10], index: 1, kind: input, shape index: {}]   ;;  %s8148_s2 = inlined_call_operand.hbm [shape: f32[10,128], index: 2, kind: input, shape index: {}]   ;;  %s8149_s3 = inlined_call_operand.vmem [shape: f32[32,128], index: 3, kind: input, shape index: {}]   ;;  %s8150_s4 = inlined_call_operand.vmem [shape: f32[32,128], index: 4, kind: input, shape index: {}]   ;;  %s8151_s5 = inlined_call_operand.hbm [shape: f32[1,128], index: 5, kind: input, shape index: {}]   ;;  %s8152_s6 = inlined_call_operand.vmem [shape: f32[32,128], index: 6, kind: input, shape index: {}]   ;;  %s8153_s7 = inlined_call_operand.hbm [shape: f32[32,128], index: 7, kind: input, shape index: {}]   ;;  %s8154_s8 = inlined_call_operand.hbm [shape: f32[1,128], index: 8, kind: input, shape index: {}]   ;;  %s8155_s9 = inlined_call_operand.vmem [shape: f32[32,10], index: 9, kind: input, shape index: {}]   ;;  %s8156_s10 = inlined_call_operand.vmem [shape: f32[32,10], index: 10, kind: input, shape index: {}]   ;;  %s8157_s11 = inlined_call_operand.vmem [shape: f32[1,10], index: 11, kind: input, shape index: {}]   ;;  %s8158_s12 = inlined_call_operand.hbm [shape: f32[5,2,128], index: 12, kind: output, shape index: {}]  }
   0x1   :  { %18 = vsyncpa [#allocation6], 0 }
   0x2   :  { %19 = vsyncpa [#allocation9], 0 }
   0x3   :  { %20 = vsyncpa [#allocation4], 0  ;;  %s6934_s21 = smov [#allocation5]   ;;  %s6935_s23 = smov [#allocation8]  }
   0x4   :  { %s40_s22 = sshll.u32 %s6934_s21, 4  ;;  %s68_s24 = sshll.u32 %s6935_s23, 4  ;;  %s41_s22 = int_to_ptr.vmem [resolvable:$true] %s40_s22  ;;  %s7018_s24 = int_to_ptr.vmem [resolvable:$true] %s68_s24 }
   0x5   :  { %s6794_s27 = scalar_lea.hbm %s8148_s2, 256 }
   0x6   :  { %p6795_p0 = scmp.ne.s32.totalorder %s8148_s2, %s6794_s27  ;;  %p6798_p1 = scmp.lt.u32.totalorder %s6794_s27, %s8148_s2 }
   0x8   :  { %p6800_p2 = pnand %p6798_p1, %p6795_p0 }
   0xa   :  { %6803 = shalt.err (!%p6800_p2)
}
   0xb   :  { %s6804_s14 = scalar_lea.vmem %s41_s22, 256  ;;  %p6809_p4 = scmp.lt.s32.totalorder %s41_s22, %s41_s22 }
   0xc   :  { %p6805_p3 = scmp.ne.s32.totalorder %s41_s22, %s6804_s14  ;;  %p6810_p5 = scmp.lt.s32.totalorder %s6804_s14, %s6804_s14 }
   0xe   :  { %p6811_p6 = por %p6810_p5, %p6809_p4 }
  0x10   :  { %p6812_p7 = pnand %p6811_p6, %p6805_p3 }
  0x12   :  { %6815 = shalt.err (!%p6812_p7)
}
  0x13   :  { %s6936_s15 = smov 128   ;;  %s6937_s16 = smov 8  }
  0x14   :  { %46 = dma.hbm_to_vmem [thread:$0]  %s8148_s2, 256, %s41_s22, [#allocation6], %s6936_s15, %s6936_s15, %s6937_s16  }
  0x15   :  { %s6816_s21 = scalar_lea.hbm %s8153_s7, 512 }
  0x16   :  { %p6817_p8 = scmp.ne.s32.totalorder %s8153_s7, %s6816_s21  ;;  %p6820_p9 = scmp.lt.u32.totalorder %s6816_s21, %s8153_s7 }
  0x18   :  { %p6822_p10 = pnand %p6820_p9, %p6817_p8 }
  0x1a   :  { %6825 = shalt.err (!%p6822_p10)
}
  0x1b   :  { %s6826_s28 = scalar_lea.vmem %s7018_s24, 512  ;;  %p6831_p12 = scmp.lt.s32.totalorder %s7018_s24, %s7018_s24 }
  0x1c   :  { %p6827_p11 = scmp.ne.s32.totalorder %s7018_s24, %s6826_s28  ;;  %p6832_p13 = scmp.lt.s32.totalorder %s6826_s28, %s6826_s28 }
  0x1e   :  { %p6833_p0 = por %p6832_p13, %p6831_p12 }
  0x20   :  { %p6834_p1 = pnand %p6833_p0, %p6827_p11 }
  0x22   :  { %6837 = shalt.err (!%p6834_p1)
}
  0x23   :  { %74 = dma.hbm_to_vmem [thread:$0]  %s8153_s7, 512, %s7018_s24, [#allocation9], %s6936_s15, %s6936_s15, %s6937_s16  }
  0x24   :  { %s6938_s29 = smov [#allocation2]   ;;  %s6939_s13 = smov [#allocation7]  }
  0x25   :  { %s26_s30 = sshll.u32 %s6938_s29, 4  ;;  %s57_s14 = sshll.u32 %s6939_s13, 4  ;;  %s27_s30 = int_to_ptr.vmem [resolvable:$true] %s26_s30  ;;  %s58_s14 = int_to_ptr.vmem [resolvable:$true] %s57_s14 }
  0x26   :  { %s6838_s19 = scalar_lea.hbm %s8146_s0, 256 }
  0x27   :  { %p6839_p2 = scmp.ne.s32.totalorder %s8146_s0, %s6838_s19  ;;  %p6842_p3 = scmp.lt.u32.totalorder %s6838_s19, %s8146_s0 }
  0x29   :  { %p6844_p4 = pnand %p6842_p3, %p6839_p2 }
  0x2b   :  { %6847 = shalt.err (!%p6844_p4)
}
  0x2c   :  { %s6848_s7 = scalar_lea.vmem %s27_s30, 256  ;;  %p6853_p6 = scmp.lt.s32.totalorder %s27_s30, %s27_s30 }
  0x2d   :  { %p6849_p5 = scmp.ne.s32.totalorder %s27_s30, %s6848_s7  ;;  %p6854_p7 = scmp.lt.s32.totalorder %s6848_s7, %s6848_s7 }
  0x2f   :  { %p6855_p8 = por %p6854_p7, %p6853_p6 }
  0x31   :  { %p6856_p9 = pnand %p6855_p8, %p6849_p5 }
  0x33   :  { %6859 = shalt.err (!%p6856_p9)
}
  0x34   :  { %32 = dma.hbm_to_vmem [thread:$0]  %s8146_s0, 256, %s27_s30, [#allocation3], %s6936_s15, %s6936_s15, %s6937_s16  }
  0x35   :  { %s6860_s2 = scalar_lea.hbm %s8151_s5, 16 }
  0x36   :  { %p6861_p10 = scmp.ne.s32.totalorder %s8151_s5, %s6860_s2  ;;  %p6864_p11 = scmp.lt.u32.totalorder %s6860_s2, %s8151_s5 }
  0x38   :  { %p6866_p12 = pnand %p6864_p11, %p6861_p10 }
  0x3a   :  { %6869 = shalt.err (!%p6866_p12)
}
  0x3b   :  { %s6870_s18 = scalar_lea.vmem %s58_s14, 16  ;;  %s6874_s19 = scalar_lea.vmem %s58_s14, 32 }
  0x3c   :  { %p6871_p13 = scmp.ne.s32.totalorder %s58_s14, %s6870_s18  ;;  %p6875_p0 = scmp.lt.s32.totalorder %s58_s14, %s58_s14 }
  0x3d   :  { %p6876_p1 = scmp.lt.s32.totalorder %s6874_s19, %s6870_s18 }
  0x3f   :  { %p6877_p2 = por %p6876_p1, %p6875_p0 }
  0x41   :  { %p6878_p3 = pnand %p6877_p2, %p6871_p13 }
  0x43   :  { %6881 = shalt.err (!%p6878_p3)
}
  0x44   :  { %60 = dma.hbm_to_vmem [thread:$0]  %s8151_s5, 16, %s58_s14, [#allocation6]  }
  0x45   :  { %s6940_s16 = smov [#allocation10]   ;;  %s6882_s23 = scalar_lea.hbm %s8154_s8, 16 }
  0x46   :  { %s81_s30 = sshll.u32 %s6940_s16, 4  ;;  %p6883_p4 = scmp.ne.s32.totalorder %s8154_s8, %s6882_s23  ;;  %s82_s30 = int_to_ptr.vmem [resolvable:$true] %s81_s30 }
  0x47   :  { %p6886_p5 = scmp.lt.u32.totalorder %s6882_s23, %s8154_s8 }
  0x49   :  { %p6888_p6 = pnand %p6886_p5, %p6883_p4 }
  0x4b   :  { %6891 = shalt.err (!%p6888_p6)
}
  0x4c   :  { %s6892_s27 = scalar_lea.vmem %s82_s30, 16  ;;  %s6896_s5 = scalar_lea.vmem %s82_s30, 32 }
  0x4d   :  { %p6893_p7 = scmp.ne.s32.totalorder %s82_s30, %s6892_s27  ;;  %p6897_p8 = scmp.lt.s32.totalorder %s82_s30, %s82_s30 }
  0x4e   :  { %p6898_p9 = scmp.lt.s32.totalorder %s6896_s5, %s6892_s27 }
  0x50   :  { %p6899_p10 = por %p6898_p9, %p6897_p8 }
  0x52   :  { %p6900_p11 = pnand %p6899_p10, %p6893_p7 }
  0x54   :  { %6903 = shalt.err (!%p6900_p11)
}
  0x55   :  { %84 = dma.hbm_to_vmem [thread:$0]  %s8154_s8, 16, %s82_s30, [#allocation9]  }
  0x56   :  { %6926 = dma.done.wait [#allocation3], 256  }
  0x57   :  { %6927 = vsyncadd [#allocation3], 4294967040 }
  0x58   :  { %6928 = dma.done.wait [#allocation6], 272  }
  0x59   :  { %6929 = vsyncadd [#allocation6], 4294967024 }
  0x5a   :  { %6930 = dma.done.wait [#allocation9], 528  }
  0x5b   :  { %6931 = vsyncadd [#allocation9], 4294966768  ;;  %v6941_v0 = vmov 0.0|0.0   ;;  %vm6942_vm0 = vmmov 0   ;;  %v6943_v1 = vmov 0.0   ;;  %vm217_vm1 = vcmask 1041408  }
  0x5c   :  { %6297 = vmatprep.subr.bf16.mxu0 %v6941_v0  ;;  %6303 = vmatprep.subr.bf16.mxu1 %v6941_v0  ;;  %v131_v2 = vld [vmem:[%s8149_s3] sm:$0xff]  ;;  %v132_v3 = vld [vmem:[%s8149_s3 + $0x8] sm:$0xff]  ;;  %v7106_v4 = vld [vmem:[#allocation5] sm:$0xff]  ;;  %vm6944_vm2 = vmmov 1   ;;  %vm213_vm4 = vcmask 80896   ;;  %vm138_vm5 = vcmask 1041409   ;;  %v121_v23 = vlaneseq }
  0x5d   :  { %5782 = vmatprep.mubr.msk.f32.mxu1 %vm6942_vm0, %v6943_v1  ;;  %5775 = vmatprep.mubr.msk.f32.mxu0 %vm6942_vm0, %v6943_v1  ;;  %v7108_v5 = vpack.c.bf16 %v132_v3, %v131_v2  ;;  %v130_v6 = vld [vmem:[#allocation5 + $0x8] sm:$0x3]  ;;  %vm7110_vm3 = vmpackc.low %vm217_vm1, %vm6944_vm2  ;;  %v133_v8 = vld [vmem:[%s8149_s3 + $0x10] sm:$0xff]  ;;  %vm140_vm6 = vcmask 261120   ;;  %v6945_v32 = vmov 1.0   ;;  %vm855_vm10 = vcmask 1040384  }
  0x5e   :  { %v6304_v9 = vpack.c.bf16 %v130_v6, %v7106_v4  ;;  %v134_v10 = vld [vmem:[%s8149_s3 + $0x18] sm:$0xff]  ;;  %v106_v11 = vld [vmem:[%s8150_s4] sm:$0xff]  ;;  %v107_v12 = vld [vmem:[%s8150_s4 + $0x8] sm:$0xff]  ;;  %v7170_v24 = vand.u32 127, %v121_v23  ;;  %vm924_vm11 = vcmask 58368   ;;  %vm1172_vm12 = vcmask 74752  }
  0x5f   :  { %6299 = vmatpush3.bf16.msra.mxu0 %v7108_v5  ;;  %v7128_v13 = vpack.c.bf16 %v134_v10, %v133_v8  ;;  %v7130_v14 = vld [vmem:[#allocation2 + $0x8] sm:$0xff]  ;;  %v128_v15 = vld [vmem:[%s8147_s1] sm:$0x3]  ;;  %v7138_v16 = vpack.c.bf16 %v107_v12, %v106_v11  ;;  %v108_v19 = vld [vmem:[%s8150_s4 + $0x10] sm:$0xff]  ;;  %s6946_s1 = smov 64   ;;  %vm1198_vm13 = vcmask 146432  }
  0x60   :  { %6306 = vmatpush3.bf16.msk.msra.mxu1 %vm7110_vm3, %v6304_v9  ;;  %6300 = vmatprep.subr.bf16.mxu0 %v6941_v0  ;;  %v7140_v17 = vld [vmem:[#allocation2] sm:$0xff]  ;;  %v137_v18 = vrot.slane %v7130_v14, 7  ;;  %v109_v20 = vld [vmem:[%s8150_s4 + $0x18] sm:$0xff]  ;;  %vm123_vm7 = vcmp.ge.s32.totalorder %v7170_v24, 64  ;;  %vm124_vm8 = vcmp.lt.s32.totalorder %v7170_v24, 96  ;;  %s6947_s4 = smov 32  }
  0x61   :  { %6307 = vmatprep.subr.bf16.mxu1 %v6941_v0  ;;  %v7155_v22 = vpack.c.bf16 %v109_v20, %v108_v19  ;;  %v7174_v28 = vld [vmem:[#allocation7] ss:$0 sm:$0xff]  ;;  %vm125_vm9 = vmand %vm123_vm7, %vm124_vm8  ;;  %v114_v50 = vld [vmem:[#allocation8] sm:$0xff] }
  0x62   :  { %v139_v21 = vsel %vm138_vm5, %v137_v18, %v7140_v17  ;;  %v7179_v33 = vsel %vm125_vm9, 2.0, %v6945_v32  ;;  %v7184_v42 = vsel %vm125_vm9, -1.0, %v6943_v1  ;;  %v115_v51 = vld [vmem:[#allocation8 + $0x8] sm:$0xff]  ;;  %v116_v52 = vld [vmem:[#allocation8 + $0x10] sm:$0xff]  ;;  %v117_v54 = vld [vmem:[#allocation8 + $0x18] sm:$0xff] }
  0x63   :  { %5783 = vmatmul.mubr.msk.f32.vlgmr.msra.gmra.mrb[0].mxu1 %vm213_vm4, %v128_v15  ;;  %6302 = vmatpush3.bf16.msra.mxu0 %v7128_v13  ;;  %v7193_v53 = vpack.c.bf16 %v115_v51, %v114_v50  ;;  %v110_v55 = vld [vmem:[%s8152_s6] sm:$0xff]  ;;  %v111_v56 = vld [vmem:[%s8152_s6 + $0x8] sm:$0xff]  ;;  %v112_v58 = vld [vmem:[%s8152_s6 + $0x10] sm:$0xff]  ;;  %v7210_v60 = vpack.c.bf16 %v117_v54, %v116_v52 }
  0x64   :  { %6309 = vmatpush3.bf16.msra.mxu1 %v7138_v16  ;;  %5793 = vmatprep.mubr.msk.f32.mxu1 %vm6942_vm0, %v6943_v1  ;;  %v7201_v57 = vpack.c.bf16 %v111_v56, %v110_v55  ;;  %v113_v59 = vld [vmem:[%s8152_s6 + $0x18] sm:$0xff]  ;;  %v7244_v9 = vld [vmem:[#allocation10] sm:$0x1]  ;;  %s6948_s6 = smov 96  }
  0x65   :  { %6310 = vmatprep.subr.bf16.mxu1 %v6941_v0  ;;  %6313 = vmatprep.subr.bf16.mxu0 %v6941_v0  ;;  %v7214_v61 = vpack.c.bf16 %v113_v59, %v112_v58 }
  0x66   :  { %5776 = vmatmul.mubr.msk.f32.vlgmr.msra.gmra.mrb[0].mxu0 %vm140_vm6, %v139_v21 }
  0x67   :  { %5804 = vmatprep.mubr.msk.f32.mxu0 %vm6942_vm0, %v6943_v1  ;;  %6315 = vmatpush3.bf16.msra.mxu0 %v7193_v53 }
  0x68   :  { %6312 = vmatpush3.bf16.msra.mxu1 %v7155_v22  ;;  %6316 = vmatprep.subr.bf16.mxu0 %v6941_v0 }
  0x69   :  { %6319 = vmatprep.subr.bf16.mxu1 %v6941_v0 }
  0x6b   :  { %5794 = vmatmul.mubr.f32.vlgmr.msra.gmra.mrb[2].mxu1 %v6943_v1  ;;  %6318 = vmatpush3.bf16.msra.mxu0 %v7210_v60 }
  0x6c   :  { %5815 = vmatprep.mubr.msk.f32.mxu1 %vm6942_vm0, %v6943_v1  ;;  %6321 = vmatpush3.bf16.msra.mxu1 %v7201_v57 }
  0x6d   :  { %6322 = vmatprep.subr.bf16.mxu1 %v6941_v0  ;;  %6325 = vmatprep.subr.bf16.mxu0 %v6941_v0 }
  0x6e   :  { %5805 = vmatmul.mubr.f32.vlgmr.msra.gmra.mrb[2].mxu0 %v6943_v1 }
  0x6f   :  { %6327 = vmatpush3.bf16.msra.mxu0 %v7138_v16  ;;  %5826 = vmatprep.mubr.msk.f32.mxu0 %vm6942_vm0, %v6943_v1 }
  0x70   :  { %6324 = vmatpush3.bf16.msra.mxu1 %v7214_v61  ;;  %6328 = vmatprep.subr.bf16.mxu0 %v6941_v0 }
  0x71   :  { %6331 = vmatprep.subr.bf16.mxu1 %v6941_v0 }
  0x73   :  { %6330 = vmatpush3.bf16.msra.mxu0 %v7155_v22 }
  0x74   :  { %6337 = vmatprep.subr.bf16.mxu0 %v6941_v0 }
 0x136   :  { %v287_v25 = vpop.f32.mrb[0].mxu1 }
 0x137   :  { %v5784_v26 = vpop.f32.mrb[1].mxu1 }
 0x139   :  { %v209_v27 = vpop.f32.mrb[0].mxu0 }
 0x13a   :  { %v288_v29 = vadd.f32 %v287_v25, %v209_v27  ;;  %v5777_v30 = vpop.f32.mrb[1].mxu0 }
 0x13c   :  { %v7177_v31 = vadd.f32 %v7174_v28, %v288_v29 }
 0x13e   :  { %v368_v34 = vpop.f32.mrb[2].mxu1 }
 0x13f   :  { %v372_v35 = vadd.f32 %v368_v34, %v7177_v31  ;;  %v5795_v36 = vpop.f32.mrb[3].mxu1 }
 0x141   :  { %v373_v37 = vmul.f32 %v372_v35, %v7179_v33  ;;  %v465_v3 = vpop.f32.mrb[2].mxu0 }
 0x142   :  { %v5806_v6 = vpop.f32.mrb[3].mxu0 }
 0x143   :  { %v5448_v38 = vmul.f32 -1.442695, %v373_v37 }
 0x145   :  { %6608 = vpow2.f32 %v5448_v38 }
 0x14f   :  { %v6609_v39 = vpop.eup %6608 }
 0x150   :  { %v377_v40 = vadd.f32 1.0, %v6609_v39 }
 0x152   :  { %6610 = vrcp.f32 %v377_v40 }
 0x15c   :  { %v6611_v41 = vpop.eup %6610 }
 0x15d   :  { %v380_v43 = vmul.f32 %v6611_v41, %v7179_v33 }
 0x15f   :  { %v381_v44 = vadd.f32 %v380_v43, %v7184_v42 }
 0x161   :  { %384 = vrot.lane.b32.xlu0 %v381_v44, %s6946_s1  ;;  %v382_v47 = vmul.f32 0.0, %v381_v44 }
 0x1d3   :  { %v385_v45 = vpop.permute.xlu0 %384 }
 0x1d4   :  { %v387_v46 = vmul.f32 %v385_v45, %v381_v44 }
 0x1d6   :  { %389 = vrot.lane.b32.xlu0 %v387_v46, %s6947_s4 }
 0x248   :  { %v390_v48 = vpop.permute.xlu0 %389 }
 0x249   :  { %v7190_v49 = vadd.f32 %v390_v48, %v382_v47 }
 0x24b   :  { %6612 = vtanh.f32 %v7190_v49  ;;  %v655_v46 = vrot.slane %v7190_v49, 7 }
 0x255   :  { %v6613_v62 = vpop.eup %6612 }
 0x256   :  { %395 = vrot.lane.b32.xlu1 %v6613_v62, %s6946_s1 }
 0x2c8   :  { %v396_v63 = vpop.permute.xlu1 %395 }
 0x2c9   :  { %v398_v2 = vmul.f32 %v396_v63, %v381_v44 }
 0x2cb   :  { %470 = vrot.lane.b32.xlu1 %v398_v2, %s6947_s4 }
 0x33d   :  { %v471_v8 = vpop.permute.xlu1 %470 }
 0x33e   :  { %5816 = vmatmul.mubr.msk.f32.vlgmr.msra.gmra.mrb[4].mxu1 %vm140_vm6, %v471_v8  ;;  %5827 = vmatmul.mubr.msk.f32.vlgmr.msra.gmra.mrb[4].mxu0 %vm140_vm6, %v471_v8 }
 0x33f   :  { %6333 = vmatpush3.bf16.msra.mxu1 %v7193_v53  ;;  %6339 = vmatpush3.bf16.msra.mxu0 %v7201_v57 }
 0x340   :  { %6334 = vmatprep.subr.bf16.mxu1 %v6941_v0  ;;  %6340 = vmatprep.subr.bf16.mxu0 %v6941_v0 }
 0x341   :  { %5837 = vmatprep.mubr.msk.f32.mxu1 %vm6942_vm0, %v6943_v1  ;;  %5848 = vmatprep.mubr.msk.f32.mxu0 %vm6942_vm0, %v6943_v1 }
 0x343   :  { %6336 = vmatpush3.bf16.msra.mxu1 %v7210_v60  ;;  %6342 = vmatpush3.bf16.msra.mxu0 %v7214_v61 }
 0x344   :  { %6349 = vmatprep.subr.bf16.mxu0 %v6941_v0  ;;  %6343 = vmatprep.subr.bf16.mxu1 %v6941_v0 }
 0x411   :  { %v540_v10 = vpop.f32.mrb[4].mxu1  ;;  %v637_v11 = vpop.f32.mrb[4].mxu0 }
 0x412   :  { %v541_v12 = vadd.f32 %v540_v10, %v465_v3  ;;  %v642_v15 = vrot.slane %v637_v11, 7  ;;  %v5817_v18 = vpop.f32.mrb[5].mxu1  ;;  %v5828_v19 = vpop.f32.mrb[5].mxu0 }
 0x414   :  { %v544_v20 = vadd.f32 %v541_v12, %v7244_v9  ;;  %v644_v21 = vadd.f32 %v642_v15, %v7177_v31 }
 0x416   :  { %v545_v25 = vmul.f32 %v544_v20, %v7179_v33  ;;  %v645_v26 = vmul.f32 %v644_v21, %v7179_v33 }
 0x418   :  { %v5450_v27 = vmul.f32 -1.442695, %v545_v25  ;;  %v5452_v29 = vmul.f32 -1.442695, %v645_v26 }
 0x41a   :  { %6614 = vpow2.f32 %v5450_v27 }
 0x41b   :  { %6616 = vpow2.f32 %v5452_v29 }
 0x424   :  { %v6615_v30 = vpop.eup %6614 }
 0x425   :  { %v6617_v32 = vpop.eup %6616  ;;  %v549_v34 = vadd.f32 1.0, %v6615_v30 }
 0x426   :  { %v649_v35 = vadd.f32 1.0, %v6617_v32 }
 0x427   :  { %6618 = vrcp.f32 %v549_v34 }
 0x428   :  { %6620 = vrcp.f32 %v649_v35 }
 0x431   :  { %v6619_v36 = vpop.eup %6618 }
 0x432   :  { %v6621_v37 = vpop.eup %6620  ;;  %v552_v38 = vmul.f32 %v6619_v36, %v7179_v33 }
 0x433   :  { %v652_v31 = vmul.f32 %v6621_v37, %v7179_v33  ;;  %v6949_v37 = vmov 1966171168  }
 0x434   :  { %v553_v39 = vadd.f32 %v552_v38, %v7184_v42  ;;  %v859_v38 = vunpack.c.l.s4 %v6949_v37  ;;  %v1007_v37 = vld [vmem:[%s8155_s9] sm:$0xff] }
 0x435   :  { %v653_v40 = vadd.f32 %v652_v31, %v7184_v42  ;;  %v7288_v31 = vshrl.u32 %v121_v23, 7 }
 0x436   :  { %556 = vrot.lane.b32.xlu1 %v553_v39, %s6946_s1  ;;  %v554_v47 = vmul.f32 0.0, %v553_v39 }
 0x437   :  { %659 = vrot.lane.b32.xlu0 %v653_v40, %s6946_s1  ;;  %v657_v48 = vmul.f32 %v655_v46, %v653_v40  ;;  %v7298_v46 = vsub.s32 0, %v7288_v31 }
 0x4a8   :  { %v557_v41 = vpop.permute.xlu1 %556 }
 0x4a9   :  { %v660_v43 = vpop.permute.xlu0 %659  ;;  %v559_v44 = vmul.f32 %v557_v41, %v553_v39 }
 0x4aa   :  { %v662_v45 = vmul.f32 %v660_v43, %v653_v40 }
 0x4ab   :  { %561 = vrot.lane.b32.xlu1 %v559_v44, %s6947_s4 }
 0x4ac   :  { %664 = vrot.lane.b32.xlu0 %v662_v45, %s6947_s4 }
 0x51d   :  { %v562_v50 = vpop.permute.xlu1 %561 }
 0x51e   :  { %v665_v51 = vpop.permute.xlu0 %664  ;;  %v564_v52 = vadd.f32 %v562_v50, %v554_v47 }
 0x51f   :  { %v7259_v54 = vadd.f32 %v665_v51, %v657_v48 }
 0x520   :  { %6622 = vtanh.f32 %v564_v52 }
 0x521   :  { %6624 = vtanh.f32 %v7259_v54 }
 0x52a   :  { %v6623_v55 = vpop.eup %6622 }
 0x52b   :  { %v6625_v56 = vpop.eup %6624  ;;  %567 = vrot.lane.b32.xlu1 %v6623_v55, %s6946_s1 }
 0x52c   :  { %670 = vrot.lane.b32.xlu0 %v6625_v56, %s6946_s1 }
 0x59d   :  { %v568_v58 = vpop.permute.xlu1 %567 }
 0x59e   :  { %v671_v59 = vpop.permute.xlu0 %670  ;;  %v570_v62 = vmul.f32 %v568_v58, %v553_v39  ;;  %v860_v39 = vunpack.c.0.s8 %v859_v38  ;;  %v1008_v38 = vld [vmem:[%s8155_s9 + $0x8] sm:$0xff] }
 0x59f   :  { %v673_v49 = vmul.f32 %v671_v59, %v653_v40 }
 0x5a0   :  { %675 = vrot.lane.b32.xlu0 %v570_v62, %s6947_s4  ;;  %v7293_v43 = vsub.s32 %v860_v39, %v7288_v31  ;;  %v7334_v39 = vpack.c.bf16 %v1008_v38, %v1007_v37 }
 0x5a1   :  { %v750_v63 = vrot.slane %v673_v49, 1 }
 0x5a3   :  { %751 = vrot.lane.b32.xlu1 %v750_v63, %s6947_s4 }
 0x612   :  { %v676_v2 = vpop.permute.xlu0 %675 }
 0x613   :  { %5838 = vmatmul.mubr.msk.f32.vlgmr.msra.gmra.mrb[6].mxu1 %vm140_vm6, %v676_v2 }
 0x614   :  { %5859 = vmatprep.mubr.msk.f32.mxu1 %vm6942_vm0, %v6943_v1 }
 0x615   :  { %v7269_v3 = vpop.permute.xlu1 %751 }
 0x616   :  { %5849 = vmatmul.mubr.msk.f32.vlgmr.msra.gmra.mrb[6].mxu0 %vm140_vm6, %v7269_v3 }
 0x617   :  { %5870 = vmatprep.mubr.msk.f32.mxu0 %vm6942_vm0, %v6943_v1  ;;  %6351 = vmatpush3.bf16.msra.mxu0 %v7334_v39 }
 0x618   :  { %6352 = vmatprep.subr.bf16.mxu0 %v6941_v0 }
 0x6e6   :  { %v745_v6 = vpop.f32.mrb[6].mxu1 }
 0x6e7   :  { %v5839_v8 = vpop.f32.mrb[7].mxu1 }
 0x6e9   :  { %v821_v10 = vpop.f32.mrb[6].mxu0 }
 0x6ea   :  { %v822_v11 = vadd.f32 %v821_v10, %v745_v6  ;;  %v5850_v12 = vpop.f32.mrb[7].mxu0  ;;  %v7317_v6 = vsub.s32 %v7170_v24, %v7288_v31 }
 0x6ec   :  { %v825_v15 = vadd.f32 %v822_v11, %v7244_v9 }
 0x6ee   :  { %v826_v18 = vmul.f32 %v825_v15, %v7179_v33 }
 0x6f0   :  { %v5455_v19 = vmul.f32 -1.442695, %v826_v18 }
 0x6f2   :  { %6626 = vpow2.f32 %v5455_v19  ;;  %v6950_v19 = vmov 0  }
 0x6f3   :  { %6607 = vset.pattern.permute.xlu0 %v6950_v19  ;;  %6606 = vset.pattern.permute.xlu1 %v6950_v19  ;;  %v1014_v19 = vld [vmem:[%s8156_s10 + $0x18] sm:$0xff] }
 0x6fc   :  { %v6627_v20 = vpop.eup %6626 }
 0x6fd   :  { %v830_v21 = vadd.f32 1.0, %v6627_v20  ;;  %v7324_v20 = vsub.s32 1, %v7288_v31 }
 0x6ff   :  { %6628 = vrcp.f32 %v830_v21 }
 0x709   :  { %v6629_v25 = vpop.eup %6628 }
 0x70a   :  { %v833_v26 = vmul.f32 %v6629_v25, %v7179_v33 }
 0x70c   :  { %v834_v27 = vadd.f32 %v833_v26, %v7184_v42 }
 0x70e   :  { %837 = vrot.lane.b32.xlu0 %v834_v27, %s6946_s1  ;;  %v835_v32 = vmul.f32 %v834_v27, %v564_v52 }
 0x780   :  { %v838_v29 = vpop.permute.xlu0 %837 }
 0x781   :  { %v840_v30 = vmul.f32 %v838_v29, %v834_v27 }
 0x783   :  { %842 = vrot.lane.b32.xlu1 %v840_v30, %s6947_s4 }
 0x787   :  { %890 = vrot.lane.b32.xlu1 %v7140_v17, %s6948_s6 }
 0x7f5   :  { %v843_v34 = vpop.permute.xlu1 %842 }
 0x7f6   :  { %v7282_v35 = vadd.f32 %v843_v34, %v835_v32 }
 0x7f8   :  { %6630 = vtanh.f32 %v7282_v35 }
 0x7f9   :  { %v7302_v50 = vpop.permute.xlu1 %890 }
 0x802   :  { %v6631_v36 = vpop.eup %6630 }
 0x803   :  { %848 = vrot.lane.b32.xlu0 %v6631_v36, %s6946_s1 }
 0x807   :  { %892 = vrot.lane.b32.xlu0 %v7130_v14, %s6948_s6 }
 0x875   :  { %v849_v40 = vpop.permute.xlu0 %848 }
 0x876   :  { %v7290_v41 = vmul.f32 %v849_v40, %v834_v27 }
 0x878   :  { %v853_v44 = vrot.slane %v7290_v41, 7 }
 0x879   :  { %v7306_v55 = vpop.permute.xlu0 %892 }
 0x87a   :  { %v856_v45 = vsel %vm855_vm10, %v570_v62, %v853_v44 }
 0x87b   :  { %v864_v47 = vrot.slane %v856_v45, %v7293_v43 }
 0x87d   :  { %v872_v23 = vrot.slane %v864_v47, %v7293_v43  ;;  %v865_v48 = vcombine.high %v864_v47, %v864_v47 }
 0x87f   :  { %v883_v51 = vrot.slane %v872_v23, %v7298_v46  ;;  %v879_v52 = vrot.slane %v865_v48, %v7293_v43 }
 0x881   :  { %v896_v56 = vmul.f32 %v7302_v50, %v883_v51  ;;  %v887_v58 = vrot.slane %v879_v52, %v7298_v46  ;;  %v1009_v52 = vld [vmem:[%s8155_s9 + $0x10] sm:$0xff] }
 0x883   :  { %900 = vrot.lane.b32.xlu1 %v896_v56, %s6947_s4  ;;  %v897_v59 = vmul.f32 %v7306_v55, %v887_v58  ;;  %v1010_v56 = vld [vmem:[%s8155_s9 + $0x18] sm:$0xff] }
 0x884   :  { %v7348_v58 = vpack.c.bf16 %v1010_v56, %v1009_v52 }
 0x885   :  { %902 = vrot.lane.b32.xlu0 %v897_v59, %s6947_s4 }
 0x886   :  { %6354 = vmatpush3.bf16.msra.mxu0 %v7348_v58 }
 0x887   :  { %6361 = vmatprep.subr.bf16.mxu0 %v6941_v0 }
 0x8f5   :  { %v901_v62 = vpop.permute.xlu1 %900 }
 0x8f6   :  { %v906_v49 = vsel %vm140_vm6, %v901_v62, 0.0 }
 0x8f7   :  { %907 = vadd.xlane.f32.xlu1 %v906_v49  ;;  %v903_v63 = vpop.permute.xlu0 %902 }
 0x8f8   :  { %v909_v2 = vsel %vm140_vm6, %v903_v63, 0.0 }
 0x8f9   :  { %910 = vadd.xlane.f32.xlu0 %v909_v2 }
 0x984   :  { %v908_v8 = vpop.xlane.xlu1 %907 }
 0x985   :  { %v917_v11 = vrot.slane %v908_v8, %v7317_v6 }
 0x986   :  { %v911_v10 = vpop.xlane.xlu0 %910 }
 0x987   :  { %v921_v12 = vrot.slane %v911_v10, %v7317_v6 }
 0x989   :  { %v922_v15 = vsel %vm138_vm5, %v921_v12, %v917_v11  ;;  %v1011_v11 = vld [vmem:[%s8156_s10] sm:$0xff]  ;;  %v1012_v12 = vld [vmem:[%s8156_s10 + $0x8] sm:$0xff] }
 0x98a   :  { %v925_v18 = vsel %vm924_vm11, %v922_v15, -inf  ;;  %v7364_v15 = vpack.c.bf16 %v1012_v12, %v1011_v11 }
 0x98b   :  { %926 = vmax.xlane.f32.xlu0 %v925_v18  ;;  %v1013_v18 = vld [vmem:[%s8156_s10 + $0x10] sm:$0xff] }
 0x98c   :  { %6345 = vmatpush3.bf16.msra.mxu1 %v7364_v15 }
 0x98d   :  { %6346 = vmatprep.subr.bf16.mxu1 %v6941_v0 }
 0xa18   :  { %v927_v21 = vpop.xlane.xlu0 %926 }
 0xa19   :  { %v932_v25 = vrot.slane %v927_v21, %v7298_v46  ;;  %v936_v26 = vrot.slane %v927_v21, %v7324_v20  ;;  %v7374_v21 = vpack.c.bf16 %v1014_v19, %v1013_v18 }
 0xa1b   :  { %v939_v27 = vsub.f32 %v908_v8, %v932_v25  ;;  %v940_v29 = vsub.f32 %v911_v10, %v936_v26  ;;  %6348 = vmatpush3.bf16.msra.mxu1 %v7374_v21 }
 0xa1c   :  { %6355 = vmatprep.subr.bf16.mxu1 %v6941_v0 }
 0xa1d   :  { %v941_v30 = vmul.f32 1.442695, %v939_v27  ;;  %v943_v32 = vmul.f32 1.442695, %v940_v29 }
 0xa1f   :  { %6632 = vpow2.f32 %v941_v30 }
 0xa20   :  { %6634 = vpow2.f32 %v943_v32 }
 0xa29   :  { %v6633_v34 = vpop.eup %6632 }
 0xa2a   :  { %v6635_v36 = vpop.eup %6634  ;;  %948 = vperm.xlu1 %6606, %v6633_v34  }
 0xa2b   :  { %951 = vperm.xlu0 %6607, %v6635_v36  }
 0xaa9   :  { %v949_v40 = vpop.permute.xlu1 %948 }
 0xaaa   :  { %v952_v44 = vpop.permute.xlu0 %951  ;;  %v956_v47 = vrot.slane %v949_v40, %v7317_v6 }
 0xaab   :  { %v960_v23 = vrot.slane %v952_v44, %v7317_v6 }
 0xaad   :  { %v961_v48 = vsel %vm138_vm5, %v960_v23, %v956_v47 }
 0xaae   :  { %v963_v51 = vsel %vm924_vm11, %v961_v48, 0.0 }
 0xaaf   :  { %964 = vadd.xlane.f32.xlu1 %v963_v51 }
 0xac0   :  { %1090 = vrot.lane.b32.xlu1 %v856_v45, %s6947_s4 }
 0xb3c   :  { %v965_v59 = vpop.xlane.xlu1 %964 }
 0xb3d   :  { %v970_v62 = vrot.slane %v965_v59, %v7298_v46  ;;  %v974_v49 = vrot.slane %v965_v59, %v7324_v20 }
 0xb3f   :  { %6636 = vrcp.f32 %v970_v62 }
 0xb40   :  { %v1091_v63 = vpop.permute.xlu1 %1090  ;;  %6638 = vrcp.f32 %v974_v49 }
 0xb41   :  { %5871 = vmatmul.mubr.msk.f32.vlgmr.msra.gmra.mrb[8].mxu0 %vm140_vm6, %v1091_v63 }
 0xb42   :  { %5888 = vmatprep.mubr.msk.f32.mxu0 %vm6942_vm0, %v6943_v1 }
 0xb49   :  { %v6637_v2 = vpop.eup %6636 }
 0xb4a   :  { %v978_v8 = vmul.f32 %v6637_v2, %v6633_v34  ;;  %v6639_v10 = vpop.eup %6638 }
 0xb4b   :  { %v980_v45 = vmul.f32 %v6639_v10, %v6635_v36 }
 0xb4c   :  { %983 = vperm.xlu0 %6607, %v978_v8  }
 0xb50   :  { %988 = vperm.xlu0 %6607, %v980_v45  }
 0xbcb   :  { %v7378_v25 = vpop.permute.xlu0 %983 }
 0xbcc   :  { %v991_v26 = vmul.f32 %v7378_v25, %v7140_v17 }
 0xbce   :  { %v993_v27 = vsel %vm140_vm6, %v991_v26, 0.0  ;;  %v1202_v26 = vld [vmem:[#allocation5 + $0x8] sm:$0x3] }
 0xbcf   :  { %v994_v29 = vrot.slane %v993_v27, 4  ;;  %v7383_v30 = vpop.permute.xlu0 %988 }
 0xbd0   :  { %v992_v32 = vmul.f32 %v7383_v30, %v7130_v14 }
 0xbd1   :  { %v995_v34 = vadd.f32 %v994_v29, %v993_v27  ;;  %v6362_v27 = vpack.c.bf16 %v1202_v26, %v7106_v4 }
 0xbd2   :  { %v1000_v36 = vsel %vm140_vm6, %v992_v32, 0.0  ;;  %v1186_v32 = vadd.s32 4294967286, %v7170_v24 }
 0xbd3   :  { %v996_v37 = vrot.slane %v995_v34, 2  ;;  %v1001_v38 = vrot.slane %v1000_v36, 4  ;;  %6364 = vmatpush3.bf16.msk.msra.mxu0 %vm7110_vm3, %v6362_v27 }
 0xbd4   :  { %6365 = vmatprep.subr.bf16.mxu0 %v6941_v0 }
 0xbd5   :  { %v997_v40 = vadd.f32 %v996_v37, %v995_v34  ;;  %v1002_v44 = vadd.f32 %v1001_v38, %v1000_v36  ;;  %v7417_v36 = vsub.s32 %v1186_v32, %v7288_v31 }
 0xbd7   :  { %v1003_v47 = vrot.slane %v1002_v44, 2  ;;  %v998_v23 = vrot.slane %v997_v40, 1  ;;  %v1194_v38 = vrot.slane %v7383_v30, %v7417_v36  ;;  %v1190_v4 = vrot.slane %v7378_v25, %v7417_v36 }
 0xbd9   :  { %v1004_v48 = vadd.f32 %v1003_v47, %v1002_v44  ;;  %v999_v17 = vadd.f32 %v998_v23, %v997_v40  ;;  %v1195_v47 = vsel %vm138_vm5, %v1194_v38, %v1190_v4 }
 0xbdb   :  { %v1005_v51 = vrot.slane %v1004_v48, 1 }
 0xbdd   :  { %v1006_v52 = vadd.f32 %v1005_v51, %v1004_v48 }
 0xbdf   :  { %v1017_v56 = vsel %vm138_vm5, %v1006_v52, %v999_v17 }
 0xbe0   :  { %5860 = vmatmul.mubr.msk.f32.vlgmr.msra.gmra.mrb[8].mxu1 %vm140_vm6, %v1017_v56 }
 0xbe1   :  { %6357 = vmatpush3.bf16.msra.mxu1 %v7108_v5  ;;  %5881 = vmatprep.mubr.msk.f32.mxu1 %vm6942_vm0, %v6943_v1 }
 0xbe2   :  { %6358 = vmatprep.subr.bf16.mxu1 %v6941_v0 }
 0xbe5   :  { %6360 = vmatpush3.bf16.msra.mxu1 %v7128_v13  ;;  %v7406_v13 = vld [vmem:[%s8157_s11] ss:$0 sm:$0xff] }
 0xbe6   :  { %6371 = vmatprep.subr.bf16.mxu1 %v6941_v0 }
 0xbe8   :  { %5882 = vmatmul.mubr.msk.f32.vlgmr.msra.gmra.mrb[10].mxu1 %vm140_vm6, %v1017_v56 }
 0xbe9   :  { %6373 = vmatpush3.bf16.msra.mxu1 %v7193_v53  ;;  %5910 = vmatprep.mubr.msk.f32.mxu1 %vm6942_vm0, %v6943_v1 }
 0xbea   :  { %6374 = vmatprep.subr.bf16.mxu1 %v6941_v0 }
 0xbed   :  { %6376 = vmatpush3.bf16.msra.mxu1 %v7210_v60 }
 0xbee   :  { %6383 = vmatprep.subr.bf16.mxu1 %v6941_v0 }
 0xc14   :  { %v1160_v5 = vpop.f32.mrb[8].mxu0 }
 0xc15   :  { %v5872_v14 = vpop.f32.mrb[9].mxu0 }
 0xcb3   :  { %v1086_v59 = vpop.f32.mrb[8].mxu1 }
 0xcb4   :  { %v1161_v62 = vadd.f32 %v1160_v5, %v1086_v59  ;;  %v5861_v49 = vpop.f32.mrb[9].mxu1 }
 0xcb6   :  { %v1171_v63 = vadd.f32 %v7406_v13, %v1161_v62 }
 0xcb8   :  { %v1173_v2 = vsel %vm1172_vm12, %v1171_v63, -inf }
 0xcb9   :  { %1174 = vmax.xlane.f32.xlu0 %v1173_v2 }
 0xcbb   :  { %v1273_v8 = vpop.f32.mrb[10].mxu1 }
 0xcbc   :  { %v5883_v10 = vpop.f32.mrb[11].mxu1 }
 0xd46   :  { %v1175_v45 = vpop.xlane.xlu0 %1174 }
 0xd47   :  { %v1176_v11 = vsub.f32 %v1171_v63, %v1175_v45 }
 0xd49   :  { %v1177_v12 = vmul.f32 1.442695, %v1176_v11 }
 0xd4b   :  { %6640 = vpow2.f32 %v1177_v12 }
 0xd55   :  { %v6641_v18 = vpop.eup %6640 }
 0xd56   :  { %v1179_v19 = vsel %vm1172_vm12, %v6641_v18, 0.0 }
 0xd57   :  { %1180 = vadd.xlane.f32.xlu1 %v1179_v19 }
 0xde4   :  { %v1181_v29 = vpop.xlane.xlu1 %1180 }
 0xde5   :  { %6642 = vlog2.f32 %v1181_v29 }
 0xdef   :  { %v6643_v34 = vpop.eup %6642 }
 0xdf0   :  { %v1183_v37 = vmul.f32 0.6931472, %v6643_v34 }
 0xdf2   :  { %v1184_v40 = vadd.f32 %v1183_v37, %v1175_v45 }
 0xdf4   :  { %v1185_v44 = vsub.f32 %v1171_v63, %v1184_v40 }
 0xdf6   :  { %v1197_v23 = vsel %vm213_vm4, %v1185_v44, %v1195_v47  ;;  %5889 = vmatmul.mubr.msk.f32.vlgmr.msra.gmra.mrb[10].mxu0 %vm213_vm4, %v1185_v44 }
 0xdf7   :  { %v1199_v24 = vsel %vm1198_vm13, %v1197_v23, 0.0  ;;  %6367 = vmatpush3.bf16.msra.mxu0 %v7138_v16  ;;  %5899 = vmatprep.mubr.msk.f32.mxu0 %vm6942_vm0, %v6943_v1 }
 0xdf8   :  { %1200 = vst [vmem:[#allocation11] sm:$0x3] %v1199_v24  ;;  %6368 = vmatprep.subr.bf16.mxu0 %v6941_v0 }
 0xdfb   :  { %6370 = vmatpush3.bf16.msra.mxu0 %v7155_v22 }
 0xdfc   :  { %6377 = vmatprep.subr.bf16.mxu0 %v6941_v0 }
 0xdfe   :  { %5900 = vmatmul.mubr.msk.f32.vlgmr.msra.gmra.mrb[12].mxu0 %vm140_vm6, %v7269_v3 }
 0xdff   :  { %6379 = vmatpush3.bf16.msra.mxu0 %v7201_v57  ;;  %5921 = vmatprep.mubr.msk.f32.mxu0 %vm6942_vm0, %v6943_v1 }
 0xe00   :  { %6380 = vmatprep.subr.bf16.mxu0 %v6941_v0 }
 0xe03   :  { %6382 = vmatpush3.bf16.msra.mxu0 %v7214_v61 }
 0xe04   :  { %6389 = vmatprep.subr.bf16.mxu0 %v6941_v0 }
 0xec9   :  { %v1349_v31 = vpop.f32.mrb[10].mxu0 }
 0xeca   :  { %v1350_v25 = vadd.f32 %v1349_v31, %v1273_v8  ;;  %v5890_v30 = vpop.f32.mrb[11].mxu0 }
 0xecc   :  { %v1360_v48 = vadd.f32 %v7174_v28, %v1350_v25  ;;  %v1442_v28 = vrot.slane %v7259_v54, 1 }
 0xed1   :  { %v1427_v51 = vpop.f32.mrb[12].mxu0 }
 0xed2   :  { %v1431_v17 = vadd.f32 %v1427_v51, %v1360_v48  ;;  %v5901_v52 = vpop.f32.mrb[13].mxu0 }
 0xed4   :  { %v1432_v3 = vmul.f32 %v1431_v17, %v7179_v33 }
 0xed6   :  { %v5464_v56 = vmul.f32 -1.442695, %v1432_v3 }
 0xed8   :  { %6644 = vpow2.f32 %v5464_v56 }
 0xee2   :  { %v6645_v5 = vpop.eup %6644 }
 0xee3   :  { %v1436_v14 = vadd.f32 1.0, %v6645_v5 }
 0xee5   :  { %6646 = vrcp.f32 %v1436_v14 }
 0xeef   :  { %v6647_v59 = vpop.eup %6646 }
 0xef0   :  { %v1439_v62 = vmul.f32 %v6647_v59, %v7179_v33 }
 0xef2   :  { %v1440_v49 = vadd.f32 %v1439_v62, %v7184_v42 }
 0xef4   :  { %1446 = vrot.lane.b32.xlu0 %v1440_v49, %s6946_s1  ;;  %v1444_v8 = vmul.f32 %v1442_v28, %v1440_v49 }
 0xf66   :  { %v1447_v63 = vpop.permute.xlu0 %1446 }
 0xf67   :  { %v1449_v2 = vmul.f32 %v1447_v63, %v1440_v49 }
 0xf69   :  { %1451 = vrot.lane.b32.xlu1 %v1449_v2, %s6947_s4 }
 0xfdb   :  { %v1452_v10 = vpop.permute.xlu1 %1451 }
 0xfdc   :  { %v7448_v45 = vadd.f32 %v1452_v10, %v1444_v8 }
 0xfde   :  { %6648 = vtanh.f32 %v7448_v45  ;;  %v1721_v63 = vrot.slane %v7448_v45, 7 }
 0xfe8   :  { %v6649_v11 = vpop.eup %6648 }
 0xfe9   :  { %1457 = vrot.lane.b32.xlu0 %v6649_v11, %s6946_s1 }
 0xfed   :  { %1461 = vrot.lane.b32.xlu0 %v7290_v41, %s6947_s4 }
0x105b   :  { %v1458_v12 = vpop.permute.xlu0 %1457 }
0x105c   :  { %v1460_v18 = vmul.f32 %v1458_v12, %v1440_v49 }
0x105e   :  { %1536 = vrot.lane.b32.xlu0 %v1460_v18, %s6947_s4 }
0x105f   :  { %v1462_v19 = vpop.permute.xlu0 %1461 }
0x1060   :  { %5911 = vmatmul.mubr.msk.f32.vlgmr.msra.gmra.mrb[12].mxu1 %vm140_vm6, %v1462_v19 }
0x1061   :  { %6385 = vmatpush3.bf16.msra.mxu1 %v7138_v16  ;;  %5932 = vmatprep.mubr.msk.f32.mxu1 %vm6942_vm0, %v6943_v1 }
0x1062   :  { %6386 = vmatprep.subr.bf16.mxu1 %v6941_v0 }
0x1065   :  { %6388 = vmatpush3.bf16.msra.mxu1 %v7155_v22 }
0x1066   :  { %6395 = vmatprep.subr.bf16.mxu1 %v6941_v0 }
0x10d0   :  { %v1537_v54 = vpop.permute.xlu0 %1536 }
0x10d1   :  { %5922 = vmatmul.mubr.msk.f32.vlgmr.msra.gmra.mrb[14].mxu0 %vm140_vm6, %v1537_v54  ;;  %5933 = vmatmul.mubr.msk.f32.vlgmr.msra.gmra.mrb[14].mxu1 %vm140_vm6, %v1537_v54 }
0x10d2   :  { %6391 = vmatpush3.bf16.msra.mxu0 %v7193_v53  ;;  %6397 = vmatpush3.bf16.msra.mxu1 %v7201_v57 }
0x10d3   :  { %6392 = vmatprep.subr.bf16.mxu0 %v6941_v0  ;;  %6398 = vmatprep.subr.bf16.mxu1 %v6941_v0 }
0x10d4   :  { %5943 = vmatprep.mubr.msk.f32.mxu0 %vm6942_vm0, %v6943_v1  ;;  %5954 = vmatprep.mubr.msk.f32.mxu1 %vm6942_vm0, %v6943_v1 }
0x10d6   :  { %6394 = vmatpush3.bf16.msra.mxu0 %v7210_v60  ;;  %6400 = vmatpush3.bf16.msra.mxu1 %v7214_v61 }
0x10d7   :  { %6407 = vmatprep.subr.bf16.mxu1 %v6941_v0  ;;  %6401 = vmatprep.subr.bf16.mxu0 %v6941_v0 }
0x1133   :  { %v1531_v41 = vpop.f32.mrb[12].mxu1 }
0x1134   :  { %v5912_v26 = vpop.f32.mrb[13].mxu1 }
0x11a4   :  { %v1606_v27 = vpop.f32.mrb[14].mxu0  ;;  %v1703_v29 = vpop.f32.mrb[14].mxu1 }
0x11a5   :  { %v1607_v32 = vadd.f32 %v1606_v27, %v1531_v41  ;;  %v1708_v34 = vrot.slane %v1703_v29, 7  ;;  %v5923_v37 = vpop.f32.mrb[15].mxu0  ;;  %v5934_v38 = vpop.f32.mrb[15].mxu1 }
0x11a7   :  { %v1610_v40 = vadd.f32 %v1607_v32, %v7244_v9  ;;  %v1710_v4 = vadd.f32 %v1708_v34, %v1360_v48 }
0x11a9   :  { %v1611_v44 = vmul.f32 %v1610_v40, %v7179_v33  ;;  %v1711_v47 = vmul.f32 %v1710_v4, %v7179_v33 }
0x11ab   :  { %v5467_v23 = vmul.f32 -1.442695, %v1611_v44  ;;  %v5469_v24 = vmul.f32 -1.442695, %v1711_v47 }
0x11ad   :  { %6650 = vpow2.f32 %v5467_v23 }
0x11ae   :  { %6652 = vpow2.f32 %v5469_v24 }
0x11b7   :  { %v6651_v31 = vpop.eup %6650 }
0x11b8   :  { %v6653_v25 = vpop.eup %6652  ;;  %v1615_v30 = vadd.f32 1.0, %v6651_v31 }
0x11b9   :  { %v1715_v51 = vadd.f32 1.0, %v6653_v25 }
0x11ba   :  { %6654 = vrcp.f32 %v1615_v30 }
0x11bb   :  { %6656 = vrcp.f32 %v1715_v51 }
0x11c4   :  { %v6655_v17 = vpop.eup %6654 }
0x11c5   :  { %v6657_v52 = vpop.eup %6656  ;;  %v1618_v3 = vmul.f32 %v6655_v17, %v7179_v33 }
0x11c6   :  { %v1718_v48 = vmul.f32 %v6657_v52, %v7179_v33 }
0x11c7   :  { %v1619_v56 = vadd.f32 %v1618_v3, %v7184_v42 }
0x11c8   :  { %v1719_v5 = vadd.f32 %v1718_v48, %v7184_v42 }
0x11c9   :  { %1622 = vrot.lane.b32.xlu1 %v1619_v56, %s6946_s1  ;;  %v1620_v2 = vmul.f32 %v1619_v56, %v7282_v35 }
0x11ca   :  { %1725 = vrot.lane.b32.xlu0 %v1719_v5, %s6946_s1  ;;  %v1723_v8 = vmul.f32 %v1721_v63, %v1719_v5 }
0x123b   :  { %v1623_v14 = vpop.permute.xlu1 %1622 }
0x123c   :  { %v1625_v59 = vmul.f32 %v1623_v14, %v1619_v56  ;;  %v1726_v62 = vpop.permute.xlu0 %1725 }
0x123d   :  { %v1728_v49 = vmul.f32 %v1726_v62, %v1719_v5 }
0x123e   :  { %1627 = vrot.lane.b32.xlu1 %v1625_v59, %s6947_s4 }
0x123f   :  { %1730 = vrot.lane.b32.xlu0 %v1728_v49, %s6947_s4 }
0x12b0   :  { %v1628_v28 = vpop.permute.xlu1 %1627 }
0x12b1   :  { %v1630_v10 = vadd.f32 %v1628_v28, %v1620_v2  ;;  %v1731_v11 = vpop.permute.xlu0 %1730 }
0x12b2   :  { %v7489_v12 = vadd.f32 %v1731_v11, %v1723_v8 }
0x12b3   :  { %6658 = vtanh.f32 %v1630_v10 }
0x12b4   :  { %6660 = vtanh.f32 %v7489_v12 }
0x12bd   :  { %v6659_v18 = vpop.eup %6658 }
0x12be   :  { %v6661_v19 = vpop.eup %6660  ;;  %1633 = vrot.lane.b32.xlu1 %v6659_v18, %s6946_s1 }
0x12bf   :  { %1736 = vrot.lane.b32.xlu0 %v6661_v19, %s6946_s1 }
0x1330   :  { %v1634_v54 = vpop.permute.xlu1 %1633 }
0x1331   :  { %v1636_v41 = vmul.f32 %v1634_v54, %v1619_v56  ;;  %v1737_v45 = vpop.permute.xlu0 %1736 }
0x1332   :  { %v1739_v26 = vmul.f32 %v1737_v45, %v1719_v5 }
0x1333   :  { %1741 = vrot.lane.b32.xlu0 %v1636_v41, %s6947_s4 }
0x1334   :  { %v1816_v35 = vrot.slane %v1739_v26, 1 }
0x1336   :  { %1817 = vrot.lane.b32.xlu1 %v1816_v35, %s6947_s4 }
0x13a5   :  { %v1742_v27 = vpop.permute.xlu0 %1741 }
0x13a6   :  { %5944 = vmatmul.mubr.msk.f32.vlgmr.msra.gmra.mrb[16].mxu0 %vm140_vm6, %v1742_v27 }
0x13a7   :  { %6403 = vmatpush3.bf16.msra.mxu0 %v7364_v15  ;;  %5965 = vmatprep.mubr.msk.f32.mxu0 %vm6942_vm0, %v6943_v1 }
0x13a8   :  { %v7500_v29 = vpop.permute.xlu1 %1817  ;;  %6404 = vmatprep.subr.bf16.mxu0 %v6941_v0 }
0x13a9   :  { %5955 = vmatmul.mubr.msk.f32.vlgmr.msra.gmra.mrb[16].mxu1 %vm140_vm6, %v7500_v29 }
0x13aa   :  { %6409 = vmatpush3.bf16.msra.mxu1 %v7334_v39  ;;  %5976 = vmatprep.mubr.msk.f32.mxu1 %vm6942_vm0, %v6943_v1 }
0x13ab   :  { %6410 = vmatprep.subr.bf16.mxu1 %v6941_v0  ;;  %6406 = vmatpush3.bf16.msra.mxu0 %v7374_v21 }
0x13ac   :  { %6413 = vmatprep.subr.bf16.mxu0 %v6941_v0 }
0x13ae   :  { %6412 = vmatpush3.bf16.msra.mxu1 %v7348_v58 }
0x13af   :  { %6419 = vmatprep.subr.bf16.mxu1 %v6941_v0 }
0x1479   :  { %v1811_v15 = vpop.f32.mrb[16].mxu0 }
0x147a   :  { %v5945_v32 = vpop.f32.mrb[17].mxu0 }
0x147c   :  { %v1887_v34 = vpop.f32.mrb[16].mxu1 }
0x147d   :  { %v1888_v37 = vadd.f32 %v1887_v34, %v1811_v15  ;;  %v5956_v38 = vpop.f32.mrb[17].mxu1 }
0x147f   :  { %v1891_v39 = vadd.f32 %v1888_v37, %v7244_v9 }
0x1481   :  { %v1892_v40 = vmul.f32 %v1891_v39, %v7179_v33 }
0x1483   :  { %v5472_v4 = vmul.f32 -1.442695, %v1892_v40 }
0x1485   :  { %6662 = vpow2.f32 %v5472_v4 }
0x148f   :  { %v6663_v44 = vpop.eup %6662 }
0x1490   :  { %v1896_v47 = vadd.f32 1.0, %v6663_v44 }
0x1492   :  { %6664 = vrcp.f32 %v1896_v47 }
0x149c   :  { %v6665_v21 = vpop.eup %6664 }
0x149d   :  { %v1899_v23 = vmul.f32 %v6665_v21, %v7179_v33 }
0x149f   :  { %v1900_v58 = vadd.f32 %v1899_v23, %v7184_v42 }
0x14a1   :  { %1903 = vrot.lane.b32.xlu0 %v1900_v58, %s6946_s1  ;;  %v1901_v25 = vmul.f32 %v1900_v58, %v1630_v10 }
0x1513   :  { %v1904_v24 = vpop.permute.xlu0 %1903 }
0x1514   :  { %v1906_v31 = vmul.f32 %v1904_v24, %v1900_v58 }
0x1516   :  { %1908 = vrot.lane.b32.xlu1 %v1906_v31, %s6947_s4 }
0x1588   :  { %v1909_v9 = vpop.permute.xlu1 %1908 }
0x1589   :  { %v7519_v30 = vadd.f32 %v1909_v9, %v1901_v25 }
0x158b   :  { %6666 = vtanh.f32 %v7519_v30 }
0x1595   :  { %v6667_v51 = vpop.eup %6666 }
0x1596   :  { %1914 = vrot.lane.b32.xlu0 %v6667_v51, %s6946_s1 }
0x1608   :  { %v1915_v17 = vpop.permute.xlu0 %1914 }
0x1609   :  { %v7523_v52 = vmul.f32 %v1915_v17, %v1900_v58 }
0x160b   :  { %v1919_v3 = vrot.slane %v7523_v52, 7 }
0x160d   :  { %v1921_v48 = vsel %vm855_vm10, %v1636_v41, %v1919_v3 }
0x160e   :  { %v1929_v56 = vrot.slane %v1921_v48, %v7293_v43 }
0x1610   :  { %v1937_v5 = vrot.slane %v1929_v56, %v7293_v43  ;;  %v1930_v14 = vcombine.high %v1929_v56, %v1929_v56 }
0x1612   :  { %v1948_v59 = vrot.slane %v1937_v5, %v7298_v46  ;;  %v1944_v62 = vrot.slane %v1930_v14, %v7293_v43  ;;  %v7551_v5 = vld [vmem:[#allocation2] sm:$0xff] }
0x1614   :  { %v1955_v49 = vmul.f32 %v1948_v59, %v7302_v50  ;;  %v1952_v63 = vrot.slane %v1944_v62, %v7298_v46 }
0x1616   :  { %1959 = vrot.lane.b32.xlu1 %v1955_v49, %s6947_s4  ;;  %v1956_v2 = vmul.f32 %v1952_v63, %v7306_v55 }
0x1618   :  { %1961 = vrot.lane.b32.xlu0 %v1956_v2, %s6947_s4  ;;  %v7556_v2 = vld [vmem:[#allocation2 + $0x8] sm:$0xff] }
0x1688   :  { %v1960_v28 = vpop.permute.xlu1 %1959 }
0x1689   :  { %v1965_v8 = vsel %vm140_vm6, %v1960_v28, 0.0 }
0x168a   :  { %1966 = vadd.xlane.f32.xlu1 %v1965_v8  ;;  %v1962_v10 = vpop.permute.xlu0 %1961 }
0x168b   :  { %v1968_v11 = vsel %vm140_vm6, %v1962_v10, 0.0 }
0x168c   :  { %1969 = vadd.xlane.f32.xlu0 %v1968_v11 }
0x1717   :  { %v1967_v18 = vpop.xlane.xlu1 %1966 }
0x1718   :  { %v1976_v54 = vrot.slane %v1967_v18, %v7317_v6 }
0x1719   :  { %v1970_v19 = vpop.xlane.xlu0 %1969 }
0x171a   :  { %v1980_v41 = vrot.slane %v1970_v19, %v7317_v6 }
0x171c   :  { %v1981_v45 = vsel %vm138_vm5, %v1980_v41, %v1976_v54 }
0x171d   :  { %v1983_v26 = vsel %vm924_vm11, %v1981_v45, -inf }
0x171e   :  { %1984 = vmax.xlane.f32.xlu0 %v1983_v26 }
0x17ab   :  { %v1985_v35 = vpop.xlane.xlu0 %1984 }
0x17ac   :  { %v1990_v27 = vrot.slane %v1985_v35, %v7298_v46  ;;  %v1994_v15 = vrot.slane %v1985_v35, %v7324_v20 }
0x17ae   :  { %v1997_v32 = vsub.f32 %v1967_v18, %v1990_v27  ;;  %v1998_v34 = vsub.f32 %v1970_v19, %v1994_v15  ;;  %v2259_v15 = vld [vmem:[%s8149_s3] sm:$0xff] }
0x17b0   :  { %v1999_v37 = vmul.f32 1.442695, %v1997_v32  ;;  %v2001_v38 = vmul.f32 1.442695, %v1998_v34  ;;  %v2260_v32 = vld [vmem:[%s8149_s3 + $0x8] sm:$0xff] }
0x17b2   :  { %6668 = vpow2.f32 %v1999_v37 }
0x17b3   :  { %6670 = vpow2.f32 %v2001_v38 }
0x17bc   :  { %v6669_v39 = vpop.eup %6668 }
0x17bd   :  { %v6671_v40 = vpop.eup %6670  ;;  %2006 = vperm.xlu0 %6607, %v6669_v39  }
0x17be   :  { %2009 = vperm.xlu1 %6606, %v6671_v40  }
0x183c   :  { %v2007_v4 = vpop.permute.xlu0 %2006 }
0x183d   :  { %v2010_v44 = vpop.permute.xlu1 %2009  ;;  %v2014_v47 = vrot.slane %v2007_v4, %v7317_v6  ;;  %v2262_v4 = vld [vmem:[%s8149_s3 + $0x18] sm:$0xff] }
0x183e   :  { %v2018_v21 = vrot.slane %v2010_v44, %v7317_v6 }
0x1840   :  { %v2019_v23 = vsel %vm138_vm5, %v2018_v21, %v2014_v47 }
0x1841   :  { %v2021_v58 = vsel %vm924_vm11, %v2019_v23, 0.0 }
0x1842   :  { %2022 = vadd.xlane.f32.xlu1 %v2021_v58 }
0x18cf   :  { %v2023_v24 = vpop.xlane.xlu1 %2022 }
0x18d0   :  { %v2028_v31 = vrot.slane %v2023_v24, %v7298_v46  ;;  %v2032_v25 = vrot.slane %v2023_v24, %v7324_v20 }
0x18d2   :  { %6672 = vrcp.f32 %v2028_v31 }
0x18d3   :  { %6674 = vrcp.f32 %v2032_v25 }
0x18dc   :  { %v6673_v9 = vpop.eup %6672 }
0x18dd   :  { %v2036_v51 = vmul.f32 %v6673_v9, %v6669_v39  ;;  %v6675_v17 = vpop.eup %6674  ;;  %v7571_v39 = vpack.c.bf16 %v2260_v32, %v2259_v15 }
0x18de   :  { %v2038_v3 = vmul.f32 %v6675_v17, %v6671_v40  ;;  %v2261_v40 = vld [vmem:[%s8149_s3 + $0x10] sm:$0xff] }
0x18df   :  { %2041 = vperm.xlu0 %6607, %v2036_v51   ;;  %v7582_v47 = vpack.c.bf16 %v2262_v4, %v2261_v40 }
0x18e3   :  { %2046 = vperm.xlu0 %6607, %v2038_v3  }
0x18e7   :  { %2148 = vrot.lane.b32.xlu0 %v1921_v48, %s6947_s4 }
0x195e   :  { %v2042_v56 = vpop.permute.xlu0 %2041 }
0x195f   :  { %v2049_v14 = vmul.f32 %v7551_v5, %v2042_v56  ;;  %v2246_v63 = vrot.slane %v2042_v56, %v7417_v36 }
0x1961   :  { %v2051_v59 = vsel %vm140_vm6, %v2049_v14, 0.0 }
0x1962   :  { %v2052_v62 = vrot.slane %v2051_v59, 4  ;;  %v2047_v49 = vpop.permute.xlu0 %2046 }
0x1963   :  { %v2050_v28 = vmul.f32 %v7556_v2, %v2047_v49  ;;  %v2250_v8 = vrot.slane %v2047_v49, %v7417_v36  ;;  %v7599_v49 = vld [vmem:[#allocation5] sm:$0xff] }
0x1964   :  { %v2053_v10 = vadd.f32 %v2052_v62, %v2051_v59 }
0x1965   :  { %v2058_v48 = vsel %vm140_vm6, %v2050_v28, 0.0  ;;  %v2251_v11 = vsel %vm138_vm5, %v2250_v8, %v2246_v63  ;;  %v2258_v63 = vld [vmem:[#allocation5 + $0x8] sm:$0x3] }
0x1966   :  { %v2054_v18 = vrot.slane %v2053_v10, 2  ;;  %v2059_v19 = vrot.slane %v2058_v48, 4  ;;  %v2149_v54 = vpop.permute.xlu0 %2148  ;;  %v6420_v28 = vpack.c.bf16 %v2258_v63, %v7599_v49 }
0x1967   :  { %5977 = vmatmul.mubr.msk.f32.vlgmr.msra.gmra.mrb[18].mxu1 %vm140_vm6, %v2149_v54 }
0x1968   :  { %v2055_v41 = vadd.f32 %v2054_v18, %v2053_v10  ;;  %v2060_v45 = vadd.f32 %v2059_v19, %v2058_v48  ;;  %5994 = vmatprep.mubr.msk.f32.mxu1 %vm6942_vm0, %v6943_v1  ;;  %6422 = vmatpush3.bf16.msk.msra.mxu1 %vm7110_vm3, %v6420_v28 }
0x1969   :  { %6423 = vmatprep.subr.bf16.mxu1 %v6941_v0 }
0x196a   :  { %v2061_v26 = vrot.slane %v2060_v45, 2  ;;  %v2056_v35 = vrot.slane %v2055_v41, 1 }
0x196c   :  { %v2062_v27 = vadd.f32 %v2061_v26, %v2060_v45  ;;  %v2057_v37 = vadd.f32 %v2056_v35, %v2055_v41  ;;  %v7622_v26 = vld [vmem:[#allocation7] ss:$0 sm:$0xff] }
0x196e   :  { %v2063_v34 = vrot.slane %v2062_v27, 1 }
0x1970   :  { %v2064_v38 = vadd.f32 %v2063_v34, %v2062_v27 }
0x1972   :  { %v2075_v44 = vsel %vm138_vm5, %v2064_v38, %v2057_v37 }
0x1973   :  { %5966 = vmatmul.mubr.msk.f32.vlgmr.msra.gmra.mrb[18].mxu0 %vm140_vm6, %v2075_v44 }
0x1974   :  { %6415 = vmatpush3.bf16.msra.mxu0 %v7571_v39  ;;  %5987 = vmatprep.mubr.msk.f32.mxu0 %vm6942_vm0, %v6943_v1 }
0x1975   :  { %6416 = vmatprep.subr.bf16.mxu0 %v6941_v0 }
0x1978   :  { %6418 = vmatpush3.bf16.msra.mxu0 %v7582_v47 }
0x1979   :  { %6429 = vmatprep.subr.bf16.mxu0 %v6941_v0 }
0x197b   :  { %5988 = vmatmul.mubr.msk.f32.vlgmr.msra.gmra.mrb[20].mxu0 %vm140_vm6, %v2075_v44 }
0x197c   :  { %6431 = vmatpush3.bf16.msra.mxu0 %v7193_v53  ;;  %6016 = vmatprep.mubr.msk.f32.mxu0 %vm6942_vm0, %v6943_v1 }
0x197d   :  { %6432 = vmatprep.subr.bf16.mxu0 %v6941_v0 }
0x1980   :  { %6434 = vmatpush3.bf16.msra.mxu0 %v7210_v60 }
0x1981   :  { %6441 = vmatprep.subr.bf16.mxu0 %v6941_v0 }
0x1a3a   :  { %v2218_v21 = vpop.f32.mrb[18].mxu1 }
0x1a3b   :  { %v5978_v23 = vpop.f32.mrb[19].mxu1 }
0x1a46   :  { %v2144_v58 = vpop.f32.mrb[18].mxu0 }
0x1a47   :  { %v2219_v24 = vadd.f32 %v2218_v21, %v2144_v58  ;;  %v5967_v31 = vpop.f32.mrb[19].mxu0  ;;  %v2498_v58 = vrot.slane %v7489_v12, 1 }
0x1a49   :  { %v2229_v25 = vadd.f32 %v7406_v13, %v2219_v24 }
0x1a4b   :  { %v2230_v9 = vsel %vm1172_vm12, %v2229_v25, -inf }
0x1a4c   :  { %2231 = vmax.xlane.f32.xlu0 %v2230_v9 }
0x1a4e   :  { %v2329_v51 = vpop.f32.mrb[20].mxu0 }
0x1a4f   :  { %v5989_v17 = vpop.f32.mrb[21].mxu0 }
0x1ad9   :  { %v2232_v3 = vpop.xlane.xlu0 %2231 }
0x1ada   :  { %v2233_v56 = vsub.f32 %v2229_v25, %v2232_v3 }
0x1adc   :  { %v2234_v14 = vmul.f32 1.442695, %v2233_v56 }
0x1ade   :  { %6676 = vpow2.f32 %v2234_v14 }
0x1ae8   :  { %v6677_v59 = vpop.eup %6676 }
0x1ae9   :  { %v2236_v62 = vsel %vm1172_vm12, %v6677_v59, 0.0 }
0x1aea   :  { %2237 = vadd.xlane.f32.xlu1 %v2236_v62 }
0x1b77   :  { %v2238_v13 = vpop.xlane.xlu1 %2237 }
0x1b78   :  { %6678 = vlog2.f32 %v2238_v13 }
0x1b82   :  { %v6679_v8 = vpop.eup %6678 }
0x1b83   :  { %v2240_v10 = vmul.f32 0.6931472, %v6679_v8  ;;  %v7659_v8 = vld [vmem:[#allocation10] sm:$0x1] }
0x1b85   :  { %v2241_v48 = vadd.f32 %v2240_v10, %v2232_v3 }
0x1b87   :  { %v2242_v18 = vsub.f32 %v2229_v25, %v2241_v48 }
0x1b89   :  { %v2253_v19 = vsel %vm213_vm4, %v2242_v18, %v2251_v11  ;;  %5995 = vmatmul.mubr.msk.f32.vlgmr.msra.gmra.mrb[20].mxu1 %vm213_vm4, %v2242_v18 }
0x1b8a   :  { %v2254_v54 = vsel %vm1198_vm13, %v2253_v19, 0.0  ;;  %6425 = vmatpush3.bf16.msra.mxu1 %v7138_v16  ;;  %6005 = vmatprep.mubr.msk.f32.mxu1 %vm6942_vm0, %v6943_v1 }
0x1b8b   :  { %2256 = vst [vmem:[#allocation11 + $0x2] sm:$0x3] %v2254_v54  ;;  %6426 = vmatprep.subr.bf16.mxu1 %v6941_v0 }
0x1b8e   :  { %6428 = vmatpush3.bf16.msra.mxu1 %v7155_v22 }
0x1b8f   :  { %6435 = vmatprep.subr.bf16.mxu1 %v6941_v0 }
0x1b91   :  { %6006 = vmatmul.mubr.msk.f32.vlgmr.msra.gmra.mrb[22].mxu1 %vm140_vm6, %v7500_v29 }
0x1b92   :  { %6437 = vmatpush3.bf16.msra.mxu1 %v7201_v57  ;;  %6027 = vmatprep.mubr.msk.f32.mxu1 %vm6942_vm0, %v6943_v1 }
0x1b93   :  { %6438 = vmatprep.subr.bf16.mxu1 %v6941_v0 }
0x1b96   :  { %6440 = vmatpush3.bf16.msra.mxu1 %v7214_v61 }
0x1b97   :  { %6447 = vmatprep.subr.bf16.mxu1 %v6941_v0 }
0x1c5c   :  { %v2405_v11 = vpop.f32.mrb[20].mxu1 }
0x1c5d   :  { %v2406_v41 = vadd.f32 %v2405_v11, %v2329_v51  ;;  %v5996_v45 = vpop.f32.mrb[21].mxu1 }
0x1c5f   :  { %v2416_v35 = vadd.f32 %v7622_v26, %v2406_v41 }
0x1c64   :  { %v2483_v27 = vpop.f32.mrb[22].mxu1 }
0x1c65   :  { %v2487_v29 = vadd.f32 %v2483_v27, %v2416_v35  ;;  %v6007_v15 = vpop.f32.mrb[23].mxu1 }
0x1c67   :  { %v2488_v32 = vmul.f32 %v2487_v29, %v7179_v33 }
0x1c69   :  { %v5481_v34 = vmul.f32 -1.442695, %v2488_v32 }
0x1c6b   :  { %6680 = vpow2.f32 %v5481_v34 }
0x1c75   :  { %v6681_v37 = vpop.eup %6680 }
0x1c76   :  { %v2492_v38 = vadd.f32 1.0, %v6681_v37 }
0x1c78   :  { %6682 = vrcp.f32 %v2492_v38 }
0x1c82   :  { %v6683_v40 = vpop.eup %6682 }
0x1c83   :  { %v2495_v4 = vmul.f32 %v6683_v40, %v7179_v33 }
0x1c85   :  { %v2496_v44 = vadd.f32 %v2495_v4, %v7184_v42 }
0x1c87   :  { %2502 = vrot.lane.b32.xlu1 %v2496_v44, %s6946_s1  ;;  %v2500_v24 = vmul.f32 %v2498_v58, %v2496_v44 }
0x1cf9   :  { %v2503_v21 = vpop.permute.xlu1 %2502 }
0x1cfa   :  { %v2505_v23 = vmul.f32 %v2503_v21, %v2496_v44 }
0x1cfc   :  { %2507 = vrot.lane.b32.xlu0 %v2505_v23, %s6947_s4 }
0x1d6e   :  { %v2508_v31 = vpop.permute.xlu0 %2507 }
0x1d6f   :  { %v7631_v25 = vadd.f32 %v2508_v31, %v2500_v24 }
0x1d71   :  { %6684 = vtanh.f32 %v7631_v25  ;;  %v2777_v23 = vrot.slane %v7631_v25, 7 }
0x1d7b   :  { %v6685_v9 = vpop.eup %6684 }
0x1d7c   :  { %2513 = vrot.lane.b32.xlu1 %v6685_v9, %s6946_s1 }
0x1d80   :  { %2517 = vrot.lane.b32.xlu1 %v7523_v52, %s6947_s4 }
0x1dee   :  { %v2514_v51 = vpop.permute.xlu1 %2513 }
0x1def   :  { %v2516_v17 = vmul.f32 %v2514_v51, %v2496_v44 }
0x1df1   :  { %2592 = vrot.lane.b32.xlu1 %v2516_v17, %s6947_s4 }
0x1df2   :  { %v2518_v3 = vpop.permute.xlu1 %2517 }
0x1df3   :  { %6017 = vmatmul.mubr.msk.f32.vlgmr.msra.gmra.mrb[22].mxu0 %vm140_vm6, %v2518_v3 }
0x1df4   :  { %6443 = vmatpush3.bf16.msra.mxu0 %v7138_v16  ;;  %6038 = vmatprep.mubr.msk.f32.mxu0 %vm6942_vm0, %v6943_v1 }
0x1df5   :  { %6444 = vmatprep.subr.bf16.mxu0 %v6941_v0 }
0x1df8   :  { %6446 = vmatpush3.bf16.msra.mxu0 %v7155_v22 }
0x1df9   :  { %6453 = vmatprep.subr.bf16.mxu0 %v6941_v0 }
0x1e63   :  { %v2593_v12 = vpop.permute.xlu1 %2592 }
0x1e64   :  { %6028 = vmatmul.mubr.msk.f32.vlgmr.msra.gmra.mrb[24].mxu1 %vm140_vm6, %v2593_v12  ;;  %6039 = vmatmul.mubr.msk.f32.vlgmr.msra.gmra.mrb[24].mxu0 %vm140_vm6, %v2593_v12 }
0x1e65   :  { %6449 = vmatpush3.bf16.msra.mxu1 %v7193_v53  ;;  %6455 = vmatpush3.bf16.msra.mxu0 %v7201_v57 }
0x1e66   :  { %6450 = vmatprep.subr.bf16.mxu1 %v6941_v0  ;;  %6456 = vmatprep.subr.bf16.mxu0 %v6941_v0 }
0x1e67   :  { %6049 = vmatprep.mubr.msk.f32.mxu1 %vm6942_vm0, %v6943_v1  ;;  %6060 = vmatprep.mubr.msk.f32.mxu0 %vm6942_vm0, %v6943_v1 }
0x1e69   :  { %6452 = vmatpush3.bf16.msra.mxu1 %v7210_v60  ;;  %6458 = vmatpush3.bf16.msra.mxu0 %v7214_v61 }
0x1e6a   :  { %6465 = vmatprep.subr.bf16.mxu0 %v6941_v0  ;;  %6459 = vmatprep.subr.bf16.mxu1 %v6941_v0 }
0x1ec6   :  { %v2587_v52 = vpop.f32.mrb[22].mxu0 }
0x1ec7   :  { %v6018_v56 = vpop.f32.mrb[23].mxu0 }
0x1f37   :  { %v2662_v14 = vpop.f32.mrb[24].mxu1  ;;  %v2759_v59 = vpop.f32.mrb[24].mxu0 }
0x1f38   :  { %v2663_v62 = vadd.f32 %v2662_v14, %v2587_v52  ;;  %v2764_v63 = vrot.slane %v2759_v59, 7  ;;  %v6029_v28 = vpop.f32.mrb[25].mxu1  ;;  %v6040_v13 = vpop.f32.mrb[25].mxu0 }
0x1f3a   :  { %v2666_v10 = vadd.f32 %v7659_v8, %v2663_v62  ;;  %v2766_v48 = vadd.f32 %v2764_v63, %v2416_v35 }
0x1f3c   :  { %v2667_v18 = vmul.f32 %v2666_v10, %v7179_v33  ;;  %v2767_v19 = vmul.f32 %v2766_v48, %v7179_v33 }
0x1f3e   :  { %v5484_v54 = vmul.f32 -1.442695, %v2667_v18  ;;  %v5486_v11 = vmul.f32 -1.442695, %v2767_v19 }
0x1f40   :  { %6686 = vpow2.f32 %v5484_v54 }
0x1f41   :  { %6688 = vpow2.f32 %v5486_v11 }
0x1f4a   :  { %v6687_v41 = vpop.eup %6686 }
0x1f4b   :  { %v6689_v45 = vpop.eup %6688  ;;  %v2671_v27 = vadd.f32 1.0, %v6687_v41 }
0x1f4c   :  { %v2771_v29 = vadd.f32 1.0, %v6689_v45 }
0x1f4d   :  { %6690 = vrcp.f32 %v2671_v27 }
0x1f4e   :  { %6692 = vrcp.f32 %v2771_v29 }
0x1f57   :  { %v6691_v15 = vpop.eup %6690 }
0x1f58   :  { %v6693_v32 = vpop.eup %6692  ;;  %v2674_v34 = vmul.f32 %v6691_v15, %v7179_v33 }
0x1f59   :  { %v2774_v35 = vmul.f32 %v6693_v32, %v7179_v33 }
0x1f5a   :  { %v2675_v37 = vadd.f32 %v2674_v34, %v7184_v42 }
0x1f5b   :  { %v2775_v38 = vadd.f32 %v2774_v35, %v7184_v42 }
0x1f5c   :  { %2678 = vrot.lane.b32.xlu0 %v2675_v37, %s6946_s1  ;;  %v2676_v58 = vmul.f32 %v2675_v37, %v7519_v30 }
0x1f5d   :  { %2781 = vrot.lane.b32.xlu1 %v2775_v38, %s6946_s1  ;;  %v2779_v24 = vmul.f32 %v2777_v23, %v2775_v38 }
0x1fce   :  { %v2679_v40 = vpop.permute.xlu0 %2678 }
0x1fcf   :  { %v2782_v4 = vpop.permute.xlu1 %2781  ;;  %v2681_v44 = vmul.f32 %v2679_v40, %v2675_v37 }
0x1fd0   :  { %v2784_v21 = vmul.f32 %v2782_v4, %v2775_v38 }
0x1fd1   :  { %2683 = vrot.lane.b32.xlu0 %v2681_v44, %s6947_s4 }
0x1fd2   :  { %2786 = vrot.lane.b32.xlu1 %v2784_v21, %s6947_s4 }
0x2043   :  { %v2684_v31 = vpop.permute.xlu0 %2683 }
0x2044   :  { %v2787_v9 = vpop.permute.xlu1 %2786  ;;  %v2686_v51 = vadd.f32 %v2684_v31, %v2676_v58 }
0x2045   :  { %v7674_v17 = vadd.f32 %v2787_v9, %v2779_v24 }
0x2046   :  { %6694 = vtanh.f32 %v2686_v51 }
0x2047   :  { %6696 = vtanh.f32 %v7674_v17 }
0x2050   :  { %v6695_v3 = vpop.eup %6694 }
0x2051   :  { %v6697_v12 = vpop.eup %6696  ;;  %2689 = vrot.lane.b32.xlu0 %v6695_v3, %s6946_s1 }
0x2052   :  { %2792 = vrot.lane.b32.xlu1 %v6697_v12, %s6946_s1 }
0x20c3   :  { %v2690_v52 = vpop.permute.xlu0 %2689 }
0x20c4   :  { %v2793_v56 = vpop.permute.xlu1 %2792  ;;  %v2692_v25 = vmul.f32 %v2690_v52, %v2675_v37 }
0x20c5   :  { %v2795_v14 = vmul.f32 %v2793_v56, %v2775_v38 }
0x20c6   :  { %2797 = vrot.lane.b32.xlu1 %v2692_v25, %s6947_s4 }
0x20c7   :  { %v2872_v30 = vrot.slane %v2795_v14, 1 }
0x20c9   :  { %2873 = vrot.lane.b32.xlu0 %v2872_v30, %s6947_s4 }
0x2138   :  { %v2798_v59 = vpop.permute.xlu1 %2797 }
0x2139   :  { %6050 = vmatmul.mubr.msk.f32.vlgmr.msra.gmra.mrb[26].mxu1 %vm140_vm6, %v2798_v59 }
0x213a   :  { %6071 = vmatprep.mubr.msk.f32.mxu1 %vm6942_vm0, %v6943_v1 }
0x213b   :  { %v7684_v62 = vpop.permute.xlu0 %2873 }
0x213c   :  { %6061 = vmatmul.mubr.msk.f32.vlgmr.msra.gmra.mrb[26].mxu0 %vm140_vm6, %v7684_v62 }
0x213d   :  { %6082 = vmatprep.mubr.msk.f32.mxu0 %vm6942_vm0, %v6943_v1 }
0x220c   :  { %v2867_v63 = vpop.f32.mrb[26].mxu1 }
0x220d   :  { %v6051_v28 = vpop.f32.mrb[27].mxu1 }
0x220f   :  { %v2943_v13 = vpop.f32.mrb[26].mxu0 }
0x2210   :  { %v2944_v10 = vadd.f32 %v2943_v13, %v2867_v63  ;;  %v6062_v48 = vpop.f32.mrb[27].mxu0 }
0x2212   :  { %v2947_v18 = vadd.f32 %v7659_v8, %v2944_v10 }
0x2214   :  { %v2948_v19 = vmul.f32 %v2947_v18, %v7179_v33 }
0x2216   :  { %v5489_v54 = vmul.f32 -1.442695, %v2948_v19 }
0x2218   :  { %6698 = vpow2.f32 %v5489_v54 }
0x2222   :  { %v6699_v11 = vpop.eup %6698 }
0x2223   :  { %v2952_v41 = vadd.f32 1.0, %v6699_v11 }
0x2225   :  { %6700 = vrcp.f32 %v2952_v41 }
0x222f   :  { %v6701_v45 = vpop.eup %6700 }
0x2230   :  { %v2955_v27 = vmul.f32 %v6701_v45, %v7179_v33 }
0x2232   :  { %v2956_v29 = vadd.f32 %v2955_v27, %v7184_v42 }
0x2234   :  { %2959 = vrot.lane.b32.xlu1 %v2956_v29, %s6946_s1  ;;  %v2957_v34 = vmul.f32 %v2956_v29, %v2686_v51 }
0x22a6   :  { %v2960_v15 = vpop.permute.xlu1 %2959 }
0x22a7   :  { %v2962_v32 = vmul.f32 %v2960_v15, %v2956_v29 }
0x22a9   :  { %2964 = vrot.lane.b32.xlu0 %v2962_v32, %s6947_s4 }
0x231b   :  { %v2965_v35 = vpop.permute.xlu0 %2964 }
0x231c   :  { %v7696_v37 = vadd.f32 %v2965_v35, %v2957_v34 }
0x231e   :  { %6702 = vtanh.f32 %v7696_v37 }
0x2328   :  { %v6703_v38 = vpop.eup %6702 }
0x2329   :  { %2970 = vrot.lane.b32.xlu1 %v6703_v38, %s6946_s1 }
0x239b   :  { %v2971_v40 = vpop.permute.xlu1 %2970 }
0x239c   :  { %v7700_v4 = vmul.f32 %v2971_v40, %v2956_v29 }
0x239e   :  { %v2975_v44 = vrot.slane %v7700_v4, 7 }
0x23a0   :  { %v7704_v21 = vsel %vm855_vm10, %v2692_v25, %v2975_v44 }
0x23a1   :  { %v2985_v23 = vrot.slane %v7704_v21, %v7293_v43 }
0x23a3   :  { %v2993_v58 = vrot.slane %v2985_v23, %v7293_v43  ;;  %v2986_v24 = vcombine.high %v2985_v23, %v2985_v23 }
0x23a5   :  { %v3004_v31 = vrot.slane %v2993_v58, %v7298_v46  ;;  %v3000_v9 = vrot.slane %v2986_v24, %v7293_v43 }
0x23a7   :  { %v3011_v51 = vmul.f32 %v3004_v31, %v7302_v50  ;;  %v3008_v3 = vrot.slane %v3000_v9, %v7298_v46 }
0x23a9   :  { %3015 = vrot.lane.b32.xlu0 %v3011_v51, %s6947_s4  ;;  %v3012_v12 = vmul.f32 %v3008_v3, %v7306_v55  ;;  %v3121_v51 = vld [vmem:[%s8155_s9] sm:$0xff]  ;;  %v3122_v3 = vld [vmem:[%s8155_s9 + $0x8] sm:$0xff] }
0x23ab   :  { %3017 = vrot.lane.b32.xlu1 %v3012_v12, %s6947_s4  ;;  %v7736_v12 = vpack.c.bf16 %v3122_v3, %v3121_v51 }
0x23ad   :  { %6467 = vmatpush3.bf16.msra.mxu0 %v7736_v12 }
0x23ae   :  { %6468 = vmatprep.subr.bf16.mxu0 %v6941_v0 }
0x241b   :  { %v3016_v52 = vpop.permute.xlu0 %3015 }
0x241c   :  { %v3021_v56 = vsel %vm140_vm6, %v3016_v52, 0.0 }
0x241d   :  { %3022 = vadd.xlane.f32.xlu0 %v3021_v56  ;;  %v3018_v25 = vpop.permute.xlu1 %3017  ;;  %v3123_v56 = vld [vmem:[%s8155_s9 + $0x10] sm:$0xff] }
0x241e   :  { %v3024_v14 = vsel %vm140_vm6, %v3018_v25, 0.0  ;;  %v3124_v25 = vld [vmem:[%s8155_s9 + $0x18] sm:$0xff] }
0x241f   :  { %3025 = vadd.xlane.f32.xlu1 %v3024_v14  ;;  %v7746_v14 = vpack.c.bf16 %v3124_v25, %v3123_v56 }
0x2421   :  { %6470 = vmatpush3.bf16.msra.mxu0 %v7746_v14 }
0x2422   :  { %6477 = vmatprep.subr.bf16.mxu0 %v6941_v0 }
0x24aa   :  { %v3023_v30 = vpop.xlane.xlu0 %3022 }
0x24ab   :  { %v3032_v63 = vrot.slane %v3023_v30, %v7317_v6 }
0x24ac   :  { %v3026_v59 = vpop.xlane.xlu1 %3025 }
0x24ad   :  { %v3036_v28 = vrot.slane %v3026_v59, %v7317_v6 }
0x24af   :  { %v3037_v13 = vsel %vm138_vm5, %v3036_v28, %v3032_v63  ;;  %v3127_v28 = vld [vmem:[%s8156_s10 + $0x10] sm:$0xff] }
0x24b0   :  { %v3039_v10 = vsel %vm924_vm11, %v3037_v13, -inf }
0x24b1   :  { %3040 = vmax.xlane.f32.xlu0 %v3039_v10 }
0x253e   :  { %v3041_v48 = vpop.xlane.xlu0 %3040 }
0x253f   :  { %v3046_v18 = vrot.slane %v3041_v48, %v7298_v46  ;;  %v3050_v19 = vrot.slane %v3041_v48, %v7324_v20 }
0x2541   :  { %v3053_v54 = vsub.f32 %v3023_v30, %v3046_v18  ;;  %v3054_v11 = vsub.f32 %v3026_v59, %v3050_v19  ;;  %v3125_v30 = vld [vmem:[%s8156_s10] sm:$0xff]  ;;  %v3126_v59 = vld [vmem:[%s8156_s10 + $0x8] sm:$0xff] }
0x2542   :  { %v7758_v63 = vpack.c.bf16 %v3126_v59, %v3125_v30 }
0x2543   :  { %v3055_v41 = vmul.f32 1.442695, %v3053_v54  ;;  %v3057_v45 = vmul.f32 1.442695, %v3054_v11 }
0x2544   :  { %6461 = vmatpush3.bf16.msra.mxu1 %v7758_v63 }
0x2545   :  { %6704 = vpow2.f32 %v3055_v41  ;;  %6462 = vmatprep.subr.bf16.mxu1 %v6941_v0 }
0x2546   :  { %6706 = vpow2.f32 %v3057_v45 }
0x254f   :  { %v6705_v27 = vpop.eup %6704 }
0x2550   :  { %v6707_v29 = vpop.eup %6706  ;;  %3062 = vperm.xlu0 %6607, %v6705_v27  }
0x2551   :  { %3065 = vperm.xlu1 %6606, %v6707_v29  }
0x25cf   :  { %v3063_v15 = vpop.permute.xlu0 %3062 }
0x25d0   :  { %v3066_v32 = vpop.permute.xlu1 %3065  ;;  %v3070_v34 = vrot.slane %v3063_v15, %v7317_v6 }
0x25d1   :  { %v3074_v35 = vrot.slane %v3066_v32, %v7317_v6 }
0x25d3   :  { %v3075_v38 = vsel %vm138_vm5, %v3074_v35, %v3070_v34 }
0x25d4   :  { %v3077_v40 = vsel %vm924_vm11, %v3075_v38, 0.0 }
0x25d5   :  { %3078 = vadd.xlane.f32.xlu1 %v3077_v40 }
0x2662   :  { %v3079_v44 = vpop.xlane.xlu1 %3078 }
0x2663   :  { %v3084_v23 = vrot.slane %v3079_v44, %v7298_v46  ;;  %v3088_v58 = vrot.slane %v3079_v44, %v7324_v20 }
0x2665   :  { %6708 = vrcp.f32 %v3084_v23 }
0x2666   :  { %6710 = vrcp.f32 %v3088_v58 }
0x266f   :  { %v6709_v24 = vpop.eup %6708 }
0x2670   :  { %v3092_v31 = vmul.f32 %v6709_v24, %v6705_v27  ;;  %v6711_v9 = vpop.eup %6710 }
0x2671   :  { %v3094_v52 = vmul.f32 %v6711_v9, %v6707_v29 }
0x2672   :  { %3097 = vperm.xlu0 %6607, %v3092_v31  }
0x2676   :  { %3102 = vperm.xlu0 %6607, %v3094_v52  }
0x267a   :  { %3204 = vrot.lane.b32.xlu0 %v7704_v21, %s6947_s4  ;;  %v3128_v21 = vld [vmem:[%s8156_s10 + $0x18] sm:$0xff] }
0x267b   :  { %v7768_v13 = vpack.c.bf16 %v3128_v21, %v3127_v28 }
0x267d   :  { %6464 = vmatpush3.bf16.msra.mxu1 %v7768_v13 }
0x267e   :  { %6471 = vmatprep.subr.bf16.mxu1 %v6941_v0 }
0x26f1   :  { %v3098_v10 = vpop.permute.xlu0 %3097 }
0x26f2   :  { %v3105_v48 = vmul.f32 %v7551_v5, %v3098_v10  ;;  %v3302_v11 = vrot.slane %v3098_v10, %v7417_v36 }
0x26f4   :  { %v3107_v18 = vsel %vm140_vm6, %v3105_v48, 0.0 }
0x26f5   :  { %v3108_v19 = vrot.slane %v3107_v18, 4  ;;  %v3103_v54 = vpop.permute.xlu0 %3102 }
0x26f6   :  { %v3106_v41 = vmul.f32 %v7556_v2, %v3103_v54  ;;  %v3306_v45 = vrot.slane %v3103_v54, %v7417_v36 }
0x26f7   :  { %v3109_v27 = vadd.f32 %v3108_v19, %v3107_v18  ;;  %v3314_v19 = vld [vmem:[#allocation5 + $0x8] sm:$0x3] }
0x26f8   :  { %v3114_v29 = vsel %vm140_vm6, %v3106_v41, 0.0  ;;  %v3307_v15 = vsel %vm138_vm5, %v3306_v45, %v3302_v11  ;;  %v6478_v54 = vpack.c.bf16 %v3314_v19, %v7599_v49 }
0x26f9   :  { %v3110_v32 = vrot.slane %v3109_v27, 2  ;;  %v3115_v34 = vrot.slane %v3114_v29, 4  ;;  %v3205_v35 = vpop.permute.xlu0 %3204 }
0x26fa   :  { %6083 = vmatmul.mubr.msk.f32.vlgmr.msra.gmra.mrb[28].mxu0 %vm140_vm6, %v3205_v35 }
0x26fb   :  { %v3111_v5 = vadd.f32 %v3110_v32, %v3109_v27  ;;  %v3116_v38 = vadd.f32 %v3115_v34, %v3114_v29  ;;  %6100 = vmatprep.mubr.msk.f32.mxu0 %vm6942_vm0, %v6943_v1  ;;  %6480 = vmatpush3.bf16.msk.msra.mxu0 %vm7110_vm3, %v6478_v54 }
0x26fc   :  { %6481 = vmatprep.subr.bf16.mxu0 %v6941_v0 }
0x26fd   :  { %v3117_v40 = vrot.slane %v3116_v38, 2  ;;  %v3112_v44 = vrot.slane %v3111_v5, 1 }
0x26ff   :  { %v3118_v2 = vadd.f32 %v3117_v40, %v3116_v38  ;;  %v3113_v58 = vadd.f32 %v3112_v44, %v3111_v5 }
0x2701   :  { %v3119_v23 = vrot.slane %v3118_v2, 1 }
0x2703   :  { %v3120_v24 = vadd.f32 %v3119_v23, %v3118_v2 }
0x2705   :  { %v3131_v31 = vsel %vm138_vm5, %v3120_v24, %v3113_v58 }
0x2706   :  { %6072 = vmatmul.mubr.msk.f32.vlgmr.msra.gmra.mrb[28].mxu1 %vm140_vm6, %v3131_v31 }
0x2707   :  { %6473 = vmatpush3.bf16.msra.mxu1 %v7571_v39  ;;  %6093 = vmatprep.mubr.msk.f32.mxu1 %vm6942_vm0, %v6943_v1 }
0x2708   :  { %6474 = vmatprep.subr.bf16.mxu1 %v6941_v0 }
0x270b   :  { %6476 = vmatpush3.bf16.msra.mxu1 %v7582_v47  ;;  %v7800_v47 = vld [vmem:[%s8157_s11] ss:$0 sm:$0xff] }
0x270c   :  { %6487 = vmatprep.subr.bf16.mxu1 %v6941_v0 }
0x270e   :  { %6094 = vmatmul.mubr.msk.f32.vlgmr.msra.gmra.mrb[30].mxu1 %vm140_vm6, %v3131_v31 }
0x270f   :  { %6489 = vmatpush3.bf16.msra.mxu1 %v7193_v53  ;;  %6122 = vmatprep.mubr.msk.f32.mxu1 %vm6942_vm0, %v6943_v1 }
0x2710   :  { %6490 = vmatprep.subr.bf16.mxu1 %v6941_v0 }
0x2713   :  { %6492 = vmatpush3.bf16.msra.mxu1 %v7210_v60 }
0x2714   :  { %6499 = vmatprep.subr.bf16.mxu1 %v6941_v0 }
0x27cd   :  { %v3274_v39 = vpop.f32.mrb[28].mxu0 }
0x27ce   :  { %v6084_v9 = vpop.f32.mrb[29].mxu0 }
0x27d9   :  { %v3200_v51 = vpop.f32.mrb[28].mxu1 }
0x27da   :  { %v3275_v3 = vadd.f32 %v3274_v39, %v3200_v51  ;;  %v6073_v52 = vpop.f32.mrb[29].mxu1 }
0x27dc   :  { %v3285_v56 = vadd.f32 %v7800_v47, %v3275_v3 }
0x27de   :  { %v3286_v25 = vsel %vm1172_vm12, %v3285_v56, -inf }
0x27df   :  { %3287 = vmax.xlane.f32.xlu0 %v3286_v25 }
0x27e1   :  { %v3385_v30 = vpop.f32.mrb[30].mxu1 }
0x27e2   :  { %v6095_v59 = vpop.f32.mrb[31].mxu1 }
0x286c   :  { %v3288_v28 = vpop.xlane.xlu0 %3287 }
0x286d   :  { %v3289_v21 = vsub.f32 %v3285_v56, %v3288_v28 }
0x286f   :  { %v3290_v10 = vmul.f32 1.442695, %v3289_v21 }
0x2871   :  { %6712 = vpow2.f32 %v3290_v10 }
0x287b   :  { %v6713_v48 = vpop.eup %6712 }
0x287c   :  { %v3292_v18 = vsel %vm1172_vm12, %v6713_v48, 0.0 }
0x287d   :  { %3293 = vadd.xlane.f32.xlu1 %v3292_v18 }
0x290a   :  { %v3294_v11 = vpop.xlane.xlu1 %3293 }
0x290b   :  { %6714 = vlog2.f32 %v3294_v11 }
0x2915   :  { %v6715_v41 = vpop.eup %6714 }
0x2916   :  { %v3296_v45 = vmul.f32 0.6931472, %v6715_v41 }
0x2918   :  { %v3297_v27 = vadd.f32 %v3296_v45, %v3288_v28 }
0x291a   :  { %v3298_v29 = vsub.f32 %v3285_v56, %v3297_v27 }
0x291c   :  { %v3309_v32 = vsel %vm213_vm4, %v3298_v29, %v3307_v15  ;;  %6101 = vmatmul.mubr.msk.f32.vlgmr.msra.gmra.mrb[30].mxu0 %vm213_vm4, %v3298_v29 }
0x291d   :  { %v3310_v34 = vsel %vm1198_vm13, %v3309_v32, 0.0  ;;  %6483 = vmatpush3.bf16.msra.mxu0 %v7138_v16  ;;  %6111 = vmatprep.mubr.msk.f32.mxu0 %vm6942_vm0, %v6943_v1 }
0x291e   :  { %3312 = vst [vmem:[#allocation11 + $0x4] sm:$0x3] %v3310_v34  ;;  %6484 = vmatprep.subr.bf16.mxu0 %v6941_v0 }
0x2921   :  { %6486 = vmatpush3.bf16.msra.mxu0 %v7155_v22 }
0x2922   :  { %6493 = vmatprep.subr.bf16.mxu0 %v6941_v0 }
0x2924   :  { %6112 = vmatmul.mubr.msk.f32.vlgmr.msra.gmra.mrb[32].mxu0 %vm140_vm6, %v7684_v62 }
0x2925   :  { %6495 = vmatpush3.bf16.msra.mxu0 %v7201_v57  ;;  %6133 = vmatprep.mubr.msk.f32.mxu0 %vm6942_vm0, %v6943_v1 }
0x2926   :  { %6496 = vmatprep.subr.bf16.mxu0 %v6941_v0 }
0x2929   :  { %6498 = vmatpush3.bf16.msra.mxu0 %v7214_v61 }
0x292a   :  { %6505 = vmatprep.subr.bf16.mxu0 %v6941_v0 }
0x29ef   :  { %v3461_v49 = vpop.f32.mrb[30].mxu0 }
0x29f0   :  { %v3462_v15 = vadd.f32 %v3461_v49, %v3385_v30  ;;  %v6102_v35 = vpop.f32.mrb[31].mxu0 }
0x29f2   :  { %v3472_v5 = vadd.f32 %v7622_v26, %v3462_v15  ;;  %v3554_v26 = vrot.slane %v7674_v17, 1 }
0x29f7   :  { %v3539_v38 = vpop.f32.mrb[32].mxu0 }
0x29f8   :  { %v3543_v40 = vadd.f32 %v3539_v38, %v3472_v5  ;;  %v6113_v44 = vpop.f32.mrb[33].mxu0 }
0x29fa   :  { %v3544_v62 = vmul.f32 %v3543_v40, %v7179_v33 }
0x29fc   :  { %v5498_v2 = vmul.f32 -1.442695, %v3544_v62 }
0x29fe   :  { %6716 = vpow2.f32 %v5498_v2 }
0x2a08   :  { %v6717_v23 = vpop.eup %6716 }
0x2a09   :  { %v3548_v58 = vadd.f32 1.0, %v6717_v23 }
0x2a0b   :  { %6718 = vrcp.f32 %v3548_v58 }
0x2a15   :  { %v6719_v24 = vpop.eup %6718 }
0x2a16   :  { %v3551_v31 = vmul.f32 %v6719_v24, %v7179_v33 }
0x2a18   :  { %v3552_v39 = vadd.f32 %v3551_v31, %v7184_v42 }
0x2a1a   :  { %3558 = vrot.lane.b32.xlu1 %v3552_v39, %s6946_s1  ;;  %v3556_v3 = vmul.f32 %v3554_v26, %v3552_v39 }
0x2a8c   :  { %v3559_v9 = vpop.permute.xlu1 %3558 }
0x2a8d   :  { %v3561_v51 = vmul.f32 %v3559_v9, %v3552_v39 }
0x2a8f   :  { %3563 = vrot.lane.b32.xlu0 %v3561_v51, %s6947_s4 }
0x2b01   :  { %v3564_v52 = vpop.permute.xlu0 %3563 }
0x2b02   :  { %v7833_v56 = vadd.f32 %v3564_v52, %v3556_v3 }
0x2b04   :  { %6720 = vtanh.f32 %v7833_v56  ;;  %v3833_v9 = vrot.slane %v7833_v56, 7 }
0x2b0e   :  { %v6721_v25 = vpop.eup %6720 }
0x2b0f   :  { %3569 = vrot.lane.b32.xlu1 %v6721_v25, %s6946_s1 }
0x2b13   :  { %3573 = vrot.lane.b32.xlu1 %v7700_v4, %s6947_s4 }
0x2b81   :  { %v3570_v30 = vpop.permute.xlu1 %3569 }
0x2b82   :  { %v3572_v59 = vmul.f32 %v3570_v30, %v3552_v39 }
0x2b84   :  { %3648 = vrot.lane.b32.xlu1 %v3572_v59, %s6947_s4 }
0x2b85   :  { %v3574_v28 = vpop.permute.xlu1 %3573 }
0x2b86   :  { %6123 = vmatmul.mubr.msk.f32.vlgmr.msra.gmra.mrb[32].mxu1 %vm140_vm6, %v3574_v28 }
0x2b87   :  { %6501 = vmatpush3.bf16.msra.mxu1 %v7138_v16  ;;  %6144 = vmatprep.mubr.msk.f32.mxu1 %vm6942_vm0, %v6943_v1 }
0x2b88   :  { %6502 = vmatprep.subr.bf16.mxu1 %v6941_v0 }
0x2b8b   :  { %6504 = vmatpush3.bf16.msra.mxu1 %v7155_v22 }
0x2b8c   :  { %6511 = vmatprep.subr.bf16.mxu1 %v6941_v0 }
0x2bf6   :  { %v3649_v17 = vpop.permute.xlu1 %3648 }
0x2bf7   :  { %6134 = vmatmul.mubr.msk.f32.vlgmr.msra.gmra.mrb[34].mxu0 %vm140_vm6, %v3649_v17  ;;  %6145 = vmatmul.mubr.msk.f32.vlgmr.msra.gmra.mrb[34].mxu1 %vm140_vm6, %v3649_v17 }
0x2bf8   :  { %6507 = vmatpush3.bf16.msra.mxu0 %v7193_v53  ;;  %6513 = vmatpush3.bf16.msra.mxu1 %v7201_v57 }
0x2bf9   :  { %6508 = vmatprep.subr.bf16.mxu0 %v6941_v0  ;;  %6514 = vmatprep.subr.bf16.mxu1 %v6941_v0 }
0x2bfa   :  { %6155 = vmatprep.mubr.msk.f32.mxu0 %vm6942_vm0, %v6943_v1  ;;  %6166 = vmatprep.mubr.msk.f32.mxu1 %vm6942_vm0, %v6943_v1 }
0x2bfc   :  { %6510 = vmatpush3.bf16.msra.mxu0 %v7210_v60  ;;  %6516 = vmatpush3.bf16.msra.mxu1 %v7214_v61 }
0x2bfd   :  { %6523 = vmatprep.subr.bf16.mxu1 %v6941_v0  ;;  %6517 = vmatprep.subr.bf16.mxu0 %v6941_v0 }
0x2c59   :  { %v3643_v4 = vpop.f32.mrb[32].mxu1 }
0x2c5a   :  { %v6124_v21 = vpop.f32.mrb[33].mxu1 }
0x2cca   :  { %v3718_v10 = vpop.f32.mrb[34].mxu0  ;;  %v3815_v48 = vpop.f32.mrb[34].mxu1 }
0x2ccb   :  { %v3719_v18 = vadd.f32 %v3718_v10, %v3643_v4  ;;  %v3820_v19 = vrot.slane %v3815_v48, 7  ;;  %v6135_v54 = vpop.f32.mrb[35].mxu0  ;;  %v6146_v11 = vpop.f32.mrb[35].mxu1 }
0x2ccd   :  { %v3722_v41 = vadd.f32 %v7659_v8, %v3719_v18  ;;  %v3822_v45 = vadd.f32 %v3820_v19, %v3472_v5 }
0x2ccf   :  { %v3723_v27 = vmul.f32 %v3722_v41, %v7179_v33  ;;  %v3823_v29 = vmul.f32 %v3822_v45, %v7179_v33 }
0x2cd1   :  { %v5501_v32 = vmul.f32 -1.442695, %v3723_v27  ;;  %v5503_v34 = vmul.f32 -1.442695, %v3823_v29 }
0x2cd3   :  { %6722 = vpow2.f32 %v5501_v32 }
0x2cd4   :  { %6724 = vpow2.f32 %v5503_v34 }
0x2cdd   :  { %v6723_v49 = vpop.eup %6722 }
0x2cde   :  { %v6725_v15 = vpop.eup %6724  ;;  %v3727_v35 = vadd.f32 1.0, %v6723_v49 }
0x2cdf   :  { %v3827_v38 = vadd.f32 1.0, %v6725_v15 }
0x2ce0   :  { %6726 = vrcp.f32 %v3727_v35 }
0x2ce1   :  { %6728 = vrcp.f32 %v3827_v38 }
0x2cea   :  { %v6727_v40 = vpop.eup %6726 }
0x2ceb   :  { %v6729_v44 = vpop.eup %6728  ;;  %v3730_v62 = vmul.f32 %v6727_v40, %v7179_v33 }
0x2cec   :  { %v3830_v5 = vmul.f32 %v6729_v44, %v7179_v33 }
0x2ced   :  { %v3731_v2 = vadd.f32 %v3730_v62, %v7184_v42 }
0x2cee   :  { %v3831_v23 = vadd.f32 %v3830_v5, %v7184_v42 }
0x2cef   :  { %3734 = vrot.lane.b32.xlu1 %v3731_v2, %s6946_s1  ;;  %v3732_v51 = vmul.f32 %v3731_v2, %v7696_v37 }
0x2cf0   :  { %3837 = vrot.lane.b32.xlu0 %v3831_v23, %s6946_s1  ;;  %v3835_v3 = vmul.f32 %v3833_v9, %v3831_v23 }
0x2d61   :  { %v3735_v58 = vpop.permute.xlu1 %3734 }
0x2d62   :  { %v3737_v24 = vmul.f32 %v3735_v58, %v3731_v2  ;;  %v3838_v31 = vpop.permute.xlu0 %3837 }
0x2d63   :  { %v3840_v39 = vmul.f32 %v3838_v31, %v3831_v23 }
0x2d64   :  { %3739 = vrot.lane.b32.xlu1 %v3737_v24, %s6947_s4 }
0x2d65   :  { %3842 = vrot.lane.b32.xlu0 %v3840_v39, %s6947_s4 }
0x2dd6   :  { %v3740_v26 = vpop.permute.xlu1 %3739 }
0x2dd7   :  { %v3742_v52 = vadd.f32 %v3740_v26, %v3732_v51  ;;  %v3843_v25 = vpop.permute.xlu0 %3842 }
0x2dd8   :  { %v7874_v30 = vadd.f32 %v3843_v25, %v3835_v3 }
0x2dd9   :  { %6730 = vtanh.f32 %v3742_v52 }
0x2dda   :  { %6732 = vtanh.f32 %v7874_v30 }
0x2de3   :  { %v6731_v59 = vpop.eup %6730 }
0x2de4   :  { %v6733_v28 = vpop.eup %6732  ;;  %3745 = vrot.lane.b32.xlu1 %v6731_v59, %s6946_s1 }
0x2de5   :  { %3848 = vrot.lane.b32.xlu0 %v6733_v28, %s6946_s1 }
0x2e56   :  { %v3746_v17 = vpop.permute.xlu1 %3745 }
0x2e57   :  { %v3748_v4 = vmul.f32 %v3746_v17, %v3731_v2  ;;  %v3849_v56 = vpop.permute.xlu0 %3848 }
0x2e58   :  { %v3851_v21 = vmul.f32 %v3849_v56, %v3831_v23 }
0x2e59   :  { %3853 = vrot.lane.b32.xlu0 %v3748_v4, %s6947_s4 }
0x2e5a   :  { %v3928_v37 = vrot.slane %v3851_v21, 1 }
0x2e5c   :  { %3929 = vrot.lane.b32.xlu1 %v3928_v37, %s6947_s4 }
0x2ecb   :  { %v3854_v10 = vpop.permute.xlu0 %3853 }
0x2ecc   :  { %6156 = vmatmul.mubr.msk.f32.vlgmr.msra.gmra.mrb[36].mxu0 %vm140_vm6, %v3854_v10 }
0x2ecd   :  { %6519 = vmatpush3.bf16.msra.mxu0 %v7758_v63  ;;  %6177 = vmatprep.mubr.msk.f32.mxu0 %vm6942_vm0, %v6943_v1 }
0x2ece   :  { %v7885_v48 = vpop.permute.xlu1 %3929  ;;  %6520 = vmatprep.subr.bf16.mxu0 %v6941_v0 }
0x2ecf   :  { %6167 = vmatmul.mubr.msk.f32.vlgmr.msra.gmra.mrb[36].mxu1 %vm140_vm6, %v7885_v48 }
0x2ed0   :  { %6525 = vmatpush3.bf16.msra.mxu1 %v7736_v12  ;;  %6188 = vmatprep.mubr.msk.f32.mxu1 %vm6942_vm0, %v6943_v1 }
0x2ed1   :  { %6526 = vmatprep.subr.bf16.mxu1 %v6941_v0  ;;  %6522 = vmatpush3.bf16.msra.mxu0 %v7768_v13 }
0x2ed2   :  { %6529 = vmatprep.subr.bf16.mxu0 %v6941_v0 }
0x2ed4   :  { %6528 = vmatpush3.bf16.msra.mxu1 %v7746_v14 }
0x2ed5   :  { %6535 = vmatprep.subr.bf16.mxu1 %v6941_v0 }
0x2f9f   :  { %v3923_v63 = vpop.f32.mrb[36].mxu0 }
0x2fa0   :  { %v6157_v18 = vpop.f32.mrb[37].mxu0 }
0x2fa2   :  { %v3999_v19 = vpop.f32.mrb[36].mxu1 }
0x2fa3   :  { %v4000_v54 = vadd.f32 %v3999_v19, %v3923_v63  ;;  %v6168_v11 = vpop.f32.mrb[37].mxu1 }
0x2fa5   :  { %v4003_v12 = vadd.f32 %v7659_v8, %v4000_v54 }
0x2fa7   :  { %v4004_v41 = vmul.f32 %v4003_v12, %v7179_v33 }
0x2fa9   :  { %v5506_v45 = vmul.f32 -1.442695, %v4004_v41 }
0x2fab   :  { %6734 = vpow2.f32 %v5506_v45 }
0x2fb5   :  { %v6735_v27 = vpop.eup %6734 }
0x2fb6   :  { %v4008_v29 = vadd.f32 1.0, %v6735_v27 }
0x2fb8   :  { %6736 = vrcp.f32 %v4008_v29 }
0x2fc2   :  { %v6737_v13 = vpop.eup %6736 }
0x2fc3   :  { %v4011_v32 = vmul.f32 %v6737_v13, %v7179_v33 }
0x2fc5   :  { %v4012_v14 = vadd.f32 %v4011_v32, %v7184_v42 }
0x2fc7   :  { %4015 = vrot.lane.b32.xlu0 %v4012_v14, %s6946_s1  ;;  %v4013_v15 = vmul.f32 %v4012_v14, %v3742_v52 }
0x3039   :  { %v4016_v34 = vpop.permute.xlu0 %4015 }
0x303a   :  { %v4018_v49 = vmul.f32 %v4016_v34, %v4012_v14 }
0x303c   :  { %4020 = vrot.lane.b32.xlu1 %v4018_v49, %s6947_s4 }
0x30ae   :  { %v4021_v8 = vpop.permute.xlu1 %4020 }
0x30af   :  { %v7904_v35 = vadd.f32 %v4021_v8, %v4013_v15 }
0x30b1   :  { %6738 = vtanh.f32 %v7904_v35 }
0x30bb   :  { %v6739_v38 = vpop.eup %6738 }
0x30bc   :  { %4026 = vrot.lane.b32.xlu0 %v6739_v38, %s6946_s1 }
0x312e   :  { %v4027_v40 = vpop.permute.xlu0 %4026 }
0x312f   :  { %v7908_v44 = vmul.f32 %v4027_v40, %v4012_v14 }
0x3131   :  { %v4031_v62 = vrot.slane %v7908_v44, 7 }
0x3133   :  { %v4033_v5 = vsel %vm855_vm10, %v3748_v4, %v4031_v62 }
0x3134   :  { %v4041_v2 = vrot.slane %v4033_v5, %v7293_v43 }
0x3136   :  { %v4042_v23 = vcombine.high %v4041_v2, %v4041_v2  ;;  %v4049_v58 = vrot.slane %v4041_v2, %v7293_v43 }
0x3138   :  { %v4060_v24 = vrot.slane %v4049_v58, %v7298_v46  ;;  %v4056_v31 = vrot.slane %v4042_v23, %v7293_v43  ;;  %v7936_v23 = vld [vmem:[#allocation2] sm:$0xff] }
0x313a   :  { %v4067_v39 = vmul.f32 %v4060_v24, %v7302_v50  ;;  %v4064_v9 = vrot.slane %v4056_v31, %v7298_v46 }
0x313c   :  { %4071 = vrot.lane.b32.xlu1 %v4067_v39, %s6947_s4  ;;  %v4068_v51 = vmul.f32 %v4064_v9, %v7306_v55 }
0x313e   :  { %4073 = vrot.lane.b32.xlu0 %v4068_v51, %s6947_s4  ;;  %v7941_v51 = vld [vmem:[#allocation2 + $0x8] sm:$0xff] }
0x31ae   :  { %v4072_v26 = vpop.permute.xlu1 %4071 }
0x31af   :  { %v4077_v3 = vsel %vm140_vm6, %v4072_v26, 0.0 }
0x31b0   :  { %4078 = vadd.xlane.f32.xlu1 %v4077_v3  ;;  %v4074_v52 = vpop.permute.xlu0 %4073 }
0x31b1   :  { %v4080_v25 = vsel %vm140_vm6, %v4074_v52, 0.0 }
0x31b2   :  { %4081 = vadd.xlane.f32.xlu0 %v4080_v25 }
0x323d   :  { %v4079_v59 = vpop.xlane.xlu1 %4078 }
0x323e   :  { %v4088_v17 = vrot.slane %v4079_v59, %v7317_v6 }
0x323f   :  { %v4082_v28 = vpop.xlane.xlu0 %4081 }
0x3240   :  { %v4092_v4 = vrot.slane %v4082_v28, %v7317_v6 }
0x3242   :  { %v4093_v56 = vsel %vm138_vm5, %v4092_v4, %v4088_v17 }
0x3243   :  { %v4095_v21 = vsel %vm924_vm11, %v4093_v56, -inf }
0x3244   :  { %4096 = vmax.xlane.f32.xlu0 %v4095_v21 }
0x32d1   :  { %v4097_v37 = vpop.xlane.xlu0 %4096 }
0x32d2   :  { %v4102_v10 = vrot.slane %v4097_v37, %v7298_v46  ;;  %v4106_v63 = vrot.slane %v4097_v37, %v7324_v20 }
0x32d4   :  { %v4109_v18 = vsub.f32 %v4079_v59, %v4102_v10  ;;  %v4110_v19 = vsub.f32 %v4082_v28, %v4106_v63  ;;  %v4371_v63 = vld [vmem:[%s8149_s3] sm:$0xff] }
0x32d6   :  { %v4111_v54 = vmul.f32 1.442695, %v4109_v18  ;;  %v4113_v11 = vmul.f32 1.442695, %v4110_v19  ;;  %v4372_v18 = vld [vmem:[%s8149_s3 + $0x8] sm:$0xff] }
0x32d8   :  { %6740 = vpow2.f32 %v4111_v54 }
0x32d9   :  { %6742 = vpow2.f32 %v4113_v11 }
0x32e2   :  { %v6741_v12 = vpop.eup %6740 }
0x32e3   :  { %v6743_v41 = vpop.eup %6742  ;;  %4118 = vperm.xlu0 %6607, %v6741_v12  }
0x32e4   :  { %4121 = vperm.xlu1 %6606, %v6743_v41  }
0x3362   :  { %v4119_v45 = vpop.permute.xlu0 %4118 }
0x3363   :  { %v4122_v27 = vpop.permute.xlu1 %4121  ;;  %v4126_v29 = vrot.slane %v4119_v45, %v7317_v6  ;;  %v4374_v45 = vld [vmem:[%s8149_s3 + $0x18] sm:$0xff] }
0x3364   :  { %v4130_v13 = vrot.slane %v4122_v27, %v7317_v6 }
0x3366   :  { %v4131_v32 = vsel %vm138_vm5, %v4130_v13, %v4126_v29 }
0x3367   :  { %v4133_v14 = vsel %vm924_vm11, %v4131_v32, 0.0 }
0x3368   :  { %4134 = vadd.xlane.f32.xlu1 %v4133_v14 }
0x33f5   :  { %v4135_v34 = vpop.xlane.xlu1 %4134 }
0x33f6   :  { %v4140_v49 = vrot.slane %v4135_v34, %v7298_v46  ;;  %v4144_v15 = vrot.slane %v4135_v34, %v7324_v20 }
0x33f8   :  { %6744 = vrcp.f32 %v4140_v49 }
0x33f9   :  { %6746 = vrcp.f32 %v4144_v15 }
0x3402   :  { %v6745_v8 = vpop.eup %6744 }
0x3403   :  { %v4148_v38 = vmul.f32 %v6745_v8, %v6741_v12  ;;  %v6747_v40 = vpop.eup %6746  ;;  %v6530_v12 = vpack.c.bf16 %v4372_v18, %v4371_v63 }
0x3404   :  { %v4150_v62 = vmul.f32 %v6747_v40, %v6743_v41  ;;  %v4373_v41 = vld [vmem:[%s8149_s3 + $0x10] sm:$0xff] }
0x3405   :  { %4153 = vperm.xlu0 %6607, %v4148_v38   ;;  %v6533_v29 = vpack.c.bf16 %v4374_v45, %v4373_v41 }
0x3409   :  { %4158 = vperm.xlu0 %6607, %v4150_v62  }
0x340d   :  { %4260 = vrot.lane.b32.xlu0 %v4033_v5, %s6947_s4 }
0x3484   :  { %v4154_v2 = vpop.permute.xlu0 %4153 }
0x3485   :  { %v4161_v58 = vmul.f32 %v7936_v23, %v4154_v2  ;;  %v4358_v9 = vrot.slane %v4154_v2, %v7417_v36 }
0x3487   :  { %v4163_v24 = vsel %vm140_vm6, %v4161_v58, 0.0 }
0x3488   :  { %v4164_v31 = vrot.slane %v4163_v24, 4  ;;  %v4159_v39 = vpop.permute.xlu0 %4158 }
0x3489   :  { %v4162_v26 = vmul.f32 %v7941_v51, %v4159_v39  ;;  %v4362_v3 = vrot.slane %v4159_v39, %v7417_v36  ;;  %v4369_v39 = vld [vmem:[#allocation5] sm:$0xff] }
0x348a   :  { %v4165_v52 = vadd.f32 %v4164_v31, %v4163_v24 }
0x348b   :  { %v4170_v5 = vsel %vm140_vm6, %v4162_v26, 0.0  ;;  %v4363_v25 = vsel %vm138_vm5, %v4362_v3, %v4358_v9  ;;  %v4370_v9 = vld [vmem:[#allocation5 + $0x8] sm:$0x3] }
0x348c   :  { %v4166_v59 = vrot.slane %v4165_v52, 2  ;;  %v4171_v28 = vrot.slane %v4170_v5, 4  ;;  %v4261_v17 = vpop.permute.xlu0 %4260  ;;  %v6536_v26 = vpack.c.bf16 %v4370_v9, %v4369_v39 }
0x348d   :  { %6189 = vmatmul.mubr.msk.f32.vlgmr.msra.gmra.mrb[38].mxu1 %vm140_vm6, %v4261_v17 }
0x348e   :  { %v4167_v4 = vadd.f32 %v4166_v59, %v4165_v52  ;;  %v4172_v56 = vadd.f32 %v4171_v28, %v4170_v5  ;;  %6206 = vmatprep.mubr.msk.f32.mxu1 %vm6942_vm0, %v6943_v1  ;;  %6538 = vmatpush3.bf16.msk.msra.mxu1 %vm7110_vm3, %v6536_v26 }
0x348f   :  { %6539 = vmatprep.subr.bf16.mxu1 %v6941_v0 }
0x3490   :  { %v4173_v21 = vrot.slane %v4172_v56, 2  ;;  %v4168_v37 = vrot.slane %v4167_v4, 1 }
0x3492   :  { %v4174_v10 = vadd.f32 %v4173_v21, %v4172_v56  ;;  %v4169_v54 = vadd.f32 %v4168_v37, %v4167_v4  ;;  %v5513_v56 = vld [vmem:[#allocation7] ss:$0 sm:$0xff] }
0x3494   :  { %v4175_v19 = vrot.slane %v4174_v10, 1 }
0x3496   :  { %v4176_v11 = vadd.f32 %v4175_v19, %v4174_v10 }
0x3498   :  { %v4187_v27 = vsel %vm138_vm5, %v4176_v11, %v4169_v54 }
0x3499   :  { %6178 = vmatmul.mubr.msk.f32.vlgmr.msra.gmra.mrb[38].mxu0 %vm140_vm6, %v4187_v27 }
0x349a   :  { %6531 = vmatpush3.bf16.msra.mxu0 %v6530_v12  ;;  %6199 = vmatprep.mubr.msk.f32.mxu0 %vm6942_vm0, %v6943_v1 }
0x349b   :  { %6532 = vmatprep.subr.bf16.mxu0 %v6941_v0 }
0x349e   :  { %6534 = vmatpush3.bf16.msra.mxu0 %v6533_v29  ;;  %v4610_v29 = vrot.slane %v7874_v30, 1 }
0x349f   :  { %6545 = vmatprep.subr.bf16.mxu0 %v6941_v0 }
0x34a1   :  { %6200 = vmatmul.mubr.msk.f32.vlgmr.msra.gmra.mrb[40].mxu0 %vm140_vm6, %v4187_v27 }
0x34a2   :  { %6547 = vmatpush3.bf16.msra.mxu0 %v7193_v53  ;;  %6228 = vmatprep.mubr.msk.f32.mxu0 %vm6942_vm0, %v6943_v1 }
0x34a3   :  { %6548 = vmatprep.subr.bf16.mxu0 %v6941_v0 }
0x34a6   :  { %6550 = vmatpush3.bf16.msra.mxu0 %v7210_v60 }
0x34a7   :  { %6557 = vmatprep.subr.bf16.mxu0 %v6941_v0 }
0x3560   :  { %v4330_v13 = vpop.f32.mrb[38].mxu1 }
0x3561   :  { %v6190_v32 = vpop.f32.mrb[39].mxu1 }
0x356c   :  { %v4256_v14 = vpop.f32.mrb[38].mxu0 }
0x356d   :  { %v4331_v34 = vadd.f32 %v4330_v13, %v4256_v14  ;;  %v6179_v49 = vpop.f32.mrb[39].mxu0 }
0x356f   :  { %v4341_v15 = vadd.f32 %v7800_v47, %v4331_v34 }
0x3571   :  { %v4342_v8 = vsel %vm1172_vm12, %v4341_v15, -inf }
0x3572   :  { %4343 = vmax.xlane.f32.xlu0 %v4342_v8 }
0x3574   :  { %v4441_v38 = vpop.f32.mrb[40].mxu0 }
0x3575   :  { %v6201_v40 = vpop.f32.mrb[41].mxu0 }
0x35ff   :  { %v4344_v62 = vpop.xlane.xlu0 %4343 }
0x3600   :  { %v4345_v2 = vsub.f32 %v4341_v15, %v4344_v62 }
0x3602   :  { %v4346_v58 = vmul.f32 1.442695, %v4345_v2  ;;  %v6793_v2 = vld [vmem:[#allocation10] sm:$0x1] }
0x3604   :  { %6748 = vpow2.f32 %v4346_v58 }
0x360e   :  { %v6749_v24 = vpop.eup %6748 }
0x360f   :  { %v4348_v31 = vsel %vm1172_vm12, %v6749_v24, 0.0 }
0x3610   :  { %4349 = vadd.xlane.f32.xlu1 %v4348_v31 }
0x369d   :  { %v4350_v47 = vpop.xlane.xlu1 %4349 }
0x369e   :  { %6750 = vlog2.f32 %v4350_v47 }
0x36a8   :  { %v6751_v3 = vpop.eup %6750 }
0x36a9   :  { %v4352_v52 = vmul.f32 0.6931472, %v6751_v3 }
0x36ab   :  { %v4353_v5 = vadd.f32 %v4352_v52, %v4344_v62 }
0x36ad   :  { %v4354_v59 = vsub.f32 %v4341_v15, %v4353_v5 }
0x36af   :  { %v4365_v28 = vsel %vm213_vm4, %v4354_v59, %v4363_v25  ;;  %6207 = vmatmul.mubr.msk.f32.vlgmr.msra.gmra.mrb[40].mxu1 %vm213_vm4, %v4354_v59 }
0x36b0   :  { %v4366_v17 = vsel %vm1198_vm13, %v4365_v28, 0.0  ;;  %6541 = vmatpush3.bf16.msra.mxu1 %v7138_v16  ;;  %6217 = vmatprep.mubr.msk.f32.mxu1 %vm6942_vm0, %v6943_v1 }
0x36b1   :  { %4368 = vst [vmem:[#allocation11 + $0x6] sm:$0x3] %v4366_v17  ;;  %6542 = vmatprep.subr.bf16.mxu1 %v6941_v0 }
0x36b4   :  { %6544 = vmatpush3.bf16.msra.mxu1 %v7155_v22 }
0x36b5   :  { %6551 = vmatprep.subr.bf16.mxu1 %v6941_v0 }
0x36b7   :  { %6218 = vmatmul.mubr.msk.f32.vlgmr.msra.gmra.mrb[42].mxu1 %vm140_vm6, %v7885_v48 }
0x36b8   :  { %6553 = vmatpush3.bf16.msra.mxu1 %v7201_v57  ;;  %6239 = vmatprep.mubr.msk.f32.mxu1 %vm6942_vm0, %v6943_v1 }
0x36b9   :  { %6554 = vmatprep.subr.bf16.mxu1 %v6941_v0 }
0x36bc   :  { %6556 = vmatpush3.bf16.msra.mxu1 %v7214_v61 }
0x36bd   :  { %6563 = vmatprep.subr.bf16.mxu1 %v6941_v0 }
0x3782   :  { %v4517_v7 = vpop.f32.mrb[40].mxu1 }
0x3783   :  { %v4518_v25 = vadd.f32 %v4517_v7, %v4441_v38  ;;  %v6208_v4 = vpop.f32.mrb[41].mxu1 }
0x3785   :  { %v4528_v21 = vadd.f32 %v5513_v56, %v4518_v25 }
0x378a   :  { %v4595_v37 = vpop.f32.mrb[42].mxu1 }
0x378b   :  { %v4599_v10 = vadd.f32 %v4595_v37, %v4528_v21  ;;  %v6219_v63 = vpop.f32.mrb[43].mxu1 }
0x378d   :  { %v4600_v48 = vmul.f32 %v4599_v10, %v7179_v33 }
0x378f   :  { %v5515_v18 = vmul.f32 -1.442695, %v4600_v48 }
0x3791   :  { %6752 = vpow2.f32 %v5515_v18 }
0x379b   :  { %v6753_v19 = vpop.eup %6752 }
0x379c   :  { %v4604_v54 = vadd.f32 1.0, %v6753_v19 }
0x379e   :  { %6754 = vrcp.f32 %v4604_v54 }
0x37a8   :  { %v6755_v11 = vpop.eup %6754 }
0x37a9   :  { %v4607_v12 = vmul.f32 %v6755_v11, %v7179_v33 }
0x37ab   :  { %v4608_v41 = vadd.f32 %v4607_v12, %v7184_v42 }
0x37ad   :  { %4614 = vrot.lane.b32.xlu1 %v4608_v41, %s6946_s1  ;;  %v4612_v13 = vmul.f32 %v4610_v29, %v4608_v41 }
0x381f   :  { %v4615_v45 = vpop.permute.xlu1 %4614 }
0x3820   :  { %v4617_v27 = vmul.f32 %v4615_v45, %v4608_v41 }
0x3822   :  { %4619 = vrot.lane.b32.xlu0 %v4617_v27, %s6947_s4 }
0x3894   :  { %v4620_v32 = vpop.permute.xlu0 %4619 }
0x3895   :  { %v8004_v14 = vadd.f32 %v4620_v32, %v4612_v13 }
0x3897   :  { %6756 = vtanh.f32 %v8004_v14  ;;  %v4889_v37 = vrot.slane %v8004_v14, 7 }
0x38a1   :  { %v6757_v34 = vpop.eup %6756 }
0x38a2   :  { %4625 = vrot.lane.b32.xlu1 %v6757_v34, %s6946_s1 }
0x38a6   :  { %4629 = vrot.lane.b32.xlu1 %v7908_v44, %s6947_s4 }
0x3914   :  { %v4626_v49 = vpop.permute.xlu1 %4625 }
0x3915   :  { %v4628_v15 = vmul.f32 %v4626_v49, %v4608_v41 }
0x3917   :  { %4704 = vrot.lane.b32.xlu1 %v4628_v15, %s6947_s4 }
0x3918   :  { %v4630_v8 = vpop.permute.xlu1 %4629 }
0x3919   :  { %6229 = vmatmul.mubr.msk.f32.vlgmr.msra.gmra.mrb[42].mxu0 %vm140_vm6, %v4630_v8 }
0x391a   :  { %6559 = vmatpush3.bf16.msra.mxu0 %v7138_v16  ;;  %6250 = vmatprep.mubr.msk.f32.mxu0 %vm6942_vm0, %v6943_v1 }
0x391b   :  { %6560 = vmatprep.subr.bf16.mxu0 %v6941_v0 }
0x391e   :  { %6562 = vmatpush3.bf16.msra.mxu0 %v7155_v22 }
0x391f   :  { %6569 = vmatprep.subr.bf16.mxu0 %v6941_v0 }
0x3989   :  { %v4705_v30 = vpop.permute.xlu1 %4704 }
0x398a   :  { %6240 = vmatmul.mubr.msk.f32.vlgmr.msra.gmra.mrb[44].mxu1 %vm140_vm6, %v4705_v30  ;;  %6251 = vmatmul.mubr.msk.f32.vlgmr.msra.gmra.mrb[44].mxu0 %vm140_vm6, %v4705_v30 }
0x398b   :  { %6565 = vmatpush3.bf16.msra.mxu1 %v7193_v53  ;;  %6571 = vmatpush3.bf16.msra.mxu0 %v7201_v57 }
0x398c   :  { %6566 = vmatprep.subr.bf16.mxu1 %v6941_v0  ;;  %6572 = vmatprep.subr.bf16.mxu0 %v6941_v0 }
0x398d   :  { %6261 = vmatprep.mubr.msk.f32.mxu1 %vm6942_vm0, %v6943_v1  ;;  %6272 = vmatprep.mubr.msk.f32.mxu0 %vm6942_vm0, %v6943_v1 }
0x398f   :  { %6568 = vmatpush3.bf16.msra.mxu1 %v7210_v60  ;;  %6574 = vmatpush3.bf16.msra.mxu0 %v7214_v61 }
0x3990   :  { %6581 = vmatprep.subr.bf16.mxu0 %v6941_v0  ;;  %6575 = vmatprep.subr.bf16.mxu1 %v6941_v0 }
0x39ec   :  { %v4699_v16 = vpop.f32.mrb[42].mxu0 }
0x39ed   :  { %v6230_v22 = vpop.f32.mrb[43].mxu0 }
0x3a5d   :  { %v4774_v53 = vpop.f32.mrb[44].mxu1  ;;  %v4871_v57 = vpop.f32.mrb[44].mxu0 }
0x3a5e   :  { %v4775_v44 = vadd.f32 %v4774_v53, %v4699_v16  ;;  %v4876_v38 = vrot.slane %v4871_v57, 7  ;;  %v6241_v40 = vpop.f32.mrb[45].mxu1  ;;  %v6252_v62 = vpop.f32.mrb[45].mxu0 }
0x3a60   :  { %v4778_v58 = vadd.f32 %v6793_v2, %v4775_v44  ;;  %v4878_v24 = vadd.f32 %v4876_v38, %v4528_v21 }
0x3a62   :  { %v4779_v31 = vmul.f32 %v4778_v58, %v7179_v33  ;;  %v4879_v60 = vmul.f32 %v4878_v24, %v7179_v33 }
0x3a64   :  { %v5518_v61 = vmul.f32 -1.442695, %v4779_v31  ;;  %v5520_v39 = vmul.f32 -1.442695, %v4879_v60 }
0x3a66   :  { %6758 = vpow2.f32 %v5518_v61 }
0x3a67   :  { %6760 = vpow2.f32 %v5520_v39 }
0x3a70   :  { %v6759_v9 = vpop.eup %6758 }
0x3a71   :  { %v6761_v26 = vpop.eup %6760  ;;  %v4783_v47 = vadd.f32 1.0, %v6759_v9 }
0x3a72   :  { %v4883_v3 = vadd.f32 1.0, %v6761_v26 }
0x3a73   :  { %6762 = vrcp.f32 %v4783_v47 }
0x3a74   :  { %6764 = vrcp.f32 %v4883_v3 }
0x3a7d   :  { %v6763_v52 = vpop.eup %6762 }
0x3a7e   :  { %v6765_v5 = vpop.eup %6764  ;;  %v4786_v59 = vmul.f32 %v6763_v52, %v7179_v33 }
0x3a7f   :  { %v4886_v28 = vmul.f32 %v6765_v5, %v7179_v33 }
0x3a80   :  { %v4787_v17 = vadd.f32 %v4786_v59, %v7184_v42 }
0x3a81   :  { %v4887_v7 = vadd.f32 %v4886_v28, %v7184_v42 }
0x3a82   :  { %4790 = vrot.lane.b32.xlu0 %v4787_v17, %s6946_s1  ;;  %v4788_v10 = vmul.f32 %v4787_v17, %v7904_v35 }
0x3a83   :  { %4893 = vrot.lane.b32.xlu1 %v4887_v7, %s6946_s1  ;;  %v4891_v63 = vmul.f32 %v4889_v37, %v4887_v7 }
0x3af4   :  { %v4791_v25 = vpop.permute.xlu0 %4790 }
0x3af5   :  { %v4894_v4 = vpop.permute.xlu1 %4893  ;;  %v4793_v56 = vmul.f32 %v4791_v25, %v4787_v17 }
0x3af6   :  { %v4896_v21 = vmul.f32 %v4894_v4, %v4887_v7 }
0x3af7   :  { %4795 = vrot.lane.b32.xlu0 %v4793_v56, %s6947_s4 }
0x3af8   :  { %4898 = vrot.lane.b32.xlu1 %v4896_v21, %s6947_s4 }
0x3b69   :  { %v4796_v48 = vpop.permute.xlu0 %4795 }
0x3b6a   :  { %v4899_v18 = vpop.permute.xlu1 %4898  ;;  %v4798_v19 = vadd.f32 %v4796_v48, %v4788_v10 }
0x3b6b   :  { %v4901_v54 = vadd.f32 %v4899_v18, %v4891_v63 }
0x3b6c   :  { %6766 = vtanh.f32 %v4798_v19 }
0x3b6d   :  { %6768 = vtanh.f32 %v4901_v54 }
0x3b76   :  { %v6767_v11 = vpop.eup %6766 }
0x3b77   :  { %v6769_v12 = vpop.eup %6768  ;;  %4801 = vrot.lane.b32.xlu0 %v6767_v11, %s6946_s1 }
0x3b78   :  { %4904 = vrot.lane.b32.xlu1 %v6769_v12, %s6946_s1 }
0x3be9   :  { %v4802_v41 = vpop.permute.xlu0 %4801 }
0x3bea   :  { %v4905_v45 = vpop.permute.xlu1 %4904  ;;  %v4804_v27 = vmul.f32 %v4802_v41, %v4787_v17 }
0x3beb   :  { %v4907_v29 = vmul.f32 %v4905_v45, %v4887_v7 }
0x3bec   :  { %4909 = vrot.lane.b32.xlu1 %v4804_v27, %s6947_s4 }
0x3bed   :  { %v4984_v35 = vrot.slane %v4907_v29, 1 }
0x3bef   :  { %4985 = vrot.lane.b32.xlu0 %v4984_v35, %s6947_s4 }
0x3c5e   :  { %v4910_v13 = vpop.permute.xlu1 %4909 }
0x3c5f   :  { %6262 = vmatmul.mubr.msk.f32.vlgmr.msra.gmra.mrb[46].mxu1 %vm140_vm6, %v4910_v13 }
0x3c60   :  { %6283 = vmatprep.mubr.msk.f32.mxu1 %vm6942_vm0, %v6943_v1 }
0x3c61   :  { %v4986_v32 = vpop.permute.xlu0 %4985 }
0x3c62   :  { %6273 = vmatmul.mubr.msk.f32.vlgmr.msra.gmra.mrb[46].mxu0 %vm140_vm6, %v4986_v32 }
0x3c63   :  { %6294 = vmatprep.mubr.msk.f32.mxu0 %vm6942_vm0, %v6943_v1 }
0x3d32   :  { %v4979_v14 = vpop.f32.mrb[46].mxu1 }
0x3d33   :  { %v6263_v34 = vpop.f32.mrb[47].mxu1 }
0x3d35   :  { %v5055_v49 = vpop.f32.mrb[46].mxu0 }
0x3d36   :  { %v5056_v15 = vadd.f32 %v5055_v49, %v4979_v14  ;;  %v6274_v8 = vpop.f32.mrb[47].mxu0 }
0x3d38   :  { %v5059_v30 = vadd.f32 %v6793_v2, %v5056_v15 }
0x3d3a   :  { %v5060_v16 = vmul.f32 %v5059_v30, %v7179_v33  ;;  %v5233_v30 = vld [vmem:[%s8155_s9] sm:$0xff] }
0x3d3c   :  { %v5523_v22 = vmul.f32 -1.442695, %v5060_v16 }
0x3d3e   :  { %6770 = vpow2.f32 %v5523_v22 }
0x3d48   :  { %v6771_v53 = vpop.eup %6770 }
0x3d49   :  { %v5064_v57 = vadd.f32 1.0, %v6771_v53 }
0x3d4b   :  { %6772 = vrcp.f32 %v5064_v57  ;;  %v5237_v57 = vld [vmem:[%s8156_s10] sm:$0xff] }
0x3d55   :  { %v6773_v44 = vpop.eup %6772 }
0x3d56   :  { %v5067_v38 = vmul.f32 %v6773_v44, %v7179_v33  ;;  %v5238_v44 = vld [vmem:[%s8156_s10 + $0x8] sm:$0xff] }
0x3d58   :  { %v5068_v40 = vadd.f32 %v5067_v38, %v7184_v42  ;;  %v6576_v38 = vpack.c.bf16 %v5238_v44, %v5237_v57 }
0x3d5a   :  { %5071 = vrot.lane.b32.xlu1 %v5068_v40, %s6946_s1  ;;  %v5069_v58 = vmul.f32 %v5068_v40, %v4798_v19  ;;  %6577 = vmatpush3.bf16.msra.mxu1 %v6576_v38 }
0x3d5b   :  { %6578 = vmatprep.subr.bf16.mxu1 %v6941_v0 }
0x3dcc   :  { %v5072_v1 = vpop.permute.xlu1 %5071 }
0x3dcd   :  { %v5074_v62 = vmul.f32 %v5072_v1, %v5068_v40  ;;  %v5240_v1 = vld [vmem:[%s8156_s10 + $0x18] sm:$0xff] }
0x3dcf   :  { %5076 = vrot.lane.b32.xlu0 %v5074_v62, %s6947_s4 }
0x3e41   :  { %v5077_v2 = vpop.permute.xlu0 %5076 }
0x3e42   :  { %v5079_v24 = vadd.f32 %v5077_v2, %v5069_v58 }
0x3e44   :  { %6774 = vtanh.f32 %v5079_v24 }
0x3e4e   :  { %v6775_v31 = vpop.eup %6774 }
0x3e4f   :  { %5082 = vrot.lane.b32.xlu1 %v6775_v31, %s6946_s1 }
0x3ec1   :  { %v5083_v60 = vpop.permute.xlu1 %5082 }
0x3ec2   :  { %v5085_v61 = vmul.f32 %v5083_v60, %v5068_v40  ;;  %v5239_v40 = vld [vmem:[%s8156_s10 + $0x10] sm:$0xff] }
0x3ec3   :  { %v6579_v62 = vpack.c.bf16 %v5240_v1, %v5239_v40 }
0x3ec4   :  { %v5087_v39 = vrot.slane %v5085_v61, 7 }
0x3ec5   :  { %6580 = vmatpush3.bf16.msra.mxu1 %v6579_v62 }
0x3ec6   :  { %v8061_v33 = vsel %vm855_vm10, %v4804_v27, %v5087_v39 }
0x3ec7   :  { %v5097_v42 = vrot.slane %v8061_v33, %v7293_v43 }
0x3ec9   :  { %v5098_v9 = vcombine.high %v5097_v42, %v5097_v42  ;;  %v5105_v26 = vrot.slane %v5097_v42, %v7293_v43 }
0x3ecb   :  { %v5112_v47 = vrot.slane %v5098_v9, %v7293_v43  ;;  %v5116_v3 = vrot.slane %v5105_v26, %v7298_v46 }
0x3ecd   :  { %v5123_v52 = vmul.f32 %v5116_v3, %v7302_v50  ;;  %v5120_v5 = vrot.slane %v5112_v47, %v7298_v46 }
0x3ecf   :  { %5127 = vrot.lane.b32.xlu0 %v5123_v52, %s6947_s4  ;;  %v5124_v59 = vmul.f32 %v5120_v5, %v7306_v55 }
0x3ed1   :  { %5129 = vrot.lane.b32.xlu1 %v5124_v59, %s6947_s4 }
0x3f41   :  { %v5128_v28 = vpop.permute.xlu0 %5127 }
0x3f42   :  { %v5133_v17 = vsel %vm140_vm6, %v5128_v28, 0.0 }
0x3f43   :  { %5134 = vadd.xlane.f32.xlu0 %v5133_v17  ;;  %v5130_v7 = vpop.permute.xlu1 %5129 }
0x3f44   :  { %v5136_v25 = vsel %vm140_vm6, %v5130_v7, 0.0 }
0x3f45   :  { %5137 = vadd.xlane.f32.xlu1 %v5136_v25 }
0x3fd0   :  { %v5135_v43 = vpop.xlane.xlu0 %5134 }
0x3fd1   :  { %v5144_v50 = vrot.slane %v5135_v43, %v7317_v6 }
0x3fd2   :  { %v5138_v4 = vpop.xlane.xlu1 %5137 }
0x3fd3   :  { %v5148_v56 = vrot.slane %v5138_v4, %v7317_v6 }
0x3fd5   :  { %v5149_v21 = vsel %vm138_vm5, %v5148_v56, %v5144_v50  ;;  %v5526_v50 = vld [vmem:[%s8157_s11] ss:$0 sm:$0xff]  ;;  %s6951_s11 = smov [#allocation11]  }
0x3fd6   :  { %v5151_v55 = vsel %vm924_vm11, %v5149_v21, -inf  ;;  %s5430_s14 = sshll.u32 %s6951_s11, 4  ;;  %s5431_s14 = int_to_ptr.vmem [resolvable:$true] %s5430_s14 }
0x3fd7   :  { %5152 = vmax.xlane.f32.xlu0 %v5151_v55  ;;  %s6904_s28 = scalar_lea.vmem %s5431_s14, 160  ;;  %p6909_p13 = scmp.lt.s32.totalorder %s5431_s14, %s5431_s14 }
0x3fd8   :  { %p6905_p12 = scmp.ne.s32.totalorder %s5431_s14, %s6904_s28  ;;  %p6910_p0 = scmp.lt.s32.totalorder %s6904_s28, %s6904_s28 }
0x3fda   :  { %p6911_p1 = por %p6910_p0, %p6909_p13 }
0x3fdc   :  { %p6912_p2 = pnand %p6911_p1, %p6905_p12 }
0x4064   :  { %v5153_v37 = vpop.xlane.xlu0 %5152 }
0x4065   :  { %v5158_v10 = vrot.slane %v5153_v37, %v7298_v46  ;;  %v5162_v63 = vrot.slane %v5153_v37, %v7324_v20 }
0x4067   :  { %v5165_v48 = vsub.f32 %v5135_v43, %v5158_v10  ;;  %v5166_v18 = vsub.f32 %v5138_v4, %v5162_v63 }
0x4069   :  { %v5167_v19 = vmul.f32 1.442695, %v5165_v48  ;;  %v5169_v54 = vmul.f32 1.442695, %v5166_v18 }
0x406b   :  { %6776 = vpow2.f32 %v5167_v19 }
0x406c   :  { %6778 = vpow2.f32 %v5169_v54 }
0x4075   :  { %v6777_v11 = vpop.eup %6776 }
0x4076   :  { %v6779_v12 = vpop.eup %6778  ;;  %5174 = vperm.xlu0 %6607, %v6777_v11  }
0x4077   :  { %5177 = vperm.xlu1 %6606, %v6779_v12  }
0x40f5   :  { %v5175_v41 = vpop.permute.xlu0 %5174 }
0x40f6   :  { %v5178_v45 = vpop.permute.xlu1 %5177  ;;  %v5182_v27 = vrot.slane %v5175_v41, %v7317_v6 }
0x40f7   :  { %v5186_v29 = vrot.slane %v5178_v45, %v7317_v6  ;;  %v5234_v6 = vld [vmem:[%s8155_s9 + $0x8] sm:$0xff] }
0x40f8   :  { %v6582_v16 = vpack.c.bf16 %v5234_v6, %v5233_v30 }
0x40f9   :  { %v5187_v35 = vsel %vm138_vm5, %v5186_v29, %v5182_v27 }
0x40fa   :  { %v5189_v13 = vsel %vm924_vm11, %v5187_v35, 0.0  ;;  %6583 = vmatpush3.bf16.msra.mxu0 %v6582_v16 }
0x40fb   :  { %5190 = vadd.xlane.f32.xlu1 %v5189_v13  ;;  %6584 = vmatprep.subr.bf16.mxu0 %v6941_v0 }
0x4188   :  { %v5191_v32 = vpop.xlane.xlu1 %5190 }
0x4189   :  { %v5196_v14 = vrot.slane %v5191_v32, %v7298_v46  ;;  %v5200_v34 = vrot.slane %v5191_v32, %v7324_v20  ;;  %v5235_v46 = vld [vmem:[%s8155_s9 + $0x10] sm:$0xff]  ;;  %v5236_v20 = vld [vmem:[%s8155_s9 + $0x18] sm:$0xff] }
0x418a   :  { %v6585_v53 = vpack.c.bf16 %v5236_v20, %v5235_v46 }
0x418b   :  { %6780 = vrcp.f32 %v5196_v14 }
0x418c   :  { %6782 = vrcp.f32 %v5200_v34  ;;  %6586 = vmatpush3.bf16.msra.mxu0 %v6585_v53 }
0x4195   :  { %v6781_v49 = vpop.eup %6780 }
0x4196   :  { %v5204_v15 = vmul.f32 %v6781_v49, %v6777_v11  ;;  %v6783_v8 = vpop.eup %6782 }
0x4197   :  { %v5206_v22 = vmul.f32 %v6783_v8, %v6779_v12 }
0x4198   :  { %5209 = vperm.xlu0 %6607, %v5204_v15  }
0x419c   :  { %5214 = vperm.xlu0 %6607, %v5206_v22  }
0x41a0   :  { %5316 = vrot.lane.b32.xlu0 %v8061_v33, %s6947_s4 }
0x4217   :  { %v5210_v58 = vpop.permute.xlu0 %5209 }
0x4218   :  { %v5217_v2 = vmul.f32 %v7936_v23, %v5210_v58  ;;  %v5414_v61 = vrot.slane %v5210_v58, %v7417_v36 }
0x421a   :  { %v5219_v24 = vsel %vm140_vm6, %v5217_v2, 0.0 }
0x421b   :  { %v5220_v31 = vrot.slane %v5219_v24, 4  ;;  %v5215_v60 = vpop.permute.xlu0 %5214 }
0x421c   :  { %v5218_v0 = vmul.f32 %v7941_v51, %v5215_v60  ;;  %v5418_v39 = vrot.slane %v5215_v60, %v7417_v36 }
0x421d   :  { %v5221_v33 = vadd.f32 %v5220_v31, %v5219_v24 }
0x421e   :  { %v5226_v42 = vsel %vm140_vm6, %v5218_v0, 0.0  ;;  %v5419_v9 = vsel %vm138_vm5, %v5418_v39, %v5414_v61 }
0x421f   :  { %v5222_v26 = vrot.slane %v5221_v33, 2  ;;  %v5227_v47 = vrot.slane %v5226_v42, 4  ;;  %v5317_v3 = vpop.permute.xlu0 %5316 }
0x4220   :  { %6295 = vmatmul.mubr.msk.f32.vlgmr.msra.gmra.mrb[48].mxu0 %vm140_vm6, %v5317_v3 }
0x4221   :  { %v5223_v23 = vadd.f32 %v5222_v26, %v5221_v33  ;;  %v5228_v52 = vadd.f32 %v5227_v47, %v5226_v42 }
0x4223   :  { %v5229_v5 = vrot.slane %v5228_v52, 2  ;;  %v5224_v59 = vrot.slane %v5223_v23, 1 }
0x4225   :  { %v5230_v28 = vadd.f32 %v5229_v5, %v5228_v52  ;;  %v5225_v7 = vadd.f32 %v5224_v59, %v5223_v23 }
0x4227   :  { %v5231_v17 = vrot.slane %v5230_v28, 1 }
0x4229   :  { %v5232_v51 = vadd.f32 %v5231_v17, %v5230_v28 }
0x422b   :  { %v5243_v36 = vsel %vm138_vm5, %v5232_v51, %v5225_v7 }
0x422c   :  { %6284 = vmatmul.mubr.msk.f32.vlgmr.msra.gmra.mrb[48].mxu1 %vm140_vm6, %v5243_v36 }
0x42f3   :  { %v5386_v25 = vpop.f32.mrb[48].mxu0 }
0x42f4   :  { %v6296_v43 = vpop.f32.mrb[49].mxu0 }
0x42ff   :  { %v5312_v4 = vpop.f32.mrb[48].mxu1 }
0x4300   :  { %v5387_v56 = vadd.f32 %v5386_v25, %v5312_v4  ;;  %v6285_v21 = vpop.f32.mrb[49].mxu1 }
0x4302   :  { %v5397_v55 = vadd.f32 %v5526_v50, %v5387_v56 }
0x4304   :  { %v5398_v37 = vsel %vm1172_vm12, %v5397_v55, -inf }
0x4305   :  { %5399 = vmax.xlane.f32.xlu0 %v5398_v37 }
0x4392   :  { %v5400_v10 = vpop.xlane.xlu0 %5399 }
0x4393   :  { %v5401_v63 = vsub.f32 %v5397_v55, %v5400_v10 }
0x4395   :  { %v5402_v48 = vmul.f32 1.442695, %v5401_v63 }
0x4397   :  { %6784 = vpow2.f32 %v5402_v48 }
0x43a1   :  { %v6785_v18 = vpop.eup %6784 }
0x43a2   :  { %v5404_v19 = vsel %vm1172_vm12, %v6785_v18, 0.0 }
0x43a3   :  { %5405 = vadd.xlane.f32.xlu1 %v5404_v19 }
0x4430   :  { %v5406_v54 = vpop.xlane.xlu1 %5405 }
0x4431   :  { %6786 = vlog2.f32 %v5406_v54 }
0x443b   :  { %v6787_v11 = vpop.eup %6786 }
0x443c   :  { %v5408_v12 = vmul.f32 0.6931472, %v6787_v11 }
0x443e   :  { %v5409_v41 = vadd.f32 %v5408_v12, %v5400_v10 }
0x4440   :  { %v5410_v45 = vsub.f32 %v5397_v55, %v5409_v41 }
0x4442   :  { %v5421_v27 = vsel %vm213_vm4, %v5410_v45, %v5419_v9 }
0x4443   :  { %v5422_v29 = vsel %vm1198_vm13, %v5421_v27, 0.0 }
0x4444   :  { %5424 = vst [vmem:[#allocation11 + $0x8] sm:$0x3] %v5422_v29 }
0x4445   :  { %6915 = shalt.err (!%p6912_p2)
}
0x4446   :  { %s6916_s22 = scalar_lea.hbm %s8158_s12, 160 }
0x4447   :  { %p6917_p3 = scmp.ne.s32.totalorder %s8158_s12, %s6916_s22  ;;  %p6920_p4 = scmp.lt.u32.totalorder %s6916_s22, %s8158_s12 }
0x4449   :  { %p6922_p5 = pnand %p6920_p4, %p6917_p3 }
0x444b   :  { %6925 = shalt.err (!%p6922_p5)
}
0x444c   :  { %s6952_s18 = smov 2  }
0x444d   :  { %5436 = dma.vmem_to_hbm [thread:$0]  %s5431_s14, 160, %s8158_s12, [#allocation4], %s6947_s4, %s6947_s4, %s6952_s18  }
0x444e   :  { %6932 = dma.done.wait [#allocation4], 160  }
0x444f   :  { %6933 = vsyncadd [#allocation4], 4294967136 }
0x4450   :  { %5440 = vsyncpa [#allocation3], 1 }
0x4451   :  { %5441 = vsyncpa [#allocation6], 1 }
0x4452   :  { %5442 = vsyncpa [#allocation9], 1 }
0x4453   :  { %5443 = vsyncpa [#allocation4], 1 }

</bundles_post_ra>
